<compile_context>
chip_gen: v7x
topology: tpu7x:2x2x1
jax: 0.10.0
libtpu: 0.0.40
codegen_flags: <defaults>
</compile_context>

<pallas_src>
import functools

import jax
import jax.numpy as jnp
from jax.experimental import pallas as pl
from jax.experimental.pallas import tpu as pltpu

DIMS = [3 * 32 * 32, 256, 128, 64, 32, 16, 10]          # true layer widths
PAD_DIMS = [3072, 256, 128, 128, 128, 128, 128]          # lane-dense (>=128) widths
N_LAYERS = 6
TB_MAX = 512                                             # max batch tile (MXU-aligned)


def mlp_kernel(x_ref,
               w1_ref, b1_ref, w2_ref, b2_ref, w3_ref, b3_ref,
               w4_ref, b4_ref, w5_ref, b5_ref, w6_ref, b6_ref,
               o_ref):
    """One (TB, 3072) bf16 batch tile -> (TB, 128) f32 padded logits
    (columns 10..127 are exactly 0)."""

    def layer(h, w_ref, b_ref, apply_relu, to_bf16):
        # Weights are already non-negative (clamped once outside the kernel).
        # bf16 x bf16 -> f32 on the MXU; bias add (+ ReLU) in f32 on the VPU.
        z = jnp.dot(h, w_ref[...], preferred_element_type=jnp.float32) + b_ref[...]
        if apply_relu:
            z = jnp.maximum(z, 0.0)  # RobustReLu with epsilon_a == 0
        return z.astype(jnp.bfloat16) if to_bf16 else z

    h = x_ref[...]                                       # (TB, 3072) bf16
    h = layer(h, w1_ref, b1_ref, True, True)
    h = layer(h, w2_ref, b2_ref, True, True)
    h = layer(h, w3_ref, b3_ref, True, True)
    h = layer(h, w4_ref, b4_ref, True, True)
    h = layer(h, w5_ref, b5_ref, True, True)
    h = layer(h, w6_ref, b6_ref, False, False)           # final layer stays f32
    o_ref[...] = h


def init_params(key):
    """PyTorch-Linear-style init: U(-1/sqrt(fan_in), 1/sqrt(fan_in)).

    Stored as (in_features, out_features) so the forward pass is h @ W + b.
    """
    params = []
    for i in range(N_LAYERS):
        fan_in, fan_out = DIMS[i], DIMS[i + 1]
        key, kw, kb = jax.random.split(key, 3)
        bound = 1.0 / jnp.sqrt(jnp.float32(fan_in))
        w = jax.random.uniform(kw, (fan_in, fan_out), jnp.float32, -bound, bound)
        b = jax.random.uniform(kb, (1, fan_out), jnp.float32, -bound, bound)
        params.append((w, b))
    return params


def prepare_params(params):
    """Clamp weights to >= 0 ONCE (non_negative=True), zero-pad narrow layers
    up to 128 columns / matching rows, and cast weights to bf16 (biases stay
    f32; bias+ReLU run in f32 inside the kernel).

    Zero-padding is numerically exact: padded weight rows/cols AND padded
    bias entries are zero, so padded activation columns are exactly 0 and
    multiply zero weight rows downstream.
    """
    prepared = []
    for i, (w, b) in enumerate(params):
        in_p, out_p = PAD_DIMS[i], PAD_DIMS[i + 1]
        w_nn = jnp.maximum(w, 0.0)                       # non_negative clamp, once
        w_pad = jnp.zeros((in_p, out_p), jnp.float32).at[:w.shape[0], :w.shape[1]].set(w_nn)
        b_pad = jnp.zeros((1, out_p), jnp.float32).at[:, :b.shape[1]].set(b)
        prepared.append((w_pad.astype(jnp.bfloat16), b_pad))
    return prepared


def _round_up(x, m):
    return ((x + m - 1) // m) * m


@jax.jit
def cifar10_mlp_forward(x_nchw, *flat_padded_params):
    """x_nchw: (B, 3, 32, 32) float32. Returns (B, 10) float32 logits."""
    B = x_nchw.shape[0]
    x_flat = x_nchw.reshape(B, -1).astype(jnp.bfloat16)  # same order as torch .view

    # Adaptive batch tile:
    #  * tiny batches pad only to 128 rows (not a full TB_MAX tile),
    #  * larger batches aim for >= 2 grid steps so v7x megacore can shard the
    #    ("parallel",) batch axis over both TensorCores,
    #  * capped at TB_MAX=512 which keeps the working set ~11 MiB of VMEM.
    tb = min(TB_MAX, max(128, _round_up(pl.cdiv(B, 2), 128)))
    B_pad = _round_up(B, tb)
    if B_pad != B:
        x_flat = jnp.pad(x_flat, ((0, B_pad - B), (0, 0)))

    in_specs = [pl.BlockSpec((tb, PAD_DIMS[0]), lambda i: (i, 0))]   # x: batch-tiled
    for p in flat_padded_params:
        # Weights / biases: full-array blocks, constant index_map -> VMEM-resident.
        in_specs.append(pl.BlockSpec(p.shape, lambda i: (0, 0)))

    out = pl.pallas_call(
        mlp_kernel,
        out_shape=jax.ShapeDtypeStruct((B_pad, PAD_DIMS[-1]), jnp.float32),
        grid=(B_pad // tb,),
        in_specs=in_specs,
        out_specs=pl.BlockSpec((tb, PAD_DIMS[-1]), lambda i: (i, 0)),
        compiler_params=pltpu.CompilerParams(
            dimension_semantics=("parallel",),           # megacore split on v7x
            vmem_limit_bytes=32 << 20,                   # ~11 MiB used; safe on all gens
        ),
    )(x_flat, *flat_padded_params)

    return out[:B, :DIMS[-1]]


def reference_forward(x_nchw, params):
    """Plain-JAX reference with the same bf16 cast pattern as the kernel."""
    h = x_nchw.reshape(x_nchw.shape[0], -1).astype(jnp.bfloat16)
    for i, (w, b) in enumerate(params):
        w_bf = jnp.maximum(w, 0.0).astype(jnp.bfloat16)
        z = jnp.dot(h, w_bf, preferred_element_type=jnp.float32) + b
        if i < N_LAYERS - 1:
            h = jnp.maximum(z, 0.0).astype(jnp.bfloat16)
        else:
            h = z
    return h


if __name__ == "__main__":
    key = jax.random.PRNGKey(0)
    key, kx = jax.random.split(key)
    # Small batch; spatial/channel dims are fixed by fc1 (32*32*3 inputs).
    x = jax.random.normal(kx, (2, 3, 32, 32), jnp.float32)

    params = init_params(key)
    padded_params = prepare_params(params)
    flat_padded = [p for wb in padded_params for p in wb]

    out = cifar10_mlp_forward(x, *flat_padded)
    out = jax.block_until_ready(out)

    ref = reference_forward(x, params)
    assert out.shape == (2, 10)
    assert out.dtype == jnp.float32
    assert jnp.allclose(out, ref, atol=1e-2, rtol=1e-2), (
        f"max abs diff {jnp.max(jnp.abs(out - ref))}")

    print("KERNEL_OK")
</pallas_src>

<mosaic_0001>
module attributes {stable_mosaic.version = 11 : i64} {
  func.func @mlp_kernel(%arg0: i32, %arg1: memref<128x3072xbf16, #tpu.memory_space<vmem>>, %arg2: memref<3072x256xbf16, #tpu.memory_space<vmem>>, %arg3: memref<1x256xf32, #tpu.memory_space<vmem>>, %arg4: memref<256x128xbf16, #tpu.memory_space<vmem>>, %arg5: memref<1x128xf32, #tpu.memory_space<vmem>>, %arg6: memref<128x128xbf16, #tpu.memory_space<vmem>>, %arg7: memref<1x128xf32, #tpu.memory_space<vmem>>, %arg8: memref<128x128xbf16, #tpu.memory_space<vmem>>, %arg9: memref<1x128xf32, #tpu.memory_space<vmem>>, %arg10: memref<128x128xbf16, #tpu.memory_space<vmem>>, %arg11: memref<1x128xf32, #tpu.memory_space<vmem>>, %arg12: memref<128x128xbf16, #tpu.memory_space<vmem>>, %arg13: memref<1x128xf32, #tpu.memory_space<vmem>>, %arg14: memref<128x128xf32, #tpu.memory_space<vmem>>) attributes {dimension_semantics = [#tpu.dimension_semantics<parallel>], iteration_bounds = array<i64: 1>, scalar_prefetch = 0 : i64, scratch_operands = 0 : i64, tpu.core_type = #tpu.core_type<tc>, window_params = [{transform_indices = @transform_0, window_bounds = array<i64: 128, 3072>}, {pipeline_mode = #tpu.pipeline_mode<synchronous>, transform_indices = @transform_1, window_bounds = array<i64: 3072, 256>}, {pipeline_mode = #tpu.pipeline_mode<synchronous>, transform_indices = @transform_2, window_bounds = array<i64: 1, 256>}, {pipeline_mode = #tpu.pipeline_mode<synchronous>, transform_indices = @transform_3, window_bounds = array<i64: 256, 128>}, {pipeline_mode = #tpu.pipeline_mode<synchronous>, transform_indices = @transform_4, window_bounds = array<i64: 1, 128>}, {pipeline_mode = #tpu.pipeline_mode<synchronous>, transform_indices = @transform_5, window_bounds = array<i64: 128, 128>}, {pipeline_mode = #tpu.pipeline_mode<synchronous>, transform_indices = @transform_6, window_bounds = array<i64: 1, 128>}, {pipeline_mode = #tpu.pipeline_mode<synchronous>, transform_indices = @transform_7, window_bounds = array<i64: 128, 128>}, {pipeline_mode = #tpu.pipeline_mode<synchronous>, transform_indices = @transform_8, window_bounds = array<i64: 1, 128>}, {pipeline_mode = #tpu.pipeline_mode<synchronous>, transform_indices = @transform_9, window_bounds = array<i64: 128, 128>}, {pipeline_mode = #tpu.pipeline_mode<synchronous>, transform_indices = @transform_10, window_bounds = array<i64: 1, 128>}, {pipeline_mode = #tpu.pipeline_mode<synchronous>, transform_indices = @transform_11, window_bounds = array<i64: 128, 128>}, {pipeline_mode = #tpu.pipeline_mode<synchronous>, transform_indices = @transform_12, window_bounds = array<i64: 1, 128>}, {transform_indices = @transform_13, window_bounds = array<i64: 128, 128>}]} {
    %c0 = arith.constant 0 : index
    %c0_0 = arith.constant 0 : index
    %0 = vector.load %arg1[%c0, %c0_0] : memref<128x3072xbf16, #tpu.memory_space<vmem>>, vector<128x3072xbf16>
    %c0_1 = arith.constant 0 : index
    %c0_2 = arith.constant 0 : index
    %1 = vector.load %arg2[%c0_1, %c0_2] : memref<3072x256xbf16, #tpu.memory_space<vmem>>, vector<3072x256xbf16>
    %cst = arith.constant dense<0.000000e+00> : vector<128x256xf32>
    %2 = tpu.matmul %0, %1, %cst {dimension_numbers = #tpu.dot_dimension_numbers<[1], [0], [0], [1], [0, 0, 1, 1], [], []>} : vector<128x3072xbf16>, vector<3072x256xbf16>, vector<128x256xf32> -> vector<128x256xf32>
    %c0_3 = arith.constant 0 : index
    %c0_4 = arith.constant 0 : index
    %3 = vector.load %arg3[%c0_3, %c0_4] : memref<1x256xf32, #tpu.memory_space<vmem>>, vector<1x256xf32>
    %4 = vector.broadcast %3 : vector<1x256xf32> to vector<128x256xf32>
    %5 = arith.addf %2, %4 : vector<128x256xf32>
    %cst_5 = arith.constant 0.000000e+00 : f32
    %6 = vector.broadcast %cst_5 : f32 to vector<128x256xf32>
    %7 = arith.maximumf %5, %6 : vector<128x256xf32>
    %8 = arith.truncf %7 : vector<128x256xf32> to vector<128x256xbf16>
    %c0_6 = arith.constant 0 : index
    %c0_7 = arith.constant 0 : index
    %9 = vector.load %arg4[%c0_6, %c0_7] : memref<256x128xbf16, #tpu.memory_space<vmem>>, vector<256x128xbf16>
    %cst_8 = arith.constant dense<0.000000e+00> : vector<128x128xf32>
    %10 = tpu.matmul %8, %9, %cst_8 {dimension_numbers = #tpu.dot_dimension_numbers<[1], [0], [0], [1], [0, 0, 1, 1], [], []>} : vector<128x256xbf16>, vector<256x128xbf16>, vector<128x128xf32> -> vector<128x128xf32>
    %c0_9 = arith.constant 0 : index
    %c0_10 = arith.constant 0 : index
    %11 = vector.load %arg5[%c0_9, %c0_10] : memref<1x128xf32, #tpu.memory_space<vmem>>, vector<1x128xf32>
    %12 = vector.broadcast %11 : vector<1x128xf32> to vector<128x128xf32>
    %13 = arith.addf %10, %12 : vector<128x128xf32>
    %cst_11 = arith.constant 0.000000e+00 : f32
    %14 = vector.broadcast %cst_11 : f32 to vector<128x128xf32>
    %15 = arith.maximumf %13, %14 : vector<128x128xf32>
    %16 = arith.truncf %15 : vector<128x128xf32> to vector<128x128xbf16>
    %c0_12 = arith.constant 0 : index
    %c0_13 = arith.constant 0 : index
    %17 = vector.load %arg6[%c0_12, %c0_13] : memref<128x128xbf16, #tpu.memory_space<vmem>>, vector<128x128xbf16>
    %cst_14 = arith.constant dense<0.000000e+00> : vector<128x128xf32>
    %18 = tpu.matmul %16, %17, %cst_14 {dimension_numbers = #tpu.dot_dimension_numbers<[1], [0], [0], [1], [0, 0, 1, 1], [], []>} : vector<128x128xbf16>, vector<128x128xbf16>, vector<128x128xf32> -> vector<128x128xf32>
    %c0_15 = arith.constant 0 : index
    %c0_16 = arith.constant 0 : index
    %19 = vector.load %arg7[%c0_15, %c0_16] : memref<1x128xf32, #tpu.memory_space<vmem>>, vector<1x128xf32>
    %20 = vector.broadcast %19 : vector<1x128xf32> to vector<128x128xf32>
    %21 = arith.addf %18, %20 : vector<128x128xf32>
    %cst_17 = arith.constant 0.000000e+00 : f32
    %22 = vector.broadcast %cst_17 : f32 to vector<128x128xf32>
    %23 = arith.maximumf %21, %22 : vector<128x128xf32>
    %24 = arith.truncf %23 : vector<128x128xf32> to vector<128x128xbf16>
    %c0_18 = arith.constant 0 : index
    %c0_19 = arith.constant 0 : index
    %25 = vector.load %arg8[%c0_18, %c0_19] : memref<128x128xbf16, #tpu.memory_space<vmem>>, vector<128x128xbf16>
    %cst_20 = arith.constant dense<0.000000e+00> : vector<128x128xf32>
    %26 = tpu.matmul %24, %25, %cst_20 {dimension_numbers = #tpu.dot_dimension_numbers<[1], [0], [0], [1], [0, 0, 1, 1], [], []>} : vector<128x128xbf16>, vector<128x128xbf16>, vector<128x128xf32> -> vector<128x128xf32>
    %c0_21 = arith.constant 0 : index
    %c0_22 = arith.constant 0 : index
    %27 = vector.load %arg9[%c0_21, %c0_22] : memref<1x128xf32, #tpu.memory_space<vmem>>, vector<1x128xf32>
    %28 = vector.broadcast %27 : vector<1x128xf32> to vector<128x128xf32>
    %29 = arith.addf %26, %28 : vector<128x128xf32>
    %cst_23 = arith.constant 0.000000e+00 : f32
    %30 = vector.broadcast %cst_23 : f32 to vector<128x128xf32>
    %31 = arith.maximumf %29, %30 : vector<128x128xf32>
    %32 = arith.truncf %31 : vector<128x128xf32> to vector<128x128xbf16>
    %c0_24 = arith.constant 0 : index
    %c0_25 = arith.constant 0 : index
    %33 = vector.load %arg10[%c0_24, %c0_25] : memref<128x128xbf16, #tpu.memory_space<vmem>>, vector<128x128xbf16>
    %cst_26 = arith.constant dense<0.000000e+00> : vector<128x128xf32>
    %34 = tpu.matmul %32, %33, %cst_26 {dimension_numbers = #tpu.dot_dimension_numbers<[1], [0], [0], [1], [0, 0, 1, 1], [], []>} : vector<128x128xbf16>, vector<128x128xbf16>, vector<128x128xf32> -> vector<128x128xf32>
    %c0_27 = arith.constant 0 : index
    %c0_28 = arith.constant 0 : index
    %35 = vector.load %arg11[%c0_27, %c0_28] : memref<1x128xf32, #tpu.memory_space<vmem>>, vector<1x128xf32>
    %36 = vector.broadcast %35 : vector<1x128xf32> to vector<128x128xf32>
    %37 = arith.addf %34, %36 : vector<128x128xf32>
    %cst_29 = arith.constant 0.000000e+00 : f32
    %38 = vector.broadcast %cst_29 : f32 to vector<128x128xf32>
    %39 = arith.maximumf %37, %38 : vector<128x128xf32>
    %40 = arith.truncf %39 : vector<128x128xf32> to vector<128x128xbf16>
    %c0_30 = arith.constant 0 : index
    %c0_31 = arith.constant 0 : index
    %41 = vector.load %arg12[%c0_30, %c0_31] : memref<128x128xbf16, #tpu.memory_space<vmem>>, vector<128x128xbf16>
    %cst_32 = arith.constant dense<0.000000e+00> : vector<128x128xf32>
    %42 = tpu.matmul %40, %41, %cst_32 {dimension_numbers = #tpu.dot_dimension_numbers<[1], [0], [0], [1], [0, 0, 1, 1], [], []>} : vector<128x128xbf16>, vector<128x128xbf16>, vector<128x128xf32> -> vector<128x128xf32>
    %c0_33 = arith.constant 0 : index
    %c0_34 = arith.constant 0 : index
    %43 = vector.load %arg13[%c0_33, %c0_34] : memref<1x128xf32, #tpu.memory_space<vmem>>, vector<1x128xf32>
    %44 = vector.broadcast %43 : vector<1x128xf32> to vector<128x128xf32>
    %45 = arith.addf %42, %44 : vector<128x128xf32>
    %c0_35 = arith.constant 0 : index
    %c0_36 = arith.constant 0 : index
    %46 = vector.load %arg14[%c0_35, %c0_36] : memref<128x128xf32, #tpu.memory_space<vmem>>, vector<128x128xf32>
    tpu.vector_store %arg14[%c0_35, %c0_36], %45 {strides = array<i32>} : memref<128x128xf32, #tpu.memory_space<vmem>>, vector<128x128xf32>,
    return
  }
  func.func @transform_0(%arg0: i32) -> (i32, i32) {
    %c0_i32 = arith.constant 0 : i32
    %c0_i32_0 = arith.constant 0 : i32
    return %arg0, %c0_i32 : i32, i32
  }
  func.func @transform_1(%arg0: i32) -> (i32, i32) {
    %c0_i32 = arith.constant 0 : i32
    %c0_i32_0 = arith.constant 0 : i32
    %c0_i32_1 = arith.constant 0 : i32
    return %c0_i32, %c0_i32_0 : i32, i32
  }
  func.func @transform_2(%arg0: i32) -> (i32, i32) {
    %c0_i32 = arith.constant 0 : i32
    %c0_i32_0 = arith.constant 0 : i32
    %c0_i32_1 = arith.constant 0 : i32
    return %c0_i32, %c0_i32_0 : i32, i32
  }
  func.func @transform_3(%arg0: i32) -> (i32, i32) {
    %c0_i32 = arith.constant 0 : i32
    %c0_i32_0 = arith.constant 0 : i32
    %c0_i32_1 = arith.constant 0 : i32
    return %c0_i32, %c0_i32_0 : i32, i32
  }
  func.func @transform_4(%arg0: i32) -> (i32, i32) {
    %c0_i32 = arith.constant 0 : i32
    %c0_i32_0 = arith.constant 0 : i32
    %c0_i32_1 = arith.constant 0 : i32
    return %c0_i32, %c0_i32_0 : i32, i32
  }
  func.func @transform_5(%arg0: i32) -> (i32, i32) {
    %c0_i32 = arith.constant 0 : i32
    %c0_i32_0 = arith.constant 0 : i32
    %c0_i32_1 = arith.constant 0 : i32
    return %c0_i32, %c0_i32_0 : i32, i32
  }
  func.func @transform_6(%arg0: i32) -> (i32, i32) {
    %c0_i32 = arith.constant 0 : i32
    %c0_i32_0 = arith.constant 0 : i32
    %c0_i32_1 = arith.constant 0 : i32
    return %c0_i32, %c0_i32_0 : i32, i32
  }
  func.func @transform_7(%arg0: i32) -> (i32, i32) {
    %c0_i32 = arith.constant 0 : i32
    %c0_i32_0 = arith.constant 0 : i32
    %c0_i32_1 = arith.constant 0 : i32
    return %c0_i32, %c0_i32_0 : i32, i32
  }
  func.func @transform_8(%arg0: i32) -> (i32, i32) {
    %c0_i32 = arith.constant 0 : i32
    %c0_i32_0 = arith.constant 0 : i32
    %c0_i32_1 = arith.constant 0 : i32
    return %c0_i32, %c0_i32_0 : i32, i32
  }
  func.func @transform_9(%arg0: i32) -> (i32, i32) {
    %c0_i32 = arith.constant 0 : i32
    %c0_i32_0 = arith.constant 0 : i32
    %c0_i32_1 = arith.constant 0 : i32
    return %c0_i32, %c0_i32_0 : i32, i32
  }
  func.func @transform_10(%arg0: i32) -> (i32, i32) {
    %c0_i32 = arith.constant 0 : i32
    %c0_i32_0 = arith.constant 0 : i32
    %c0_i32_1 = arith.constant 0 : i32
    return %c0_i32, %c0_i32_0 : i32, i32
  }
  func.func @transform_11(%arg0: i32) -> (i32, i32) {
    %c0_i32 = arith.constant 0 : i32
    %c0_i32_0 = arith.constant 0 : i32
    %c0_i32_1 = arith.constant 0 : i32
    return %c0_i32, %c0_i32_0 : i32, i32
  }
  func.func @transform_12(%arg0: i32) -> (i32, i32) {
    %c0_i32 = arith.constant 0 : i32
    %c0_i32_0 = arith.constant 0 : i32
    %c0_i32_1 = arith.constant 0 : i32
    return %c0_i32, %c0_i32_0 : i32, i32
  }
  func.func @transform_13(%arg0: i32) -> (i32, i32) {
    %c0_i32 = arith.constant 0 : i32
    %c0_i32_0 = arith.constant 0 : i32
    return %arg0, %c0_i32 : i32, i32
  }
}

</mosaic_0001>

<bundles_post_ra>
// kernel: cifar10_mlp_forward.1
= control target key start
LH: loop header
LB: loop body
LE: loop exit
PB: predicated region body
PF: predicated region fallthrough
CT: control target
= control target key end

     0   :  { %18 = vsyncpa [#allocation3], 0  ;;  %s9592_s0 = inlined_call_operand.vmem [shape: bf16[128,3072], index: 0, kind: input, shape index: {}]   ;;  %s9593_s1 = inlined_call_operand.hbm [shape: bf16[3072,256], index: 1, kind: input, shape index: {}]   ;;  %s9594_s2 = inlined_call_operand.hbm [shape: f32[1,256], index: 2, kind: input, shape index: {}]   ;;  %s9595_s3 = inlined_call_operand.hbm [shape: bf16[256,128], index: 3, kind: input, shape index: {}]   ;;  %s9596_s4 = inlined_call_operand.hbm [shape: f32[1,128], index: 4, kind: input, shape index: {}]   ;;  %s9597_s5 = inlined_call_operand.hbm [shape: bf16[128,128], index: 5, kind: input, shape index: {}]   ;;  %s9598_s6 = inlined_call_operand.hbm [shape: f32[1,128], index: 6, kind: input, shape index: {}]   ;;  %s9599_s7 = inlined_call_operand.hbm [shape: bf16[128,128], index: 7, kind: input, shape index: {}]   ;;  %s9600_s8 = inlined_call_operand.hbm [shape: f32[1,128], index: 8, kind: input, shape index: {}]   ;;  %s9601_s9 = inlined_call_operand.hbm [shape: bf16[128,128], index: 9, kind: input, shape index: {}]   ;;  %s9602_s10 = inlined_call_operand.hbm [shape: f32[1,128], index: 10, kind: input, shape index: {}]   ;;  %s9603_s11 = inlined_call_operand.hbm [shape: bf16[128,128], index: 11, kind: input, shape index: {}]   ;;  %s9604_s12 = inlined_call_operand.hbm [shape: f32[1,128], index: 12, kind: input, shape index: {}]   ;;  %s9605_s13 = inlined_call_operand.vmem [shape: f32[128,128], index: 13, kind: output, shape index: {}]  }
   0x1   :  { %19 = vsyncpa [#allocation5], 0 }
   0x2   :  { %20 = vsyncpa [#allocation8], 0 }
   0x3   :  { %21 = vsyncpa [#allocation11], 0 }
   0x4   :  { %22 = vsyncpa [#allocation14], 0 }
   0x5   :  { %23 = vsyncpa [#allocation17], 0 }
   0x6   :  { %24 = vsyncpa [#allocation20], 0  ;;  %s8314_s25 = smov [#allocation4]   ;;  %s8315_s27 = smov [#allocation7]  }
   0x7   :  { %s45_s26 = sshll.u32 %s8314_s25, 4  ;;  %s67_s28 = sshll.u32 %s8315_s27, 4  ;;  %s46_s26 = int_to_ptr.vmem [resolvable:$true] %s45_s26  ;;  %s68_s28 = int_to_ptr.vmem [resolvable:$true] %s67_s28 }
   0x8   :  { %s8036_s14 = scalar_lea.hbm %s9594_s2, 32 }
   0x9   :  { %p8037_p0 = scmp.ne.s32.totalorder %s9594_s2, %s8036_s14  ;;  %p8040_p1 = scmp.lt.u32.totalorder %s8036_s14, %s9594_s2 }
   0xb   :  { %p8042_p2 = pnand %p8040_p1, %p8037_p0 }
   0xd   :  { %8045 = shalt.err (!%p8042_p2)
}
   0xe   :  { %s8046_s19 = scalar_lea.vmem %s46_s26, 32  ;;  %p8051_p4 = scmp.lt.s32.totalorder %s46_s26, %s46_s26 }
   0xf   :  { %p8047_p3 = scmp.ne.s32.totalorder %s46_s26, %s8046_s19  ;;  %p8052_p5 = scmp.lt.s32.totalorder %s8046_s19, %s8046_s19 }
  0x11   :  { %p8053_p6 = por %p8052_p5, %p8051_p4 }
  0x13   :  { %p8054_p7 = pnand %p8053_p6, %p8047_p3 }
  0x15   :  { %8057 = shalt.err (!%p8054_p7)
}
  0x16   :  { %48 = dma.hbm_to_vmem [thread:$0]  %s9594_s2, 32, %s46_s26, [#allocation5]  }
  0x17   :  { %s8058_s24 = scalar_lea.hbm %s9596_s4, 16 }
  0x18   :  { %p8059_p8 = scmp.ne.s32.totalorder %s9596_s4, %s8058_s24  ;;  %p8062_p9 = scmp.lt.u32.totalorder %s8058_s24, %s9596_s4 }
  0x1a   :  { %p8064_p10 = pnand %p8062_p9, %p8059_p8 }
  0x1c   :  { %8067 = shalt.err (!%p8064_p10)
}
  0x1d   :  { %s8068_s14 = scalar_lea.vmem %s68_s28, 16  ;;  %s8072_s15 = scalar_lea.vmem %s68_s28, 32 }
  0x1e   :  { %p8069_p11 = scmp.ne.s32.totalorder %s68_s28, %s8068_s14  ;;  %p8073_p12 = scmp.lt.s32.totalorder %s68_s28, %s68_s28 }
  0x1f   :  { %p8074_p13 = scmp.lt.s32.totalorder %s8072_s15, %s8068_s14 }
  0x21   :  { %p8075_p0 = por %p8074_p13, %p8073_p12 }
  0x23   :  { %p8076_p1 = pnand %p8075_p0, %p8069_p11 }
  0x25   :  { %8079 = shalt.err (!%p8076_p1)
}
  0x26   :  { %70 = dma.hbm_to_vmem [thread:$0]  %s9596_s4, 16, %s68_s28, [#allocation8]  }
  0x27   :  { %s8316_s16 = smov [#allocation10]   ;;  %s8317_s18 = smov [#allocation13]  }
  0x28   :  { %s89_s17 = sshll.u32 %s8316_s16, 4  ;;  %s111_s19 = sshll.u32 %s8317_s18, 4  ;;  %s90_s17 = int_to_ptr.vmem [resolvable:$true] %s89_s17  ;;  %s112_s19 = int_to_ptr.vmem [resolvable:$true] %s111_s19 }
  0x29   :  { %s8080_s22 = scalar_lea.hbm %s9598_s6, 16 }
  0x2a   :  { %p8081_p2 = scmp.ne.s32.totalorder %s9598_s6, %s8080_s22  ;;  %p8084_p3 = scmp.lt.u32.totalorder %s8080_s22, %s9598_s6 }
  0x2c   :  { %p8086_p4 = pnand %p8084_p3, %p8081_p2 }
  0x2e   :  { %8089 = shalt.err (!%p8086_p4)
}
  0x2f   :  { %s8090_s4 = scalar_lea.vmem %s90_s17, 16  ;;  %s8094_s28 = scalar_lea.vmem %s90_s17, 32 }
  0x30   :  { %p8091_p5 = scmp.ne.s32.totalorder %s90_s17, %s8090_s4  ;;  %p8095_p6 = scmp.lt.s32.totalorder %s90_s17, %s90_s17 }
  0x31   :  { %p8096_p7 = scmp.lt.s32.totalorder %s8094_s28, %s8090_s4 }
  0x33   :  { %p8097_p8 = por %p8096_p7, %p8095_p6 }
  0x35   :  { %p8098_p9 = pnand %p8097_p8, %p8091_p5 }
  0x37   :  { %8101 = shalt.err (!%p8098_p9)
}
  0x38   :  { %92 = dma.hbm_to_vmem [thread:$0]  %s9598_s6, 16, %s90_s17, [#allocation11]  }
  0x39   :  { %s8102_s2 = scalar_lea.hbm %s9600_s8, 16 }
  0x3a   :  { %p8103_p10 = scmp.ne.s32.totalorder %s9600_s8, %s8102_s2  ;;  %p8106_p11 = scmp.lt.u32.totalorder %s8102_s2, %s9600_s8 }
  0x3c   :  { %p8108_p12 = pnand %p8106_p11, %p8103_p10 }
  0x3e   :  { %8111 = shalt.err (!%p8108_p12)
}
  0x3f   :  { %s8112_s21 = scalar_lea.vmem %s112_s19, 16  ;;  %s8116_s22 = scalar_lea.vmem %s112_s19, 32 }
  0x40   :  { %p8113_p13 = scmp.ne.s32.totalorder %s112_s19, %s8112_s21  ;;  %p8117_p0 = scmp.lt.s32.totalorder %s112_s19, %s112_s19 }
  0x41   :  { %p8118_p1 = scmp.lt.s32.totalorder %s8116_s22, %s8112_s21 }
  0x43   :  { %p8119_p2 = por %p8118_p1, %p8117_p0 }
  0x45   :  { %p8120_p3 = pnand %p8119_p2, %p8113_p13 }
  0x47   :  { %8123 = shalt.err (!%p8120_p3)
}
  0x48   :  { %114 = dma.hbm_to_vmem [thread:$0]  %s9600_s8, 16, %s112_s19, [#allocation14]  }
  0x49   :  { %s8318_s23 = smov [#allocation16]   ;;  %s8319_s25 = smov [#allocation2]  }
  0x4a   :  { %s133_s24 = sshll.u32 %s8318_s23, 4  ;;  %s32_s27 = sshll.u32 %s8319_s25, 4  ;;  %s134_s24 = int_to_ptr.vmem [resolvable:$true] %s133_s24  ;;  %s8448_s27 = int_to_ptr.vmem [resolvable:$true] %s32_s27 }
  0x4b   :  { %s8124_s29 = scalar_lea.hbm %s9602_s10, 16 }
  0x4c   :  { %p8125_p4 = scmp.ne.s32.totalorder %s9602_s10, %s8124_s29  ;;  %p8128_p5 = scmp.lt.u32.totalorder %s8124_s29, %s9602_s10 }
  0x4e   :  { %p8130_p6 = pnand %p8128_p5, %p8125_p4 }
  0x50   :  { %8133 = shalt.err (!%p8130_p6)
}
  0x51   :  { %s8134_s8 = scalar_lea.vmem %s134_s24, 16  ;;  %s8138_s19 = scalar_lea.vmem %s134_s24, 32 }
  0x52   :  { %p8135_p7 = scmp.ne.s32.totalorder %s134_s24, %s8134_s8  ;;  %p8139_p8 = scmp.lt.s32.totalorder %s134_s24, %s134_s24 }
  0x53   :  { %p8140_p9 = scmp.lt.s32.totalorder %s8138_s19, %s8134_s8 }
  0x55   :  { %p8141_p10 = por %p8140_p9, %p8139_p8 }
  0x57   :  { %p8142_p11 = pnand %p8141_p10, %p8135_p7 }
  0x59   :  { %8145 = shalt.err (!%p8142_p11)
}
  0x5a   :  { %136 = dma.hbm_to_vmem [thread:$0]  %s9602_s10, 16, %s134_s24, [#allocation17]  }
  0x5b   :  { %s8146_s21 = scalar_lea.hbm %s9593_s1, 49152 }
  0x5c   :  { %p8147_p12 = scmp.ne.s32.totalorder %s9593_s1, %s8146_s21  ;;  %p8150_p13 = scmp.lt.u32.totalorder %s8146_s21, %s9593_s1 }
  0x5e   :  { %p8152_p0 = pnand %p8150_p13, %p8147_p12 }
  0x60   :  { %8155 = shalt.err (!%p8152_p0)
}
  0x61   :  { %s8156_s25 = scalar_lea.vmem %s8448_s27, 49152  ;;  %p8161_p2 = scmp.lt.s32.totalorder %s8448_s27, %s8448_s27 }
  0x62   :  { %p8157_p1 = scmp.ne.s32.totalorder %s8448_s27, %s8156_s25  ;;  %p8162_p3 = scmp.lt.s32.totalorder %s8156_s25, %s8156_s25 }
  0x64   :  { %p8163_p4 = por %p8162_p3, %p8161_p2 }
  0x66   :  { %p8164_p5 = pnand %p8163_p4, %p8157_p1 }
  0x68   :  { %8167 = shalt.err (!%p8164_p5)
}
  0x69   :  { %s8320_s10 = smov 128   ;;  %s8321_s24 = smov 8  }
  0x6a   :  { %38 = dma.hbm_to_vmem [thread:$0]  %s9593_s1, 49152, %s8448_s27, [#allocation3], %s8320_s10, %s8320_s10, %s8321_s24  }
  0x6b   :  { %s8322_s29 = smov [#allocation6]   ;;  %s8168_s2 = scalar_lea.hbm %s9595_s3, 2048 }
  0x6c   :  { %s54_s30 = sshll.u32 %s8322_s29, 4  ;;  %p8169_p6 = scmp.ne.s32.totalorder %s9595_s3, %s8168_s2  ;;  %s55_s30 = int_to_ptr.vmem [resolvable:$true] %s54_s30 }
  0x6d   :  { %p8172_p7 = scmp.lt.u32.totalorder %s8168_s2, %s9595_s3 }
  0x6f   :  { %p8174_p8 = pnand %p8172_p7, %p8169_p6 }
  0x71   :  { %8177 = shalt.err (!%p8174_p8)
}
  0x72   :  { %s8178_s18 = scalar_lea.vmem %s55_s30, 2048  ;;  %p8183_p10 = scmp.lt.s32.totalorder %s55_s30, %s55_s30 }
  0x73   :  { %p8179_p9 = scmp.ne.s32.totalorder %s55_s30, %s8178_s18  ;;  %p8184_p11 = scmp.lt.s32.totalorder %s8178_s18, %s8178_s18 }
  0x75   :  { %p8185_p12 = por %p8184_p11, %p8183_p10 }
  0x77   :  { %p8186_p13 = pnand %p8185_p12, %p8179_p9 }
  0x79   :  { %8189 = shalt.err (!%p8186_p13)
}
  0x7a   :  { %s8323_s1 = smov 64   ;;  %s8324_s27 = smov 4  }
  0x7b   :  { %60 = dma.hbm_to_vmem [thread:$0]  %s9595_s3, 2048, %s55_s30, [#allocation5], %s8323_s1, %s8323_s1, %s8324_s27  }
  0x7c   :  { %s8325_s22 = smov [#allocation9]   ;;  %s8326_s17 = smov [#allocation12]  }
  0x7d   :  { %s76_s6 = sshll.u32 %s8325_s22, 4  ;;  %s98_s23 = sshll.u32 %s8326_s17, 4  ;;  %s77_s6 = int_to_ptr.vmem [resolvable:$true] %s76_s6  ;;  %s99_s23 = int_to_ptr.vmem [resolvable:$true] %s98_s23 }
  0x7e   :  { %s8190_s24 = scalar_lea.hbm %s9597_s5, 1024 }
  0x7f   :  { %p8191_p0 = scmp.ne.s32.totalorder %s9597_s5, %s8190_s24  ;;  %p8194_p1 = scmp.lt.u32.totalorder %s8190_s24, %s9597_s5 }
  0x81   :  { %p8196_p2 = pnand %p8194_p1, %p8191_p0 }
  0x83   :  { %8199 = shalt.err (!%p8196_p2)
}
  0x84   :  { %s8200_s3 = scalar_lea.vmem %s77_s6, 1024  ;;  %p8205_p4 = scmp.lt.s32.totalorder %s77_s6, %s77_s6 }
  0x85   :  { %p8201_p3 = scmp.ne.s32.totalorder %s77_s6, %s8200_s3  ;;  %p8206_p5 = scmp.lt.s32.totalorder %s8200_s3, %s8200_s3 }
  0x87   :  { %p8207_p6 = por %p8206_p5, %p8205_p4 }
  0x89   :  { %p8208_p7 = pnand %p8207_p6, %p8201_p3 }
  0x8b   :  { %8211 = shalt.err (!%p8208_p7)
}
  0x8c   :  { %82 = dma.hbm_to_vmem [thread:$0]  %s9597_s5, 1024, %s77_s6, [#allocation8], %s8323_s1, %s8323_s1, %s8324_s27  }
  0x8d   :  { %s8212_s19 = scalar_lea.hbm %s9599_s7, 1024 }
  0x8e   :  { %p8213_p8 = scmp.ne.s32.totalorder %s9599_s7, %s8212_s19  ;;  %p8216_p9 = scmp.lt.u32.totalorder %s8212_s19, %s9599_s7 }
  0x90   :  { %p8218_p10 = pnand %p8216_p9, %p8213_p8 }
  0x92   :  { %8221 = shalt.err (!%p8218_p10)
}
  0x93   :  { %s8222_s21 = scalar_lea.vmem %s99_s23, 1024  ;;  %p8227_p12 = scmp.lt.s32.totalorder %s99_s23, %s99_s23 }
  0x94   :  { %p8223_p11 = scmp.ne.s32.totalorder %s99_s23, %s8222_s21  ;;  %p8228_p13 = scmp.lt.s32.totalorder %s8222_s21, %s8222_s21 }
  0x96   :  { %p8229_p0 = por %p8228_p13, %p8227_p12 }
  0x98   :  { %p8230_p1 = pnand %p8229_p0, %p8223_p11 }
  0x9a   :  { %8233 = shalt.err (!%p8230_p1)
}
  0x9b   :  { %104 = dma.hbm_to_vmem [thread:$0]  %s9599_s7, 1024, %s99_s23, [#allocation11], %s8323_s1, %s8323_s1, %s8324_s27  }
  0x9c   :  { %s8327_s6 = smov [#allocation15]   ;;  %s8328_s25 = smov [#allocation18]  }
  0x9d   :  { %s120_s17 = sshll.u32 %s8327_s6, 4  ;;  %s142_s10 = sshll.u32 %s8328_s25, 4  ;;  %s121_s17 = int_to_ptr.vmem [resolvable:$true] %s120_s17  ;;  %s143_s10 = int_to_ptr.vmem [resolvable:$true] %s142_s10 }
  0x9e   :  { %s8234_s28 = scalar_lea.hbm %s9601_s9, 1024 }
  0x9f   :  { %p8235_p2 = scmp.ne.s32.totalorder %s9601_s9, %s8234_s28  ;;  %p8238_p3 = scmp.lt.u32.totalorder %s8234_s28, %s9601_s9 }
  0xa1   :  { %p8240_p4 = pnand %p8238_p3, %p8235_p2 }
  0xa3   :  { %8243 = shalt.err (!%p8240_p4)
}
  0xa4   :  { %s8244_s7 = scalar_lea.vmem %s121_s17, 1024  ;;  %p8249_p6 = scmp.lt.s32.totalorder %s121_s17, %s121_s17 }
  0xa5   :  { %p8245_p5 = scmp.ne.s32.totalorder %s121_s17, %s8244_s7  ;;  %p8250_p7 = scmp.lt.s32.totalorder %s8244_s7, %s8244_s7 }
  0xa7   :  { %p8251_p8 = por %p8250_p7, %p8249_p6 }
  0xa9   :  { %p8252_p9 = pnand %p8251_p8, %p8245_p5 }
  0xab   :  { %8255 = shalt.err (!%p8252_p9)
}
  0xac   :  { %126 = dma.hbm_to_vmem [thread:$0]  %s9601_s9, 1024, %s121_s17, [#allocation14], %s8323_s1, %s8323_s1, %s8324_s27  }
  0xad   :  { %s8256_s19 = scalar_lea.hbm %s9603_s11, 1024 }
  0xae   :  { %p8257_p10 = scmp.ne.s32.totalorder %s9603_s11, %s8256_s19  ;;  %p8260_p11 = scmp.lt.u32.totalorder %s8256_s19, %s9603_s11 }
  0xb0   :  { %p8262_p12 = pnand %p8260_p11, %p8257_p10 }
  0xb2   :  { %8265 = shalt.err (!%p8262_p12)
}
  0xb3   :  { %s8266_s21 = scalar_lea.vmem %s143_s10, 1024  ;;  %p8271_p0 = scmp.lt.s32.totalorder %s143_s10, %s143_s10 }
  0xb4   :  { %p8267_p13 = scmp.ne.s32.totalorder %s143_s10, %s8266_s21  ;;  %p8272_p1 = scmp.lt.s32.totalorder %s8266_s21, %s8266_s21 }
  0xb6   :  { %p8273_p2 = por %p8272_p1, %p8271_p0 }
  0xb8   :  { %p8274_p3 = pnand %p8273_p2, %p8267_p13 }
  0xba   :  { %8277 = shalt.err (!%p8274_p3)
}
  0xbb   :  { %148 = dma.hbm_to_vmem [thread:$0]  %s9603_s11, 1024, %s143_s10, [#allocation17], %s8323_s1, %s8323_s1, %s8324_s27  }
  0xbc   :  { %s8329_s22 = smov [#allocation19]   ;;  %s8278_s24 = scalar_lea.hbm %s9604_s12, 16 }
  0xbd   :  { %s155_s6 = sshll.u32 %s8329_s22, 4  ;;  %p8279_p4 = scmp.ne.s32.totalorder %s9604_s12, %s8278_s24  ;;  %s156_s6 = int_to_ptr.vmem [resolvable:$true] %s155_s6 }
  0xbe   :  { %p8282_p5 = scmp.lt.u32.totalorder %s8278_s24, %s9604_s12 }
  0xc0   :  { %p8284_p6 = pnand %p8282_p5, %p8279_p4 }
  0xc2   :  { %8287 = shalt.err (!%p8284_p6)
}
  0xc3   :  { %s8288_s3 = scalar_lea.vmem %s156_s6, 16  ;;  %s8292_s11 = scalar_lea.vmem %s156_s6, 32 }
  0xc4   :  { %p8289_p7 = scmp.ne.s32.totalorder %s156_s6, %s8288_s3  ;;  %p8293_p8 = scmp.lt.s32.totalorder %s156_s6, %s156_s6 }
  0xc5   :  { %p8294_p9 = scmp.lt.s32.totalorder %s8292_s11, %s8288_s3 }
  0xc7   :  { %p8295_p10 = por %p8294_p9, %p8293_p8 }
  0xc9   :  { %p8296_p11 = pnand %p8295_p10, %p8289_p7 }
  0xcb   :  { %8299 = shalt.err (!%p8296_p11)
}
  0xcc   :  { %158 = dma.hbm_to_vmem [thread:$0]  %s9604_s12, 16, %s156_s6, [#allocation20]  }
  0xcd   :  { %8300 = dma.done.wait [#allocation3], 49152  }
  0xce   :  { %8301 = vsyncadd [#allocation3], 4294918144 }
  0xcf   :  { %8302 = dma.done.wait [#allocation5], 2080  }
  0xd0   :  { %8303 = vsyncadd [#allocation5], 4294965216 }
  0xd1   :  { %8304 = dma.done.wait [#allocation8], 1040  }
  0xd2   :  { %8305 = vsyncadd [#allocation8], 4294966256 }
  0xd3   :  { %8306 = dma.done.wait [#allocation11], 1040  }
  0xd4   :  { %8307 = vsyncadd [#allocation11], 4294966256 }
  0xd5   :  { %8308 = dma.done.wait [#allocation14], 1040  }
  0xd6   :  { %8309 = vsyncadd [#allocation14], 4294966256 }
  0xd7   :  { %8310 = dma.done.wait [#allocation17], 1040  }
  0xd8   :  { %8311 = vsyncadd [#allocation17], 4294966256 }
  0xd9   :  { %8312 = dma.done.wait [#allocation20], 16  }
  0xda   :  { %8313 = vsyncadd [#allocation20], 4294967280  ;;  %v7412_v0 = vld [vmem:[#allocation2 + $0x404] ss:$8 sps:$4 sm:$0xff]   ;;  %v7414_v1 = vld [vmem:[#allocation2 + $0x400] ss:$8 sps:$4 sm:$0xff]  }
  0xdb   :  { %4116 = vmatprep.subr.bf16.mxu0 %v7412_v0  ;;  %v7415_v2 = vld [vmem:[#allocation2 + $0x414] ss:$8 sps:$4 sm:$0xff]   ;;  %v7417_v3 = vld [vmem:[#allocation2 + $0x410] ss:$8 sps:$4 sm:$0xff]   ;;  %v7418_v4 = vld [vmem:[#allocation2 + $0x424] ss:$8 sps:$4 sm:$0xff]  }
  0xdc   :  { %4117 = vmatpush1.bf16.msra.mxu0 %v7414_v1  ;;  %v7420_v5 = vld [vmem:[#allocation2 + $0x420] ss:$8 sps:$4 sm:$0xff]   ;;  %v7421_v6 = vld [vmem:[#allocation2 + $0x434] ss:$8 sps:$4 sm:$0xff]   ;;  %v7423_v7 = vld [vmem:[#allocation2 + $0x430] ss:$8 sps:$4 sm:$0xff]  }
  0xdd   :  { %4118 = vmatprep.subr.bf16.mxu0 %v7415_v2  ;;  %v7436_v8 = vld [vmem:[#allocation2 + $0x4] ss:$8 sps:$4 sm:$0xff]   ;;  %v7438_v9 = vld [vmem:[#allocation2] ss:$8 sps:$4 sm:$0xff]   ;;  %v7442_v11 = vld [vmem:[#allocation2 + $0x14] ss:$8 sps:$4 sm:$0xff]  }
  0xde   :  { %v7424_v10 = vld [vmem:[#allocation2 + $0x444] ss:$8 sps:$4 sm:$0xff]   ;;  %3664 = vmatprep.subr.bf16.mxu1 %v7436_v8  ;;  %v7444_v12 = vld [vmem:[#allocation2 + $0x10] ss:$8 sps:$4 sm:$0xff]   ;;  %v7426_v13 = vld [vmem:[#allocation2 + $0x440] ss:$8 sps:$4 sm:$0xff]  }
  0xdf   :  { %3665 = vmatpush1.bf16.msra.mxu1 %v7438_v9  ;;  %v7427_v14 = vld [vmem:[#allocation2 + $0x454] ss:$8 sps:$4 sm:$0xff]   ;;  %v7448_v15 = vld [vmem:[#allocation2 + $0x24] ss:$8 sps:$4 sm:$0xff]   ;;  %v7450_v16 = vld [vmem:[#allocation2 + $0x20] ss:$8 sps:$4 sm:$0xff]  }
  0xe0   :  { %4119 = vmatpush1.bf16.msra.mxu0 %v7417_v3  ;;  %3666 = vmatprep.subr.bf16.mxu1 %v7442_v11  ;;  %v7429_v17 = vld [vmem:[#allocation2 + $0x450] ss:$8 sps:$4 sm:$0xff]   ;;  %v7454_v18 = vld [vmem:[#allocation2 + $0x34] ss:$8 sps:$4 sm:$0xff]   ;;  %v7430_v19 = vld [vmem:[#allocation2 + $0x464] ss:$8 sps:$4 sm:$0xff]  }
  0xe1   :  { %4120 = vmatprep.subr.bf16.mxu0 %v7418_v4  ;;  %v7456_v20 = vld [vmem:[#allocation2 + $0x30] ss:$8 sps:$4 sm:$0xff]   ;;  %v7432_v21 = vld [vmem:[#allocation2 + $0x460] ss:$8 sps:$4 sm:$0xff]   ;;  %v7460_v22 = vld [vmem:[#allocation2 + $0x44] ss:$8 sps:$4 sm:$0xff]  }
  0xe2   :  { %v7433_v23 = vld [vmem:[#allocation2 + $0x474] ss:$8 sps:$4 sm:$0xff]   ;;  %v7462_v24 = vld [vmem:[#allocation2 + $0x40] ss:$8 sps:$4 sm:$0xff]   ;;  %v7435_v25 = vld [vmem:[#allocation2 + $0x470] ss:$8 sps:$4 sm:$0xff]  }
  0xe3   :  { %3667 = vmatpush1.bf16.msra.mxu1 %v7444_v12  ;;  %v7466_v26 = vld [vmem:[#allocation2 + $0x54] ss:$8 sps:$4 sm:$0xff]   ;;  %v7439_v27 = vld [vmem:[#allocation2 + $0x484] ss:$8 sps:$4 sm:$0xff]   ;;  %v7468_v28 = vld [vmem:[#allocation2 + $0x50] ss:$8 sps:$4 sm:$0xff]  }
  0xe4   :  { %4121 = vmatpush1.bf16.msra.mxu0 %v7420_v5  ;;  %3668 = vmatprep.subr.bf16.mxu1 %v7448_v15  ;;  %v7441_v29 = vld [vmem:[#allocation2 + $0x480] ss:$8 sps:$4 sm:$0xff]   ;;  %v7472_v30 = vld [vmem:[#allocation2 + $0x64] ss:$8 sps:$4 sm:$0xff]   ;;  %v7445_v31 = vld [vmem:[#allocation2 + $0x494] ss:$8 sps:$4 sm:$0xff]  }
  0xe5   :  { %4122 = vmatprep.subr.bf16.mxu0 %v7421_v6  ;;  %v7447_v32 = vld [vmem:[#allocation2 + $0x490] ss:$8 sps:$4 sm:$0xff]   ;;  %v8569_v33 = vld [vmem:[%s9592_s0 + $0x20] sm:$0xff]  ;;  %v7478_v37 = vld [vmem:[#allocation2 + $0x74] ss:$8 sps:$4 sm:$0xff]  }
  0xe6   :  { %v8574_v34 = vld [vmem:[%s9592_s0 + $0x80] sm:$0xff]  ;;  %v7480_v39 = vld [vmem:[#allocation2 + $0x70] ss:$8 sps:$4 sm:$0xff]   ;;  %v7457_v42 = vld [vmem:[#allocation2 + $0x4b4] ss:$8 sps:$4 sm:$0xff]  }
  0xe7   :  { %3669 = vmatpush1.bf16.msra.mxu1 %v7450_v16  ;;  %v7474_v35 = vld [vmem:[#allocation2 + $0x60] ss:$8 sps:$4 sm:$0xff]   ;;  %v6104_v36 = vcombine.high %v8569_v33, %v8574_v34  ;;  %v7451_v38 = vld [vmem:[#allocation2 + $0x4a4] ss:$8 sps:$4 sm:$0xff]   ;;  %v7459_v44 = vld [vmem:[#allocation2 + $0x4b0] ss:$8 sps:$4 sm:$0xff]   ;;  %v6103_v4 = vcombine.low %v8569_v33, %v8574_v34 }
  0xe8   :  { %4123 = vmatpush1.bf16.msra.mxu0 %v7423_v7  ;;  %3670 = vmatprep.subr.bf16.mxu1 %v7454_v18  ;;  %v7453_v40 = vld [vmem:[#allocation2 + $0x4a0] ss:$8 sps:$4 sm:$0xff]   ;;  %v7484_v41 = vld [vmem:[#allocation2 + $0x84] ss:$8 sps:$4 sm:$0xff]   ;;  %v7490_v45 = vld [vmem:[#allocation2 + $0x94] ss:$8 sps:$4 sm:$0xff]  }
  0xe9   :  { %4124 = vmatprep.subr.bf16.mxu0 %v7424_v10  ;;  %4148 = vmatprep.mubr.bf16.mxu0 %v6104_v36  ;;  %v7486_v43 = vld [vmem:[#allocation2 + $0x80] ss:$8 sps:$4 sm:$0xff]   ;;  %v7463_v46 = vld [vmem:[#allocation2 + $0x4c4] ss:$8 sps:$4 sm:$0xff]   ;;  %v7492_v48 = vld [vmem:[#allocation2 + $0x90] ss:$8 sps:$4 sm:$0xff]  }
  0xea   :  { %v7465_v47 = vld [vmem:[#allocation2 + $0x4c0] ss:$8 sps:$4 sm:$0xff]   ;;  %v7496_v49 = vld [vmem:[#allocation2 + $0xa4] ss:$8 sps:$4 sm:$0xff]   ;;  %v7469_v50 = vld [vmem:[#allocation2 + $0x4d4] ss:$8 sps:$4 sm:$0xff]  }
  0xeb   :  { %3671 = vmatpush1.bf16.msra.mxu1 %v7456_v20  ;;  %v7498_v51 = vld [vmem:[#allocation2 + $0xa0] ss:$8 sps:$4 sm:$0xff]   ;;  %v7471_v52 = vld [vmem:[#allocation2 + $0x4d0] ss:$8 sps:$4 sm:$0xff]   ;;  %v7502_v53 = vld [vmem:[#allocation2 + $0xb4] ss:$8 sps:$4 sm:$0xff]  }
  0xec   :  { %4125 = vmatpush1.bf16.msra.mxu0 %v7426_v13  ;;  %3672 = vmatprep.subr.bf16.mxu1 %v7460_v22  ;;  %v7475_v54 = vld [vmem:[#allocation2 + $0x4e4] ss:$8 sps:$4 sm:$0xff]   ;;  %v7477_v55 = vld [vmem:[#allocation2 + $0x4e0] ss:$8 sps:$4 sm:$0xff]   ;;  %v7504_v56 = vld [vmem:[#allocation2 + $0xb0] ss:$8 sps:$4 sm:$0xff]  }
  0xed   :  { %4126 = vmatprep.subr.bf16.mxu0 %v7427_v14  ;;  %v7481_v57 = vld [vmem:[#allocation2 + $0x4f4] ss:$8 sps:$4 sm:$0xff]   ;;  %v7508_v58 = vld [vmem:[#allocation2 + $0xc4] ss:$8 sps:$4 sm:$0xff]   ;;  %v7483_v61 = vld [vmem:[#allocation2 + $0x4f0] ss:$8 sps:$4 sm:$0xff]  }
  0xee   :  { %v8581_v59 = vld [vmem:[%s9592_s0] sm:$0xff]  ;;  %v7514_v2 = vld [vmem:[#allocation2 + $0xd4] ss:$8 sps:$4 sm:$0xff]   ;;  %v7516_v5 = vld [vmem:[#allocation2 + $0xd0] ss:$8 sps:$4 sm:$0xff]  }
  0xef   :  { %3673 = vmatpush1.bf16.msra.mxu1 %v7462_v24  ;;  %v208_v60 = vld [vmem:[%s9592_s0 + $0x60] sm:$0xff]  ;;  %v7495_v8 = vld [vmem:[#allocation2 + $0x514] ss:$8 sps:$4 sm:$0xff]   ;;  %v7493_v10 = vld [vmem:[#allocation2 + $0x510] ss:$8 sps:$4 sm:$0xff]  }
  0xf0   :  { %4127 = vmatpush1.bf16.msra.mxu0 %v7429_v17  ;;  %3674 = vmatprep.subr.bf16.mxu1 %v7466_v26  ;;  %v6096_v62 = vcombine.high %v8581_v59, %v208_v60  ;;  %v7489_v63 = vld [vmem:[#allocation2 + $0x504] ss:$8 sps:$4 sm:$0xff]   ;;  %v7510_v0 = vld [vmem:[#allocation2 + $0xc0] ss:$8 sps:$4 sm:$0xff]   ;;  %v7526_v14 = vld [vmem:[#allocation2 + $0xf4] ss:$8 sps:$4 sm:$0xff]   ;;  %v6095_v24 = vcombine.low %v8581_v59, %v208_v60 }
  0xf1   :  { %4128 = vmatprep.subr.bf16.mxu0 %v7430_v19  ;;  %v224_v1 = vld [vmem:[%s9592_s0 + $0xe0] sm:$0xff]  ;;  %v7528_v18 = vld [vmem:[#allocation2 + $0xf0] ss:$8 sps:$4 sm:$0xff]   ;;  %v7507_v19 = vld [vmem:[#allocation2 + $0x534] ss:$8 sps:$4 sm:$0xff]  }
  0xf2   :  { %v236_v3 = vld [vmem:[%s9592_s0 + $0x140] sm:$0xff]  ;;  %3696 = vmatprep.mubr.bf16.mxu1 %v6096_v62  ;;  %v7519_v34 = vld [vmem:[#allocation2 + $0x554] ss:$8 sps:$4 sm:$0xff]  }
  0xf3   :  { %3675 = vmatpush1.bf16.msra.mxu1 %v7468_v28  ;;  %v7487_v6 = vld [vmem:[#allocation2 + $0x500] ss:$8 sps:$4 sm:$0xff]   ;;  %v6128_v7 = vcombine.high %v224_v1, %v236_v3  ;;  %v7520_v9 = vld [vmem:[#allocation2 + $0xe4] ss:$8 sps:$4 sm:$0xff]   ;;  %v6127_v17 = vcombine.low %v224_v1, %v236_v3  ;;  %v7564_v62 = vld [vmem:[#allocation2 + $0x154] ss:$8 sps:$4 sm:$0xff]  }
  0xf4   :  { %4129 = vmatpush1.bf16.msra.mxu0 %v7432_v21  ;;  %3676 = vmatprep.subr.bf16.mxu1 %v7472_v30  ;;  %v7501_v11 = vld [vmem:[#allocation2 + $0x524] ss:$8 sps:$4 sm:$0xff]   ;;  %v7522_v12 = vld [vmem:[#allocation2 + $0xe0] ss:$8 sps:$4 sm:$0xff]  }
  0xf5   :  { %4130 = vmatprep.subr.bf16.mxu0 %v7433_v23  ;;  %v248_v13 = vld [vmem:[%s9592_s0 + $0x1a0] sm:$0xff] }
  0xf6   :  { %v260_v15 = vld [vmem:[%s9592_s0 + $0x200] sm:$0xff] }
  0xf7   :  { %3677 = vmatpush1.bf16.msra.mxu1 %v7474_v35  ;;  %v7499_v16 = vld [vmem:[#allocation2 + $0x520] ss:$8 sps:$4 sm:$0xff]   ;;  %v6152_v20 = vcombine.high %v248_v13, %v260_v15  ;;  %v7534_v23 = vld [vmem:[#allocation2 + $0x104] ss:$8 sps:$4 sm:$0xff]   ;;  %v6151_v33 = vcombine.low %v248_v13, %v260_v15  ;;  %v7538_v35 = vld [vmem:[#allocation2 + $0x110] ss:$8 sps:$4 sm:$0xff]  }
  0xf8   :  { %4131 = vmatpush1.bf16.msra.mxu0 %v7435_v25  ;;  %3678 = vmatprep.subr.bf16.mxu1 %v7478_v37  ;;  %v220_v21 = vld [vmem:[%s9592_s0 + $0xc0] sm:$0xff]  ;;  %v7505_v25 = vld [vmem:[#allocation2 + $0x530] ss:$8 sps:$4 sm:$0xff]  }
  0xf9   :  { %4132 = vmatprep.subr.bf16.mxu0 %v7439_v27  ;;  %v232_v22 = vld [vmem:[%s9592_s0 + $0x120] sm:$0xff] }
  0xfa   :  { %v7532_v26 = vld [vmem:[#allocation2 + $0x100] ss:$8 sps:$4 sm:$0xff]   ;;  %v6120_v27 = vcombine.high %v220_v21, %v232_v22  ;;  %v7513_v28 = vld [vmem:[#allocation2 + $0x544] ss:$8 sps:$4 sm:$0xff]  }
  0xfb   :  { %3679 = vmatpush1.bf16.msra.mxu1 %v7480_v39  ;;  %v272_v30 = vld [vmem:[%s9592_s0 + $0x260] sm:$0xff] }
  0xfc   :  { %4133 = vmatpush1.bf16.msra.mxu0 %v7441_v29  ;;  %3680 = vmatprep.subr.bf16.mxu1 %v7484_v41  ;;  %v7540_v29 = vld [vmem:[#allocation2 + $0x114] ss:$8 sps:$4 sm:$0xff]   ;;  %v244_v37 = vld [vmem:[%s9592_s0 + $0x180] sm:$0xff]  ;;  %v7517_v41 = vld [vmem:[#allocation2 + $0x550] ss:$8 sps:$4 sm:$0xff]  }
  0xfd   :  { %4134 = vmatprep.subr.bf16.mxu0 %v7445_v31  ;;  %v284_v31 = vld [vmem:[%s9592_s0 + $0x2c0] sm:$0xff] }
  0xfe   :  { %v6176_v36 = vcombine.high %v272_v30, %v284_v31  ;;  %v7546_v39 = vld [vmem:[#allocation2 + $0x124] ss:$8 sps:$4 sm:$0xff]   ;;  %v7535_v1 = vld [vmem:[#allocation2 + $0x580] ss:$8 sps:$4 sm:$0xff]  }
  0xff   :  { %3681 = vmatpush1.bf16.msra.mxu1 %v7486_v43  ;;  %v7537_v60 = vld [vmem:[#allocation2 + $0x584] ss:$8 sps:$4 sm:$0xff]  }
 0x100   :  { %4135 = vmatpush1.bf16.msra.mxu0 %v7447_v32  ;;  %3682 = vmatprep.subr.bf16.mxu1 %v7490_v45  ;;  %v7511_v32 = vld [vmem:[#allocation2 + $0x540] ss:$8 sps:$4 sm:$0xff]   ;;  %v7525_v45 = vld [vmem:[#allocation2 + $0x564] ss:$8 sps:$4 sm:$0xff]  }
 0x101   :  { %4136 = vmatprep.subr.bf16.mxu0 %v7451_v38  ;;  %v256_v38 = vld [vmem:[%s9592_s0 + $0x1e0] sm:$0xff] }
 0x102   :  { %v6144_v43 = vcombine.high %v244_v37, %v256_v38  ;;  %v344_v13 = vld [vmem:[%s9592_s0 + $0x4a0] sm:$0xff] }
 0x103   :  { %3683 = vmatpush1.bf16.msra.mxu1 %v7492_v48  ;;  %v7523_v48 = vld [vmem:[#allocation2 + $0x560] ss:$8 sps:$4 sm:$0xff]  }
 0x104   :  { %4137 = vmatpush1.bf16.msra.mxu0 %v7453_v40  ;;  %3684 = vmatprep.subr.bf16.mxu1 %v7496_v49  ;;  %v6119_v40 = vcombine.low %v220_v21, %v232_v22  ;;  %v6175_v49 = vcombine.low %v272_v30, %v284_v31  ;;  %v356_v15 = vld [vmem:[%s9592_s0 + $0x500] sm:$0xff]  ;;  %v7555_v22 = vld [vmem:[#allocation2 + $0x5b4] ss:$8 sps:$4 sm:$0xff]  }
 0x105   :  { %4138 = vmatprep.subr.bf16.mxu0 %v7457_v42  ;;  %v7544_v42 = vld [vmem:[#allocation2 + $0x120] ss:$8 sps:$4 sm:$0xff]   ;;  %v7588_v30 = vld [vmem:[#allocation2 + $0x194] ss:$8 sps:$4 sm:$0xff]  }
 0x106   :  { %v328_v21 = vld [vmem:[%s9592_s0 + $0x420] sm:$0xff] }
 0x107   :  { %3685 = vmatpush1.bf16.msra.mxu1 %v7498_v51  ;;  %v7550_v51 = vld [vmem:[#allocation2 + $0x130] ss:$8 sps:$4 sm:$0xff]   ;;  %v380_v31 = vld [vmem:[%s9592_s0 + $0x5c0] sm:$0xff] }
 0x108   :  { %4139 = vmatpush1.bf16.msra.mxu0 %v7459_v44  ;;  %3686 = vmatprep.subr.bf16.mxu1 %v7502_v53  ;;  %v7552_v44 = vld [vmem:[#allocation2 + $0x134] ss:$8 sps:$4 sm:$0xff]   ;;  %v268_v53 = vld [vmem:[%s9592_s0 + $0x240] sm:$0xff] }
 0x109   :  { %4140 = vmatprep.subr.bf16.mxu0 %v7463_v46  ;;  %v296_v46 = vld [vmem:[%s9592_s0 + $0x320] sm:$0xff] }
 0x10b   :  { %3687 = vmatpush1.bf16.msra.mxu1 %v7504_v56  ;;  %v7529_v56 = vld [vmem:[#allocation2 + $0x570] ss:$8 sps:$4 sm:$0xff]  }
 0x10c   :  { %4141 = vmatpush1.bf16.msra.mxu0 %v7465_v47  ;;  %3688 = vmatprep.subr.bf16.mxu1 %v7508_v58  ;;  %v308_v47 = vld [vmem:[%s9592_s0 + $0x380] sm:$0xff] }
 0x10d   :  { %4142 = vmatprep.subr.bf16.mxu0 %v7469_v50  ;;  %v7531_v50 = vld [vmem:[#allocation2 + $0x574] ss:$8 sps:$4 sm:$0xff]   ;;  %v7556_v58 = vld [vmem:[#allocation2 + $0x140] ss:$8 sps:$4 sm:$0xff]  }
 0x10f   :  { %3689 = vmatpush1.bf16.msra.mxu1 %v7510_v0  ;;  %v6199_v0 = vcombine.low %v296_v46, %v308_v47 }
 0x110   :  { %4143 = vmatpush1.bf16.msra.mxu0 %v7471_v52  ;;  %3690 = vmatprep.subr.bf16.mxu1 %v7514_v2  ;;  %v6200_v52 = vcombine.high %v296_v46, %v308_v47  ;;  %v7562_v2 = vld [vmem:[#allocation2 + $0x150] ss:$8 sps:$4 sm:$0xff]   ;;  %v201_v46 = vld [vmem:[%s9592_s0 + $0x28] sm:$0xff] }
 0x111   :  { %4144 = vmatprep.subr.bf16.mxu0 %v7475_v54  ;;  %v280_v54 = vld [vmem:[%s9592_s0 + $0x2a0] sm:$0xff]  ;;  %v213_v47 = vld [vmem:[%s9592_s0 + $0x88] sm:$0xff] }
 0x112   :  { %v6168_v59 = vcombine.high %v268_v53, %v280_v54 }
 0x113   :  { %3691 = vmatpush1.bf16.msra.mxu1 %v7516_v5  ;;  %v304_v5 = vld [vmem:[%s9592_s0 + $0x360] sm:$0xff] }
 0x114   :  { %4145 = vmatpush1.bf16.msra.mxu0 %v7477_v55  ;;  %3692 = vmatprep.subr.bf16.mxu1 %v7520_v9  ;;  %v7558_v55 = vld [vmem:[#allocation2 + $0x144] ss:$8 sps:$4 sm:$0xff]   ;;  %v6167_v9 = vcombine.low %v268_v53, %v280_v54 }
 0x115   :  { %4146 = vmatprep.subr.bf16.mxu0 %v7481_v57  ;;  %v6143_v57 = vcombine.low %v244_v37, %v256_v38  ;;  %v340_v37 = vld [vmem:[%s9592_s0 + $0x480] sm:$0xff] }
 0x116   :  { %v352_v38 = vld [vmem:[%s9592_s0 + $0x4e0] sm:$0xff] }
 0x117   :  { %3693 = vmatpush1.bf16.msra.mxu1 %v7522_v12  ;;  %v364_v53 = vld [vmem:[%s9592_s0 + $0x540] sm:$0xff] }
 0x118   :  { %4147 = vmatpush1.bf16.msra.mxu0 %v7483_v61  ;;  %3694 = vmatprep.subr.bf16.mxu1 %v7526_v14  ;;  %v320_v61 = vld [vmem:[%s9592_s0 + $0x3e0] sm:$0xff]  ;;  %v7576_v14 = vld [vmem:[#allocation2 + $0x174] ss:$8 sps:$4 sm:$0xff]  }
 0x119   :  { %4229 = vmatprep.subr.bf16.mxu0 %v7489_v63  ;;  %v332_v63 = vld [vmem:[%s9592_s0 + $0x440] sm:$0xff] }
 0x11a   :  { %v6224_v3 = vcombine.high %v320_v61, %v332_v63  ;;  %v376_v54 = vld [vmem:[%s9592_s0 + $0x5a0] sm:$0xff] }
 0x11b   :  { %4149 = vmatmul.mubr.bf16.vlgmr.msra.gmra.mrb[0].mxu0 %v6103_v4  ;;  %3695 = vmatpush1.bf16.msra.mxu1 %v7528_v18  ;;  %v292_v4 = vld [vmem:[%s9592_s0 + $0x300] sm:$0xff]  ;;  %v7574_v18 = vld [vmem:[#allocation2 + $0x170] ss:$8 sps:$4 sm:$0xff]  }
 0x11c   :  { %4230 = vmatpush1.bf16.msra.mxu0 %v7487_v6  ;;  %4158 = vmatprep.mubr.bf16.mxu0 %v6128_v7  ;;  %v7543_v6 = vld [vmem:[#allocation2 + $0x594] ss:$8 sps:$4 sm:$0xff]   ;;  %v7570_v7 = vld [vmem:[#allocation2 + $0x164] ss:$8 sps:$4 sm:$0xff]   ;;  %v6192_v12 = vcombine.high %v292_v4, %v304_v5 }
 0x11d   :  { %4231 = vmatprep.subr.bf16.mxu0 %v7495_v8  ;;  %3777 = vmatprep.subr.bf16.mxu1 %v7534_v23  ;;  %v7541_v8 = vld [vmem:[#allocation2 + $0x590] ss:$8 sps:$4 sm:$0xff]   ;;  %v7582_v23 = vld [vmem:[#allocation2 + $0x184] ss:$8 sps:$4 sm:$0xff]  }
 0x11e   :  { %3697 = vmatmul.mubr.bf16.vlgmr.msra.gmra.mrb[0].mxu1 %v6095_v24  ;;  %v7553_v24 = vld [vmem:[#allocation2 + $0x5b0] ss:$8 sps:$4 sm:$0xff]  }
 0x11f   :  { %3778 = vmatpush1.bf16.msra.mxu1 %v7532_v26  ;;  %3706 = vmatprep.mubr.bf16.mxu1 %v6120_v27  ;;  %v7561_v26 = vld [vmem:[#allocation2 + $0x5c4] ss:$8 sps:$4 sm:$0xff]   ;;  %v7580_v27 = vld [vmem:[#allocation2 + $0x180] ss:$8 sps:$4 sm:$0xff]  }
 0x120   :  { %4232 = vmatpush1.bf16.msra.mxu0 %v7493_v10  ;;  %3779 = vmatprep.subr.bf16.mxu1 %v7540_v29  ;;  %v7549_v10 = vld [vmem:[#allocation2 + $0x5a4] ss:$8 sps:$4 sm:$0xff]  }
 0x121   :  { %4233 = vmatprep.subr.bf16.mxu0 %v7501_v11  ;;  %v7568_v11 = vld [vmem:[#allocation2 + $0x160] ss:$8 sps:$4 sm:$0xff]  }
 0x122   :  { %v368_v29 = vld [vmem:[%s9592_s0 + $0x560] sm:$0xff] }
 0x123   :  { %4159 = vmatmul.mubr.bf16.gmra.mrb[4].mxu0 %v6127_v17  ;;  %3780 = vmatpush1.bf16.msra.mxu1 %v7538_v35  ;;  %v7547_v17 = vld [vmem:[#allocation2 + $0x5a0] ss:$8 sps:$4 sm:$0xff]   ;;  %v7567_v35 = vld [vmem:[#allocation2 + $0x5d4] ss:$8 sps:$4 sm:$0xff]  }
 0x124   :  { %4234 = vmatpush1.bf16.msra.mxu0 %v7499_v16  ;;  %4168 = vmatprep.mubr.bf16.mxu0 %v6152_v20  ;;  %v6223_v16 = vcombine.low %v320_v61, %v332_v63  ;;  %v6248_v20 = vcombine.high %v344_v13, %v356_v15  ;;  %v7585_v61 = vld [vmem:[#allocation2 + $0x604] ss:$8 sps:$4 sm:$0xff]  }
 0x125   :  { %4235 = vmatprep.subr.bf16.mxu0 %v7507_v19  ;;  %3781 = vmatprep.subr.bf16.mxu1 %v7546_v39  ;;  %v316_v19 = vld [vmem:[%s9592_s0 + $0x3c0] sm:$0xff]  ;;  %v237_v63 = vld [vmem:[%s9592_s0 + $0x148] sm:$0xff] }
 0x126   :  { %3707 = vmatmul.mubr.bf16.gmra.mrb[4].mxu1 %v6119_v40  ;;  %v7594_v39 = vld [vmem:[#allocation2 + $0x1a4] ss:$8 sps:$4 sm:$0xff]   ;;  %v6215_v40 = vcombine.low %v316_v19, %v328_v21 }
 0x127   :  { %3782 = vmatpush1.bf16.msra.mxu1 %v7544_v42  ;;  %3716 = vmatprep.mubr.bf16.mxu1 %v6144_v43  ;;  %v7592_v42 = vld [vmem:[#allocation2 + $0x1a0] ss:$8 sps:$4 sm:$0xff]   ;;  %v6240_v43 = vcombine.high %v340_v37, %v352_v38 }
 0x128   :  { %4236 = vmatpush1.bf16.msra.mxu0 %v7505_v25  ;;  %3783 = vmatprep.subr.bf16.mxu1 %v7552_v44  ;;  %v6191_v25 = vcombine.low %v292_v4, %v304_v5  ;;  %v7573_v44 = vld [vmem:[#allocation2 + $0x5e4] ss:$8 sps:$4 sm:$0xff]  }
 0x129   :  { %4237 = vmatprep.subr.bf16.mxu0 %v7513_v28  ;;  %v6216_v28 = vcombine.high %v316_v19, %v328_v21  ;;  %v197_v5 = vld [vmem:[%s9592_s0 + $0x8] sm:$0xff] }
 0x12a   :  { %v233_v21 = vld [vmem:[%s9592_s0 + $0x128] sm:$0xff] }
 0x12b   :  { %4169 = vmatmul.mubr.bf16.gmra.mrb[8].mxu0 %v6151_v33  ;;  %3784 = vmatpush1.bf16.msra.mxu1 %v7550_v51  ;;  %v6247_v33 = vcombine.low %v344_v13, %v356_v15  ;;  %v7598_v51 = vld [vmem:[#allocation2 + $0x1b0] ss:$8 sps:$4 sm:$0xff]   ;;  %v249_v13 = vld [vmem:[%s9592_s0 + $0x1a8] sm:$0xff] }
 0x12c   :  { %4238 = vmatpush1.bf16.msra.mxu0 %v7511_v32  ;;  %4178 = vmatprep.mubr.bf16.mxu0 %v6176_v36  ;;  %v7559_v32 = vld [vmem:[#allocation2 + $0x5c0] ss:$8 sps:$4 sm:$0xff]   ;;  %v6272_v36 = vcombine.high %v368_v29, %v380_v31 }
 0x12d   :  { %4239 = vmatprep.subr.bf16.mxu0 %v7519_v34  ;;  %3785 = vmatprep.subr.bf16.mxu1 %v7558_v55  ;;  %v7586_v34 = vld [vmem:[#allocation2 + $0x190] ss:$8 sps:$4 sm:$0xff]   ;;  %v7606_v55 = vld [vmem:[#allocation2 + $0x1c4] ss:$8 sps:$4 sm:$0xff]  }
 0x12e   :  { %3717 = vmatmul.mubr.bf16.gmra.mrb[8].mxu1 %v6143_v57  ;;  %v7577_v57 = vld [vmem:[#allocation2 + $0x5f0] ss:$8 sps:$4 sm:$0xff]   ;;  %v261_v15 = vld [vmem:[%s9592_s0 + $0x208] sm:$0xff] }
 0x12f   :  { %3786 = vmatpush1.bf16.msra.mxu1 %v7556_v58  ;;  %3726 = vmatprep.mubr.bf16.mxu1 %v6168_v59  ;;  %v7604_v58 = vld [vmem:[#allocation2 + $0x1c0] ss:$8 sps:$4 sm:$0xff]   ;;  %v6264_v59 = vcombine.high %v364_v53, %v376_v54  ;;  %v6154_v19 = vcombine.high %v249_v13, %v261_v15 }
 0x130   :  { %4240 = vmatpush1.bf16.msra.mxu0 %v7517_v41  ;;  %3787 = vmatprep.subr.bf16.mxu1 %v7564_v62  ;;  %v7565_v41 = vld [vmem:[#allocation2 + $0x5d0] ss:$8 sps:$4 sm:$0xff]   ;;  %v225_v62 = vld [vmem:[%s9592_s0 + $0xe8] sm:$0xff] }
 0x131   :  { %4241 = vmatprep.subr.bf16.mxu0 %v7525_v45  ;;  %v7600_v45 = vld [vmem:[#allocation2 + $0x1b4] ss:$8 sps:$4 sm:$0xff]   ;;  %v6130_v4 = vcombine.high %v225_v62, %v237_v63 }
 0x133   :  { %4179 = vmatmul.mubr.bf16.gmra.mrb[12].mxu0 %v6175_v49  ;;  %3788 = vmatpush1.bf16.msra.mxu1 %v7562_v2  ;;  %v6271_v49 = vcombine.low %v368_v29, %v380_v31  ;;  %v7591_v2 = vld [vmem:[#allocation2 + $0x614] ss:$8 sps:$4 sm:$0xff]   ;;  %v273_v29 = vld [vmem:[%s9592_s0 + $0x268] sm:$0xff] }
 0x134   :  { %4242 = vmatpush1.bf16.msra.mxu0 %v7523_v48  ;;  %4188 = vmatprep.mubr.bf16.mxu0 %v6200_v52  ;;  %v7571_v48 = vld [vmem:[#allocation2 + $0x5e0] ss:$8 sps:$4 sm:$0xff]   ;;  %v6106_v52 = vcombine.high %v201_v46, %v213_v47 }
 0x135   :  { %4243 = vmatprep.subr.bf16.mxu0 %v7531_v50  ;;  %3789 = vmatprep.subr.bf16.mxu1 %v7570_v7  ;;  %v7579_v50 = vld [vmem:[#allocation2 + $0x5f4] ss:$8 sps:$4 sm:$0xff]   ;;  %v7618_v7 = vld [vmem:[#allocation2 + $0x1e4] ss:$8 sps:$4 sm:$0xff]  }
 0x136   :  { %3727 = vmatmul.mubr.bf16.gmra.mrb[12].mxu1 %v6167_v9  ;;  %v6263_v9 = vcombine.low %v364_v53, %v376_v54  ;;  %v285_v31 = vld [vmem:[%s9592_s0 + $0x2c8] sm:$0xff] }
 0x137   :  { %3790 = vmatpush1.bf16.msra.mxu1 %v7568_v11  ;;  %3736 = vmatprep.mubr.bf16.mxu1 %v6192_v12  ;;  %v7597_v12 = vld [vmem:[#allocation2 + $0x624] ss:$8 sps:$4 sm:$0xff]  }
 0x138   :  { %4244 = vmatpush1.bf16.msra.mxu0 %v7529_v56  ;;  %3791 = vmatprep.subr.bf16.mxu1 %v7576_v14  ;;  %v6239_v56 = vcombine.low %v340_v37, %v352_v38  ;;  %v7624_v14 = vld [vmem:[#allocation2 + $0x1f4] ss:$8 sps:$4 sm:$0xff]   ;;  %v257_v37 = vld [vmem:[%s9592_s0 + $0x1e8] sm:$0xff] }
 0x139   :  { %4245 = vmatprep.subr.bf16.mxu0 %v7537_v60  ;;  %v7612_v60 = vld [vmem:[#allocation2 + $0x1d4] ss:$8 sps:$4 sm:$0xff]   ;;  %v269_v53 = vld [vmem:[%s9592_s0 + $0x248] sm:$0xff] }
 0x13a   :  { %v7615_v38 = vld [vmem:[#allocation2 + $0x654] ss:$8 sps:$4 sm:$0xff]   ;;  %v281_v54 = vld [vmem:[%s9592_s0 + $0x2a8] sm:$0xff] }
 0x13b   :  { %4189 = vmatmul.mubr.bf16.gmra.mrb[16].mxu0 %v6199_v0  ;;  %3792 = vmatpush1.bf16.msra.mxu1 %v7574_v18  ;;  %v7583_v0 = vld [vmem:[#allocation2 + $0x600] ss:$8 sps:$4 sm:$0xff]   ;;  %v7622_v18 = vld [vmem:[#allocation2 + $0x1f0] ss:$8 sps:$4 sm:$0xff]  }
 0x13c   :  { %4246 = vmatpush1.bf16.msra.mxu0 %v7535_v1  ;;  %4198 = vmatprep.mubr.bf16.mxu0 %v6224_v3  ;;  %v6105_v1 = vcombine.low %v201_v46, %v213_v47  ;;  %v7610_v3 = vld [vmem:[#allocation2 + $0x1d0] ss:$8 sps:$4 sm:$0xff]   ;;  %v7648_v46 = vld [vmem:[#allocation2 + $0x234] ss:$8 sps:$4 sm:$0xff]   ;;  %v309_v47 = vld [vmem:[%s9592_s0 + $0x388] sm:$0xff] }
 0x13d   :  { %4247 = vmatprep.subr.bf16.mxu0 %v7543_v6  ;;  %3793 = vmatprep.subr.bf16.mxu1 %v7582_v23  ;;  %v209_v6 = vld [vmem:[%s9592_s0 + $0x68] sm:$0xff] }
 0x13e   :  { %3737 = vmatmul.mubr.bf16.gmra.mrb[16].mxu1 %v6191_v25  ;;  %v6098_v11 = vcombine.high %v197_v5, %v209_v6  ;;  %v7630_v23 = vld [vmem:[#allocation2 + $0x204] ss:$8 sps:$4 sm:$0xff]   ;;  %v6097_v25 = vcombine.low %v197_v5, %v209_v6 }
 0x13f   :  { %3794 = vmatpush1.bf16.msra.mxu1 %v7580_v27  ;;  %3746 = vmatprep.mubr.bf16.mxu1 %v6216_v28  ;;  %v7628_v27 = vld [vmem:[#allocation2 + $0x200] ss:$8 sps:$4 sm:$0xff]  }
 0x140   :  { %4248 = vmatpush1.bf16.msra.mxu0 %v7541_v8  ;;  %3795 = vmatprep.subr.bf16.mxu1 %v7588_v30  ;;  %v7589_v8 = vld [vmem:[#allocation2 + $0x610] ss:$8 sps:$4 sm:$0xff]   ;;  %v7636_v30 = vld [vmem:[#allocation2 + $0x214] ss:$8 sps:$4 sm:$0xff]   ;;  %v293_v5 = vld [vmem:[%s9592_s0 + $0x308] sm:$0xff] }
 0x141   :  { %4249 = vmatprep.subr.bf16.mxu0 %v7549_v10  ;;  %v7616_v10 = vld [vmem:[#allocation2 + $0x1e0] ss:$8 sps:$4 sm:$0xff]  }
 0x142   :  { %v305_v6 = vld [vmem:[%s9592_s0 + $0x368] sm:$0xff] }
 0x143   :  { %4199 = vmatmul.mubr.bf16.gmra.mrb[20].mxu0 %v6223_v16  ;;  %3796 = vmatpush1.bf16.msra.mxu1 %v7586_v34  ;;  %v6129_v16 = vcombine.low %v225_v62, %v237_v63  ;;  %v7634_v34 = vld [vmem:[#allocation2 + $0x210] ss:$8 sps:$4 sm:$0xff]   ;;  %v321_v62 = vld [vmem:[%s9592_s0 + $0x3e8] sm:$0xff] }
 0x144   :  { %4250 = vmatpush1.bf16.msra.mxu0 %v7547_v17  ;;  %4208 = vmatprep.mubr.bf16.mxu0 %v6248_v20  ;;  %v7595_v17 = vld [vmem:[#allocation2 + $0x620] ss:$8 sps:$4 sm:$0xff]  }
 0x145   :  { %4251 = vmatprep.subr.bf16.mxu0 %v7555_v22  ;;  %3797 = vmatprep.subr.bf16.mxu1 %v7594_v39  ;;  %v221_v20 = vld [vmem:[%s9592_s0 + $0xc8] sm:$0xff]  ;;  %v7603_v22 = vld [vmem:[#allocation2 + $0x634] ss:$8 sps:$4 sm:$0xff]  }
 0x146   :  { %3747 = vmatmul.mubr.bf16.gmra.mrb[20].mxu1 %v6215_v40  ;;  %v6122_v28 = vcombine.high %v221_v20, %v233_v21  ;;  %v7642_v39 = vld [vmem:[#allocation2 + $0x224] ss:$8 sps:$4 sm:$0xff]   ;;  %v7613_v40 = vld [vmem:[#allocation2 + $0x650] ss:$8 sps:$4 sm:$0xff]  }
 0x147   :  { %3798 = vmatpush1.bf16.msra.mxu1 %v7592_v42  ;;  %3756 = vmatprep.mubr.bf16.mxu1 %v6240_v43  ;;  %v7621_v42 = vld [vmem:[#allocation2 + $0x664] ss:$8 sps:$4 sm:$0xff]   ;;  %v7640_v43 = vld [vmem:[#allocation2 + $0x220] ss:$8 sps:$4 sm:$0xff]  }
 0x148   :  { %4252 = vmatpush1.bf16.msra.mxu0 %v7553_v24  ;;  %3799 = vmatprep.subr.bf16.mxu1 %v7600_v45  ;;  %v7601_v24 = vld [vmem:[#allocation2 + $0x630] ss:$8 sps:$4 sm:$0xff]   ;;  %v297_v45 = vld [vmem:[%s9592_s0 + $0x328] sm:$0xff] }
 0x149   :  { %4253 = vmatprep.subr.bf16.mxu0 %v7561_v26  ;;  %v7609_v26 = vld [vmem:[#allocation2 + $0x644] ss:$8 sps:$4 sm:$0xff]  }
 0x14a   :  { %v333_v63 = vld [vmem:[%s9592_s0 + $0x448] sm:$0xff] }
 0x14b   :  { %4209 = vmatmul.mubr.bf16.gmra.mrb[24].mxu0 %v6247_v33  ;;  %3800 = vmatpush1.bf16.msra.mxu1 %v7598_v51  ;;  %v7607_v33 = vld [vmem:[#allocation2 + $0x640] ss:$8 sps:$4 sm:$0xff]   ;;  %v7627_v51 = vld [vmem:[#allocation2 + $0x674] ss:$8 sps:$4 sm:$0xff]  }
 0x14c   :  { %4254 = vmatpush1.bf16.msra.mxu0 %v7559_v32  ;;  %4218 = vmatprep.mubr.bf16.mxu0 %v6272_v36  ;;  %v6153_v32 = vcombine.low %v249_v13, %v261_v15  ;;  %v6178_v36 = vcombine.high %v273_v29, %v285_v31  ;;  %v7645_v13 = vld [vmem:[#allocation2 + $0x6a4] ss:$8 sps:$4 sm:$0xff]  }
 0x14d   :  { %4255 = vmatprep.subr.bf16.mxu0 %v7567_v35  ;;  %3801 = vmatprep.subr.bf16.mxu1 %v7606_v55  ;;  %v245_v35 = vld [vmem:[%s9592_s0 + $0x188] sm:$0xff] }
 0x14e   :  { %3757 = vmatmul.mubr.bf16.gmra.mrb[24].mxu1 %v6239_v56  ;;  %v7654_v55 = vld [vmem:[#allocation2 + $0x244] ss:$8 sps:$4 sm:$0xff]   ;;  %v6145_v56 = vcombine.low %v245_v35, %v257_v37 }
 0x14f   :  { %3802 = vmatpush1.bf16.msra.mxu1 %v7604_v58  ;;  %3766 = vmatprep.mubr.bf16.mxu1 %v6264_v59  ;;  %v7652_v58 = vld [vmem:[#allocation2 + $0x240] ss:$8 sps:$4 sm:$0xff]   ;;  %v6170_v59 = vcombine.high %v269_v53, %v281_v54 }
 0x150   :  { %4256 = vmatpush1.bf16.msra.mxu0 %v7565_v41  ;;  %3803 = vmatprep.subr.bf16.mxu1 %v7612_v60  ;;  %v6121_v41 = vcombine.low %v221_v20, %v233_v21  ;;  %v7633_v60 = vld [vmem:[#allocation2 + $0x684] ss:$8 sps:$4 sm:$0xff]  }
 0x151   :  { %4257 = vmatprep.subr.bf16.mxu0 %v7573_v44  ;;  %v6146_v44 = vcombine.high %v245_v35, %v257_v37  ;;  %v357_v15 = vld [vmem:[%s9592_s0 + $0x508] sm:$0xff] }
 0x152   :  { %v317_v21 = vld [vmem:[%s9592_s0 + $0x3c8] sm:$0xff] }
 0x153   :  { %4219 = vmatmul.mubr.bf16.gmra.mrb[28].mxu0 %v6271_v49  ;;  %3804 = vmatpush1.bf16.msra.mxu1 %v7610_v3  ;;  %v6177_v49 = vcombine.low %v273_v29, %v285_v31  ;;  %v7658_v3 = vld [vmem:[#allocation2 + $0x250] ss:$8 sps:$4 sm:$0xff]   ;;  %v369_v29 = vld [vmem:[%s9592_s0 + $0x568] sm:$0xff] }
 0x154   :  { %4258 = vmatpush1.bf16.msra.mxu0 %v7571_v48  ;;  %4261 = vmatprep.mubr.bf16.mxu0 %v6106_v52  ;;  %v7619_v48 = vld [vmem:[#allocation2 + $0x660] ss:$8 sps:$4 sm:$0xff]   ;;  %v6202_v52 = vcombine.high %v297_v45, %v309_v47 }
 0x155   :  { %4259 = vmatprep.subr.bf16.mxu0 %v7579_v50  ;;  %3805 = vmatprep.subr.bf16.mxu1 %v7618_v7  ;;  %v7646_v50 = vld [vmem:[#allocation2 + $0x230] ss:$8 sps:$4 sm:$0xff]   ;;  %v7666_v7 = vld [vmem:[#allocation2 + $0x264] ss:$8 sps:$4 sm:$0xff]  }
 0x156   :  { %3767 = vmatmul.mubr.bf16.gmra.mrb[28].mxu1 %v6263_v9  ;;  %v7637_v9 = vld [vmem:[#allocation2 + $0x690] ss:$8 sps:$4 sm:$0xff]   ;;  %v381_v31 = vld [vmem:[%s9592_s0 + $0x5c8] sm:$0xff] }
 0x157   :  { %3806 = vmatpush1.bf16.msra.mxu1 %v7616_v10  ;;  %3809 = vmatprep.mubr.bf16.mxu1 %v6098_v11  ;;  %v7664_v10 = vld [vmem:[#allocation2 + $0x260] ss:$8 sps:$4 sm:$0xff]   ;;  %v6194_v11 = vcombine.high %v293_v5, %v305_v6  ;;  %v6274_v35 = vcombine.high %v369_v29, %v381_v31 }
 0x158   :  { %4260 = vmatpush1.bf16.msra.mxu0 %v7577_v57  ;;  %3807 = vmatprep.subr.bf16.mxu1 %v7624_v14  ;;  %v7625_v57 = vld [vmem:[#allocation2 + $0x670] ss:$8 sps:$4 sm:$0xff]   ;;  %v345_v14 = vld [vmem:[%s9592_s0 + $0x4a8] sm:$0xff] }
 0x159   :  { %4342 = vmatprep.subr.bf16.mxu0 %v7585_v61  ;;  %v7660_v61 = vld [vmem:[#allocation2 + $0x254] ss:$8 sps:$4 sm:$0xff]   ;;  %v6250_v20 = vcombine.high %v345_v14, %v357_v15  ;;  %v353_v37 = vld [vmem:[%s9592_s0 + $0x4e8] sm:$0xff] }
 0x15b   :  { %4262 = vmatmul.mubr.bf16.vlgmr.msra.gmra.mrb[0].mxu0 %v6105_v1  ;;  %3808 = vmatpush1.bf16.msra.mxu1 %v7622_v18  ;;  %v6201_v1 = vcombine.low %v297_v45, %v309_v47  ;;  %v7651_v18 = vld [vmem:[#allocation2 + $0x6b4] ss:$8 sps:$4 sm:$0xff]  }
 0x15c   :  { %4343 = vmatpush1.bf16.msra.mxu0 %v7583_v0  ;;  %4271 = vmatprep.mubr.bf16.mxu0 %v6130_v4  ;;  %v7631_v0 = vld [vmem:[#allocation2 + $0x680] ss:$8 sps:$4 sm:$0xff]   ;;  %v6226_v4 = vcombine.high %v321_v62, %v333_v63  ;;  %v202_v45 = vld [vmem:[%s9592_s0 + $0x30] sm:$0xff] }
 0x15d   :  { %4344 = vmatprep.subr.bf16.mxu0 %v7591_v2  ;;  %3890 = vmatprep.subr.bf16.mxu1 %v7630_v23  ;;  %v7639_v2 = vld [vmem:[#allocation2 + $0x694] ss:$8 sps:$4 sm:$0xff]   ;;  %v7678_v23 = vld [vmem:[#allocation2 + $0x284] ss:$8 sps:$4 sm:$0xff]  }
 0x15e   :  { %3810 = vmatmul.mubr.bf16.vlgmr.msra.gmra.mrb[0].mxu1 %v6097_v25  ;;  %v6193_v25 = vcombine.low %v293_v5, %v305_v6  ;;  %v214_v47 = vld [vmem:[%s9592_s0 + $0x90] sm:$0xff] }
 0x15f   :  { %3891 = vmatpush1.bf16.msra.mxu1 %v7628_v27  ;;  %3819 = vmatprep.mubr.bf16.mxu1 %v6122_v28  ;;  %v7657_v28 = vld [vmem:[#allocation2 + $0x6c4] ss:$8 sps:$4 sm:$0xff]   ;;  %v198_v5 = vld [vmem:[%s9592_s0 + $0x10] sm:$0xff] }
 0x160   :  { %4345 = vmatpush1.bf16.msra.mxu0 %v7589_v8  ;;  %3892 = vmatprep.subr.bf16.mxu1 %v7636_v30  ;;  %v6169_v8 = vcombine.low %v269_v53, %v281_v54  ;;  %v7684_v30 = vld [vmem:[#allocation2 + $0x294] ss:$8 sps:$4 sm:$0xff]   ;;  %v377_v53 = vld [vmem:[%s9592_s0 + $0x5a8] sm:$0xff] }
 0x161   :  { %4346 = vmatprep.subr.bf16.mxu0 %v7597_v12  ;;  %v7672_v12 = vld [vmem:[#allocation2 + $0x274] ss:$8 sps:$4 sm:$0xff]  }
 0x162   :  { %v7675_v54 = vld [vmem:[#allocation2 + $0x6f4] ss:$8 sps:$4 sm:$0xff]  }
 0x163   :  { %4272 = vmatmul.mubr.bf16.gmra.mrb[4].mxu0 %v6129_v16  ;;  %3893 = vmatpush1.bf16.msra.mxu1 %v7634_v34  ;;  %v7643_v16 = vld [vmem:[#allocation2 + $0x6a0] ss:$8 sps:$4 sm:$0xff]   ;;  %v7682_v34 = vld [vmem:[#allocation2 + $0x290] ss:$8 sps:$4 sm:$0xff]  }
 0x164   :  { %4347 = vmatpush1.bf16.msra.mxu0 %v7595_v17  ;;  %4281 = vmatprep.mubr.bf16.mxu0 %v6154_v19  ;;  %v6225_v17 = vcombine.low %v321_v62, %v333_v63  ;;  %v7670_v19 = vld [vmem:[#allocation2 + $0x270] ss:$8 sps:$4 sm:$0xff]   ;;  %v7708_v62 = vld [vmem:[#allocation2 + $0x2d4] ss:$8 sps:$4 sm:$0xff]  }
 0x165   :  { %4348 = vmatprep.subr.bf16.mxu0 %v7603_v22  ;;  %3894 = vmatprep.subr.bf16.mxu1 %v7642_v39  ;;  %v329_v22 = vld [vmem:[%s9592_s0 + $0x428] sm:$0xff]  ;;  %v238_v63 = vld [vmem:[%s9592_s0 + $0x150] sm:$0xff] }
 0x166   :  { %3820 = vmatmul.mubr.bf16.gmra.mrb[4].mxu1 %v6121_v41  ;;  %v6218_v27 = vcombine.high %v317_v21, %v329_v22  ;;  %v7690_v39 = vld [vmem:[#allocation2 + $0x2a4] ss:$8 sps:$4 sm:$0xff]   ;;  %v6217_v41 = vcombine.low %v317_v21, %v329_v22  ;;  %v210_v6 = vld [vmem:[%s9592_s0 + $0x70] sm:$0xff] }
 0x167   :  { %3895 = vmatpush1.bf16.msra.mxu1 %v7640_v43  ;;  %3829 = vmatprep.mubr.bf16.mxu1 %v6146_v44  ;;  %v7688_v43 = vld [vmem:[#allocation2 + $0x2a0] ss:$8 sps:$4 sm:$0xff]   ;;  %v222_v21 = vld [vmem:[%s9592_s0 + $0xd0] sm:$0xff] }
 0x168   :  { %4349 = vmatpush1.bf16.msra.mxu0 %v7601_v24  ;;  %3896 = vmatprep.subr.bf16.mxu1 %v7648_v46  ;;  %v7649_v24 = vld [vmem:[#allocation2 + $0x6b0] ss:$8 sps:$4 sm:$0xff]   ;;  %v7696_v46 = vld [vmem:[#allocation2 + $0x2b4] ss:$8 sps:$4 sm:$0xff]  }
 0x169   :  { %4350 = vmatprep.subr.bf16.mxu0 %v7609_v26  ;;  %v7676_v26 = vld [vmem:[#allocation2 + $0x280] ss:$8 sps:$4 sm:$0xff]   ;;  %v234_v22 = vld [vmem:[%s9592_s0 + $0x130] sm:$0xff] }
 0x16b   :  { %4282 = vmatmul.mubr.bf16.gmra.mrb[8].mxu0 %v6153_v32  ;;  %3897 = vmatpush1.bf16.msra.mxu1 %v7646_v50  ;;  %v6249_v32 = vcombine.low %v345_v14, %v357_v15  ;;  %v7694_v50 = vld [vmem:[#allocation2 + $0x2b0] ss:$8 sps:$4 sm:$0xff]  }
 0x16c   :  { %4351 = vmatpush1.bf16.msra.mxu0 %v7607_v33  ;;  %4291 = vmatprep.mubr.bf16.mxu0 %v6178_v36  ;;  %v7655_v33 = vld [vmem:[#allocation2 + $0x6c0] ss:$8 sps:$4 sm:$0xff]   ;;  %v250_v14 = vld [vmem:[%s9592_s0 + $0x1b0] sm:$0xff] }
 0x16d   :  { %4352 = vmatprep.subr.bf16.mxu0 %v7615_v38  ;;  %3898 = vmatprep.subr.bf16.mxu1 %v7654_v55  ;;  %v341_v36 = vld [vmem:[%s9592_s0 + $0x488] sm:$0xff]  ;;  %v7663_v38 = vld [vmem:[#allocation2 + $0x6d4] ss:$8 sps:$4 sm:$0xff]  }
 0x16e   :  { %3830 = vmatmul.mubr.bf16.gmra.mrb[8].mxu1 %v6145_v56  ;;  %v6242_v44 = vcombine.high %v341_v36, %v353_v37  ;;  %v7702_v55 = vld [vmem:[#allocation2 + $0x2c4] ss:$8 sps:$4 sm:$0xff]   ;;  %v7673_v56 = vld [vmem:[#allocation2 + $0x6f0] ss:$8 sps:$4 sm:$0xff]  }
 0x16f   :  { %3899 = vmatpush1.bf16.msra.mxu1 %v7652_v58  ;;  %3839 = vmatprep.mubr.bf16.mxu1 %v6170_v59  ;;  %v7681_v58 = vld [vmem:[#allocation2 + $0x704] ss:$8 sps:$4 sm:$0xff]   ;;  %v7700_v59 = vld [vmem:[#allocation2 + $0x2c0] ss:$8 sps:$4 sm:$0xff]   ;;  %v262_v15 = vld [vmem:[%s9592_s0 + $0x210] sm:$0xff] }
 0x170   :  { %4353 = vmatpush1.bf16.msra.mxu0 %v7613_v40  ;;  %3900 = vmatprep.subr.bf16.mxu1 %v7660_v61  ;;  %v7661_v40 = vld [vmem:[#allocation2 + $0x6d0] ss:$8 sps:$4 sm:$0xff]  }
 0x171   :  { %4354 = vmatprep.subr.bf16.mxu0 %v7621_v42  ;;  %v7669_v42 = vld [vmem:[#allocation2 + $0x6e4] ss:$8 sps:$4 sm:$0xff]   ;;  %v226_v61 = vld [vmem:[%s9592_s0 + $0xf0] sm:$0xff] }
 0x173   :  { %4292 = vmatmul.mubr.bf16.gmra.mrb[12].mxu0 %v6177_v49  ;;  %3901 = vmatpush1.bf16.msra.mxu1 %v7658_v3  ;;  %v7667_v49 = vld [vmem:[#allocation2 + $0x6e0] ss:$8 sps:$4 sm:$0xff]   ;;  %v7687_v3 = vld [vmem:[#allocation2 + $0x714] ss:$8 sps:$4 sm:$0xff]  }
 0x174   :  { %4355 = vmatpush1.bf16.msra.mxu0 %v7619_v48  ;;  %4301 = vmatprep.mubr.bf16.mxu0 %v6202_v52  ;;  %v6273_v48 = vcombine.low %v369_v29, %v381_v31  ;;  %v6108_v52 = vcombine.high %v202_v45, %v214_v47  ;;  %v7705_v29 = vld [vmem:[#allocation2 + $0x744] ss:$8 sps:$4 sm:$0xff]   ;;  %v286_v31 = vld [vmem:[%s9592_s0 + $0x2d0] sm:$0xff] }
 0x175   :  { %4356 = vmatprep.subr.bf16.mxu0 %v7627_v51  ;;  %3902 = vmatprep.subr.bf16.mxu1 %v7666_v7  ;;  %v365_v51 = vld [vmem:[%s9592_s0 + $0x548] sm:$0xff] }
 0x176   :  { %3840 = vmatmul.mubr.bf16.gmra.mrb[12].mxu1 %v6169_v8  ;;  %v7714_v7 = vld [vmem:[#allocation2 + $0x2e4] ss:$8 sps:$4 sm:$0xff]   ;;  %v6265_v8 = vcombine.low %v365_v51, %v377_v53 }
 0x177   :  { %3903 = vmatpush1.bf16.msra.mxu1 %v7664_v10  ;;  %3849 = vmatprep.mubr.bf16.mxu1 %v6194_v11  ;;  %v7712_v10 = vld [vmem:[#allocation2 + $0x2e0] ss:$8 sps:$4 sm:$0xff]   ;;  %v6100_v11 = vcombine.high %v198_v5, %v210_v6 }
 0x178   :  { %4357 = vmatpush1.bf16.msra.mxu0 %v7625_v57  ;;  %3904 = vmatprep.subr.bf16.mxu1 %v7672_v12  ;;  %v6241_v57 = vcombine.low %v341_v36, %v353_v37  ;;  %v7693_v12 = vld [vmem:[#allocation2 + $0x724] ss:$8 sps:$4 sm:$0xff]   ;;  %v246_v37 = vld [vmem:[%s9592_s0 + $0x190] sm:$0xff] }
 0x179   :  { %4358 = vmatprep.subr.bf16.mxu0 %v7633_v60  ;;  %v6266_v60 = vcombine.high %v365_v51, %v377_v53  ;;  %v282_v53 = vld [vmem:[%s9592_s0 + $0x2b0] sm:$0xff] }
 0x17b   :  { %4302 = vmatmul.mubr.bf16.gmra.mrb[16].mxu0 %v6201_v1  ;;  %3905 = vmatpush1.bf16.msra.mxu1 %v7670_v19  ;;  %v6107_v1 = vcombine.low %v202_v45, %v214_v47  ;;  %v7718_v19 = vld [vmem:[#allocation2 + $0x2f0] ss:$8 sps:$4 sm:$0xff]  }
 0x17c   :  { %4359 = vmatpush1.bf16.msra.mxu0 %v7631_v0  ;;  %4311 = vmatprep.mubr.bf16.mxu0 %v6226_v4  ;;  %v7679_v0 = vld [vmem:[#allocation2 + $0x700] ss:$8 sps:$4 sm:$0xff]   ;;  %v6132_v4 = vcombine.high %v226_v61, %v238_v63  ;;  %v298_v45 = vld [vmem:[%s9592_s0 + $0x330] sm:$0xff] }
 0x17d   :  { %4360 = vmatprep.subr.bf16.mxu0 %v7639_v2  ;;  %3906 = vmatprep.subr.bf16.mxu1 %v7678_v23  ;;  %v7706_v2 = vld [vmem:[#allocation2 + $0x2d0] ss:$8 sps:$4 sm:$0xff]   ;;  %v7726_v23 = vld [vmem:[#allocation2 + $0x304] ss:$8 sps:$4 sm:$0xff]  }
 0x17e   :  { %3850 = vmatmul.mubr.bf16.gmra.mrb[16].mxu1 %v6193_v25  ;;  %v7697_v25 = vld [vmem:[#allocation2 + $0x730] ss:$8 sps:$4 sm:$0xff]  }
 0x17f   :  { %3907 = vmatpush1.bf16.msra.mxu1 %v7676_v26  ;;  %3859 = vmatprep.mubr.bf16.mxu1 %v6218_v27  ;;  %v7724_v26 = vld [vmem:[#allocation2 + $0x300] ss:$8 sps:$4 sm:$0xff]   ;;  %v6124_v27 = vcombine.high %v222_v21, %v234_v22  ;;  %v310_v47 = vld [vmem:[%s9592_s0 + $0x390] sm:$0xff] }
 0x180   :  { %4361 = vmatpush1.bf16.msra.mxu0 %v7637_v9  ;;  %3908 = vmatprep.subr.bf16.mxu1 %v7684_v30  ;;  %v7685_v9 = vld [vmem:[#allocation2 + $0x710] ss:$8 sps:$4 sm:$0xff]   ;;  %v6204_v51 = vcombine.high %v298_v45, %v310_v47 }
 0x181   :  { %4362 = vmatprep.subr.bf16.mxu0 %v7645_v13  ;;  %v7720_v13 = vld [vmem:[#allocation2 + $0x2f4] ss:$8 sps:$4 sm:$0xff]  }
 0x182   :  { %v274_v30 = vld [vmem:[%s9592_s0 + $0x270] sm:$0xff] }
 0x183   :  { %4312 = vmatmul.mubr.bf16.gmra.mrb[20].mxu0 %v6225_v17  ;;  %3909 = vmatpush1.bf16.msra.mxu1 %v7682_v34  ;;  %v6131_v17 = vcombine.low %v226_v61, %v238_v63  ;;  %v7711_v34 = vld [vmem:[#allocation2 + $0x754] ss:$8 sps:$4 sm:$0xff]   ;;  %v6180_v36 = vcombine.high %v274_v30, %v286_v31  ;;  %v7729_v61 = vld [vmem:[#allocation2 + $0x784] ss:$8 sps:$4 sm:$0xff]  }
 0x184   :  { %4363 = vmatpush1.bf16.msra.mxu0 %v7643_v16  ;;  %4321 = vmatprep.mubr.bf16.mxu0 %v6250_v20  ;;  %v7691_v16 = vld [vmem:[#allocation2 + $0x720] ss:$8 sps:$4 sm:$0xff]   ;;  %v6156_v20 = vcombine.high %v250_v14, %v262_v15  ;;  %v334_v63 = vld [vmem:[%s9592_s0 + $0x450] sm:$0xff] }
 0x185   :  { %4364 = vmatprep.subr.bf16.mxu0 %v7651_v18  ;;  %3910 = vmatprep.subr.bf16.mxu1 %v7690_v39  ;;  %v7699_v18 = vld [vmem:[#allocation2 + $0x734] ss:$8 sps:$4 sm:$0xff]   ;;  %v7738_v39 = vld [vmem:[#allocation2 + $0x324] ss:$8 sps:$4 sm:$0xff]  }
 0x186   :  { %3860 = vmatmul.mubr.bf16.gmra.mrb[20].mxu1 %v6217_v41  ;;  %v6123_v41 = vcombine.low %v222_v21, %v234_v22  ;;  %v330_v21 = vld [vmem:[%s9592_s0 + $0x430] sm:$0xff] }
 0x187   :  { %3911 = vmatpush1.bf16.msra.mxu1 %v7688_v43  ;;  %3869 = vmatprep.mubr.bf16.mxu1 %v6242_v44  ;;  %v7717_v44 = vld [vmem:[#allocation2 + $0x764] ss:$8 sps:$4 sm:$0xff]   ;;  %v7747_v22 = vld [vmem:[#allocation2 + $0x7b4] ss:$8 sps:$4 sm:$0xff]  }
 0x188   :  { %4365 = vmatpush1.bf16.msra.mxu0 %v7649_v24  ;;  %3912 = vmatprep.subr.bf16.mxu1 %v7696_v46  ;;  %v6099_v24 = vcombine.low %v198_v5, %v210_v6  ;;  %v7744_v46 = vld [vmem:[#allocation2 + $0x334] ss:$8 sps:$4 sm:$0xff]  }
 0x189   :  { %4366 = vmatprep.subr.bf16.mxu0 %v7657_v28  ;;  %v7732_v28 = vld [vmem:[#allocation2 + $0x314] ss:$8 sps:$4 sm:$0xff]  }
 0x18a   :  { %v306_v5 = vld [vmem:[%s9592_s0 + $0x370] sm:$0xff] }
 0x18b   :  { %4322 = vmatmul.mubr.bf16.gmra.mrb[24].mxu0 %v6249_v32  ;;  %3913 = vmatpush1.bf16.msra.mxu1 %v7694_v50  ;;  %v7703_v32 = vld [vmem:[#allocation2 + $0x740] ss:$8 sps:$4 sm:$0xff]   ;;  %v7742_v50 = vld [vmem:[#allocation2 + $0x330] ss:$8 sps:$4 sm:$0xff]   ;;  %v7735_v6 = vld [vmem:[#allocation2 + $0x794] ss:$8 sps:$4 sm:$0xff]  }
 0x18c   :  { %4367 = vmatpush1.bf16.msra.mxu0 %v7655_v33  ;;  %4331 = vmatprep.mubr.bf16.mxu0 %v6274_v35  ;;  %v6155_v33 = vcombine.low %v250_v14, %v262_v15  ;;  %v7730_v35 = vld [vmem:[#allocation2 + $0x310] ss:$8 sps:$4 sm:$0xff]  }
 0x18d   :  { %4368 = vmatprep.subr.bf16.mxu0 %v7663_v38  ;;  %3914 = vmatprep.subr.bf16.mxu1 %v7702_v55  ;;  %v258_v38 = vld [vmem:[%s9592_s0 + $0x1f0] sm:$0xff]  ;;  %v7750_v55 = vld [vmem:[#allocation2 + $0x344] ss:$8 sps:$4 sm:$0xff]  }
 0x18e   :  { %3870 = vmatmul.mubr.bf16.gmra.mrb[24].mxu1 %v6241_v57  ;;  %v6148_v43 = vcombine.high %v246_v37, %v258_v38  ;;  %v7748_v57 = vld [vmem:[#allocation2 + $0x340] ss:$8 sps:$4 sm:$0xff]   ;;  %v346_v14 = vld [vmem:[%s9592_s0 + $0x4b0] sm:$0xff] }
 0x18f   :  { %3915 = vmatpush1.bf16.msra.mxu1 %v7700_v59  ;;  %3879 = vmatprep.mubr.bf16.mxu1 %v6266_v60  ;;  %v7721_v59 = vld [vmem:[#allocation2 + $0x770] ss:$8 sps:$4 sm:$0xff]   ;;  %v7756_v60 = vld [vmem:[#allocation2 + $0x354] ss:$8 sps:$4 sm:$0xff]  }
 0x190   :  { %4369 = vmatpush1.bf16.msra.mxu0 %v7661_v40  ;;  %3916 = vmatprep.subr.bf16.mxu1 %v7708_v62  ;;  %v7709_v40 = vld [vmem:[#allocation2 + $0x750] ss:$8 sps:$4 sm:$0xff]  }
 0x191   :  { %4370 = vmatprep.subr.bf16.mxu0 %v7669_v42  ;;  %v7736_v42 = vld [vmem:[#allocation2 + $0x320] ss:$8 sps:$4 sm:$0xff]   ;;  %v322_v62 = vld [vmem:[%s9592_s0 + $0x3f0] sm:$0xff] }
 0x192   :  { %v358_v15 = vld [vmem:[%s9592_s0 + $0x510] sm:$0xff] }
 0x193   :  { %4332 = vmatmul.mubr.bf16.gmra.mrb[28].mxu0 %v6273_v48  ;;  %3917 = vmatpush1.bf16.msra.mxu1 %v7706_v2  ;;  %v6179_v48 = vcombine.low %v274_v30, %v286_v31  ;;  %v7754_v2 = vld [vmem:[#allocation2 + $0x350] ss:$8 sps:$4 sm:$0xff]  }
 0x194   :  { %4371 = vmatpush1.bf16.msra.mxu0 %v7667_v49  ;;  %4374 = vmatprep.mubr.bf16.mxu0 %v6108_v52  ;;  %v7715_v49 = vld [vmem:[#allocation2 + $0x760] ss:$8 sps:$4 sm:$0xff]   ;;  %v270_v52 = vld [vmem:[%s9592_s0 + $0x250] sm:$0xff] }
 0x195   :  { %4372 = vmatprep.subr.bf16.mxu0 %v7675_v54  ;;  %3918 = vmatprep.subr.bf16.mxu1 %v7714_v7  ;;  %v7723_v54 = vld [vmem:[#allocation2 + $0x774] ss:$8 sps:$4 sm:$0xff]   ;;  %v7762_v7 = vld [vmem:[#allocation2 + $0x364] ss:$8 sps:$4 sm:$0xff]  }
 0x196   :  { %3880 = vmatmul.mubr.bf16.gmra.mrb[28].mxu1 %v6265_v8  ;;  %v6171_v8 = vcombine.low %v270_v52, %v282_v53  ;;  %v370_v30 = vld [vmem:[%s9592_s0 + $0x570] sm:$0xff] }
 0x197   :  { %3919 = vmatpush1.bf16.msra.mxu1 %v7712_v10  ;;  %3922 = vmatprep.mubr.bf16.mxu1 %v6100_v11  ;;  %v7733_v11 = vld [vmem:[#allocation2 + $0x790] ss:$8 sps:$4 sm:$0xff]  }
 0x198   :  { %4373 = vmatpush1.bf16.msra.mxu0 %v7673_v56  ;;  %3920 = vmatprep.subr.bf16.mxu1 %v7720_v13  ;;  %v6147_v56 = vcombine.low %v246_v37, %v258_v38  ;;  %v7741_v13 = vld [vmem:[#allocation2 + $0x7a4] ss:$8 sps:$4 sm:$0xff]   ;;  %v382_v31 = vld [vmem:[%s9592_s0 + $0x5d0] sm:$0xff] }
 0x199   :  { %4455 = vmatprep.subr.bf16.mxu0 %v7681_v58  ;;  %v6172_v58 = vcombine.high %v270_v52, %v282_v53  ;;  %v354_v37 = vld [vmem:[%s9592_s0 + $0x4f0] sm:$0xff] }
 0x19a   :  { %v7759_v38 = vld [vmem:[#allocation2 + $0x7d4] ss:$8 sps:$4 sm:$0xff]  }
 0x19b   :  { %4375 = vmatmul.mubr.bf16.vlgmr.msra.gmra.mrb[0].mxu0 %v6107_v1  ;;  %3921 = vmatpush1.bf16.msra.mxu1 %v7718_v19  ;;  %v7727_v1 = vld [vmem:[#allocation2 + $0x780] ss:$8 sps:$4 sm:$0xff]   ;;  %v6252_v19 = vcombine.high %v346_v14, %v358_v15  ;;  %v366_v52 = vld [vmem:[%s9592_s0 + $0x550] sm:$0xff] }
 0x19c   :  { %4456 = vmatpush1.bf16.msra.mxu0 %v7679_v0  ;;  %4384 = vmatprep.mubr.bf16.mxu0 %v6132_v4  ;;  %v6203_v0 = vcombine.low %v298_v45, %v310_v47  ;;  %v294_v4 = vld [vmem:[%s9592_s0 + $0x310] sm:$0xff]  ;;  %v7765_v45 = vld [vmem:[#allocation2 + $0x7e4] ss:$8 sps:$4 sm:$0xff]   ;;  %v215_v47 = vld [vmem:[%s9592_s0 + $0x98] sm:$0xff] }
 0x19d   :  { %4457 = vmatprep.subr.bf16.mxu0 %v7687_v3  ;;  %4003 = vmatprep.subr.bf16.mxu1 %v7726_v23  ;;  %v6228_v3 = vcombine.high %v322_v62, %v334_v63  ;;  %v6196_v10 = vcombine.high %v294_v4, %v306_v5  ;;  %v7774_v23 = vld [vmem:[#allocation2 + $0x384] ss:$8 sps:$4 sm:$0xff]   ;;  %v378_v53 = vld [vmem:[%s9592_s0 + $0x5b0] sm:$0xff] }
 0x19e   :  { %3923 = vmatmul.mubr.bf16.vlgmr.msra.gmra.mrb[0].mxu1 %v6099_v24  ;;  %v6195_v24 = vcombine.low %v294_v4, %v306_v5  ;;  %v211_v5 = vld [vmem:[%s9592_s0 + $0x78] sm:$0xff] }
 0x19f   :  { %4004 = vmatpush1.bf16.msra.mxu1 %v7724_v26  ;;  %3932 = vmatprep.mubr.bf16.mxu1 %v6124_v27  ;;  %v7745_v27 = vld [vmem:[#allocation2 + $0x7b0] ss:$8 sps:$4 sm:$0xff]  }
 0x1a0   :  { %4458 = vmatpush1.bf16.msra.mxu0 %v7685_v9  ;;  %4005 = vmatprep.subr.bf16.mxu1 %v7732_v28  ;;  %v7760_v9 = vld [vmem:[#allocation2 + $0x360] ss:$8 sps:$4 sm:$0xff]   ;;  %v7780_v28 = vld [vmem:[#allocation2 + $0x394] ss:$8 sps:$4 sm:$0xff]  }
 0x1a1   :  { %4459 = vmatprep.subr.bf16.mxu0 %v7693_v12  ;;  %v7768_v12 = vld [vmem:[#allocation2 + $0x374] ss:$8 sps:$4 sm:$0xff]  }
 0x1a3   :  { %4385 = vmatmul.mubr.bf16.gmra.mrb[4].mxu0 %v6131_v17  ;;  %4006 = vmatpush1.bf16.msra.mxu1 %v7730_v35  ;;  %v7739_v17 = vld [vmem:[#allocation2 + $0x7a0] ss:$8 sps:$4 sm:$0xff]   ;;  %v6276_v35 = vcombine.high %v370_v30, %v382_v31 }
 0x1a4   :  { %4460 = vmatpush1.bf16.msra.mxu0 %v7691_v16  ;;  %4394 = vmatprep.mubr.bf16.mxu0 %v6156_v20  ;;  %v6227_v16 = vcombine.low %v322_v62, %v334_v63  ;;  %v318_v20 = vld [vmem:[%s9592_s0 + $0x3d0] sm:$0xff]  ;;  %v239_v63 = vld [vmem:[%s9592_s0 + $0x158] sm:$0xff] }
 0x1a5   :  { %4461 = vmatprep.subr.bf16.mxu0 %v7699_v18  ;;  %4007 = vmatprep.subr.bf16.mxu1 %v7738_v39  ;;  %v7766_v18 = vld [vmem:[#allocation2 + $0x370] ss:$8 sps:$4 sm:$0xff]   ;;  %v6220_v26 = vcombine.high %v318_v20, %v330_v21  ;;  %v7786_v39 = vld [vmem:[#allocation2 + $0x3a4] ss:$8 sps:$4 sm:$0xff]   ;;  %v7804_v62 = vld [vmem:[#allocation2 + $0x3d4] ss:$8 sps:$4 sm:$0xff]  }
 0x1a6   :  { %3933 = vmatmul.mubr.bf16.gmra.mrb[4].mxu1 %v6123_v41  ;;  %v7784_v41 = vld [vmem:[#allocation2 + $0x3a0] ss:$8 sps:$4 sm:$0xff]  }
 0x1a7   :  { %4008 = vmatpush1.bf16.msra.mxu1 %v7736_v42  ;;  %3942 = vmatprep.mubr.bf16.mxu1 %v6148_v43  ;;  %v7757_v43 = vld [vmem:[#allocation2 + $0x7d0] ss:$8 sps:$4 sm:$0xff]  }
 0x1a8   :  { %4462 = vmatpush1.bf16.msra.mxu0 %v7697_v25  ;;  %4009 = vmatprep.subr.bf16.mxu1 %v7744_v46  ;;  %v7772_v25 = vld [vmem:[#allocation2 + $0x380] ss:$8 sps:$4 sm:$0xff]   ;;  %v203_v46 = vld [vmem:[%s9592_s0 + $0x38] sm:$0xff] }
 0x1a9   :  { %4463 = vmatprep.subr.bf16.mxu0 %v7705_v29  ;;  %v7753_v29 = vld [vmem:[#allocation2 + $0x7c4] ss:$8 sps:$4 sm:$0xff]  }
 0x1ab   :  { %4395 = vmatmul.mubr.bf16.gmra.mrb[8].mxu0 %v6155_v33  ;;  %4010 = vmatpush1.bf16.msra.mxu1 %v7742_v50  ;;  %v7751_v33 = vld [vmem:[#allocation2 + $0x7c0] ss:$8 sps:$4 sm:$0xff]   ;;  %v7790_v50 = vld [vmem:[#allocation2 + $0x3b0] ss:$8 sps:$4 sm:$0xff]  }
 0x1ac   :  { %4464 = vmatpush1.bf16.msra.mxu0 %v7703_v32  ;;  %4404 = vmatprep.mubr.bf16.mxu0 %v6180_v36  ;;  %v6251_v32 = vcombine.low %v346_v14, %v358_v15  ;;  %v342_v36 = vld [vmem:[%s9592_s0 + $0x490] sm:$0xff]  ;;  %v263_v15 = vld [vmem:[%s9592_s0 + $0x218] sm:$0xff] }
 0x1ad   :  { %4465 = vmatprep.subr.bf16.mxu0 %v7711_v34  ;;  %4011 = vmatprep.subr.bf16.mxu1 %v7750_v55  ;;  %v7778_v34 = vld [vmem:[#allocation2 + $0x390] ss:$8 sps:$4 sm:$0xff]   ;;  %v6244_v42 = vcombine.high %v342_v36, %v354_v37  ;;  %v7798_v55 = vld [vmem:[#allocation2 + $0x3c4] ss:$8 sps:$4 sm:$0xff]   ;;  %v7816_v14 = vld [vmem:[#allocation2 + $0x3f4] ss:$8 sps:$4 sm:$0xff]  }
 0x1ae   :  { %3943 = vmatmul.mubr.bf16.gmra.mrb[8].mxu1 %v6147_v56  ;;  %v7769_v56 = vld [vmem:[#allocation2 + $0x7f0] ss:$8 sps:$4 sm:$0xff]  }
 0x1af   :  { %4012 = vmatpush1.bf16.msra.mxu1 %v7748_v57  ;;  %3952 = vmatprep.mubr.bf16.mxu1 %v6172_v58  ;;  %v6243_v57 = vcombine.low %v342_v36, %v354_v37  ;;  %v7796_v58 = vld [vmem:[#allocation2 + $0x3c0] ss:$8 sps:$4 sm:$0xff]   ;;  %v7813_v37 = vld [vmem:[#allocation2 + $0x864] ss:$8 sps:$4 sm:$0xff]  }
 0x1b0   :  { %4466 = vmatpush1.bf16.msra.mxu0 %v7709_v40  ;;  %4013 = vmatprep.subr.bf16.mxu1 %v7756_v60  ;;  %v6219_v40 = vcombine.low %v318_v20, %v330_v21  ;;  %v7777_v60 = vld [vmem:[#allocation2 + $0x804] ss:$8 sps:$4 sm:$0xff]   ;;  %v235_v21 = vld [vmem:[%s9592_s0 + $0x138] sm:$0xff] }
 0x1b1   :  { %4467 = vmatprep.subr.bf16.mxu0 %v7717_v44  ;;  %v7792_v44 = vld [vmem:[#allocation2 + $0x3b4] ss:$8 sps:$4 sm:$0xff]  }
 0x1b3   :  { %4405 = vmatmul.mubr.bf16.gmra.mrb[12].mxu0 %v6179_v48  ;;  %4014 = vmatpush1.bf16.msra.mxu1 %v7754_v2  ;;  %v6275_v48 = vcombine.low %v370_v30, %v382_v31  ;;  %v7802_v2 = vld [vmem:[#allocation2 + $0x3d0] ss:$8 sps:$4 sm:$0xff]  }
 0x1b4   :  { %4468 = vmatpush1.bf16.msra.mxu0 %v7715_v49  ;;  %4414 = vmatprep.mubr.bf16.mxu0 %v6204_v51  ;;  %v7763_v49 = vld [vmem:[#allocation2 + $0x7e0] ss:$8 sps:$4 sm:$0xff]   ;;  %v6110_v51 = vcombine.high %v203_v46, %v215_v47  ;;  %v247_v31 = vld [vmem:[%s9592_s0 + $0x198] sm:$0xff] }
 0x1b5   :  { %4469 = vmatprep.subr.bf16.mxu0 %v7723_v54  ;;  %4015 = vmatprep.subr.bf16.mxu1 %v7762_v7  ;;  %v7771_v54 = vld [vmem:[#allocation2 + $0x7f4] ss:$8 sps:$4 sm:$0xff]   ;;  %v7810_v7 = vld [vmem:[#allocation2 + $0x3e4] ss:$8 sps:$4 sm:$0xff]  }
 0x1b6   :  { %3953 = vmatmul.mubr.bf16.gmra.mrb[12].mxu1 %v6171_v8  ;;  %v7781_v8 = vld [vmem:[#allocation2 + $0x810] ss:$8 sps:$4 sm:$0xff]  }
 0x1b7   :  { %4016 = vmatpush1.bf16.msra.mxu1 %v7760_v9  ;;  %3962 = vmatprep.mubr.bf16.mxu1 %v6196_v10  ;;  %v6267_v9 = vcombine.low %v366_v52, %v378_v53  ;;  %v7789_v10 = vld [vmem:[#allocation2 + $0x824] ss:$8 sps:$4 sm:$0xff]  }
 0x1b8   :  { %4470 = vmatpush1.bf16.msra.mxu0 %v7721_v59  ;;  %4017 = vmatprep.subr.bf16.mxu1 %v7768_v12  ;;  %v6268_v59 = vcombine.high %v366_v52, %v378_v53  ;;  %v335_v52 = vld [vmem:[%s9592_s0 + $0x458] sm:$0xff]  ;;  %v7820_v53 = vld [vmem:[#allocation2 + $0x880] ss:$8 sps:$4 sm:$0xff]  }
 0x1b9   :  { %4471 = vmatprep.subr.bf16.mxu0 %v7729_v61  ;;  %v227_v61 = vld [vmem:[%s9592_s0 + $0xf8] sm:$0xff] }
 0x1ba   :  { %v6134_v4 = vcombine.high %v227_v61, %v239_v63 }
 0x1bb   :  { %4415 = vmatmul.mubr.bf16.gmra.mrb[16].mxu0 %v6203_v0  ;;  %4018 = vmatpush1.bf16.msra.mxu1 %v7766_v18  ;;  %v6109_v0 = vcombine.low %v203_v46, %v215_v47  ;;  %v6133_v18 = vcombine.low %v227_v61, %v239_v63  ;;  %v7819_v46 = vld [vmem:[#allocation2 + $0x874] ss:$8 sps:$4 sm:$0xff]   ;;  %v7817_v47 = vld [vmem:[#allocation2 + $0x870] ss:$8 sps:$4 sm:$0xff]   ;;  %v7828_v61 = vld [vmem:[#allocation2 + $0x8a4] ss:$8 sps:$4 sm:$0xff]  }
 0x1bc   :  { %4472 = vmatpush1.bf16.msra.mxu0 %v7727_v1  ;;  %4424 = vmatprep.mubr.bf16.mxu0 %v6228_v3  ;;  %v7775_v1 = vld [vmem:[#allocation2 + $0x800] ss:$8 sps:$4 sm:$0xff]   ;;  %v199_v3 = vld [vmem:[%s9592_s0 + $0x18] sm:$0xff]  ;;  %v8932_v63 = vld [vmem:[#allocation2 + $0xb04] ss:$8 sps:$4 sm:$0xff]  }
 0x1bd   :  { %4473 = vmatprep.subr.bf16.mxu0 %v7735_v6  ;;  %4019 = vmatprep.subr.bf16.mxu1 %v7774_v23  ;;  %v7783_v6 = vld [vmem:[#allocation2 + $0x814] ss:$8 sps:$4 sm:$0xff]   ;;  %v6102_v12 = vcombine.high %v199_v3, %v211_v5  ;;  %v6101_v23 = vcombine.low %v199_v3, %v211_v5  ;;  %v7826_v3 = vld [vmem:[#allocation2 + $0x8a0] ss:$8 sps:$4 sm:$0xff]  }
 0x1be   :  { %3963 = vmatmul.mubr.bf16.gmra.mrb[16].mxu1 %v6195_v24  ;;  %v7793_v24 = vld [vmem:[#allocation2 + $0x830] ss:$8 sps:$4 sm:$0xff]  }
 0x1bf   :  { %4020 = vmatpush1.bf16.msra.mxu1 %v7772_v25  ;;  %3972 = vmatprep.mubr.bf16.mxu1 %v6220_v26  ;;  %v7801_v25 = vld [vmem:[#allocation2 + $0x844] ss:$8 sps:$4 sm:$0xff]   ;;  %v319_v5 = vld [vmem:[%s9592_s0 + $0x3d8] sm:$0xff] }
 0x1c0   :  { %4474 = vmatpush1.bf16.msra.mxu0 %v7733_v11  ;;  %4021 = vmatprep.subr.bf16.mxu1 %v7780_v28  ;;  %v7808_v11 = vld [vmem:[#allocation2 + $0x3e0] ss:$8 sps:$4 sm:$0xff]   ;;  %v287_v28 = vld [vmem:[%s9592_s0 + $0x2d8] sm:$0xff] }
 0x1c1   :  { %4475 = vmatprep.subr.bf16.mxu0 %v7741_v13  ;;  %v251_v13 = vld [vmem:[%s9592_s0 + $0x1b8] sm:$0xff] }
 0x1c2   :  { %v6158_v20 = vcombine.high %v251_v13, %v263_v15  ;;  %v6157_v30 = vcombine.low %v251_v13, %v263_v15  ;;  %v7834_v13 = vld [vmem:[#allocation2 + $0x8c4] ss:$8 sps:$4 sm:$0xff]  }
 0x1c3   :  { %4425 = vmatmul.mubr.bf16.gmra.mrb[20].mxu0 %v6227_v16  ;;  %4022 = vmatpush1.bf16.msra.mxu1 %v7778_v34  ;;  %v7787_v16 = vld [vmem:[#allocation2 + $0x820] ss:$8 sps:$4 sm:$0xff]   ;;  %v7807_v34 = vld [vmem:[#allocation2 + $0x854] ss:$8 sps:$4 sm:$0xff]   ;;  %v8956_v15 = vld [vmem:[#allocation2 + $0xb24] ss:$8 sps:$4 sm:$0xff]  }
 0x1c4   :  { %4476 = vmatpush1.bf16.msra.mxu0 %v7739_v17  ;;  %4434 = vmatprep.mubr.bf16.mxu0 %v6252_v19  ;;  %v7814_v17 = vld [vmem:[#allocation2 + $0x3f0] ss:$8 sps:$4 sm:$0xff]  }
 0x1c5   :  { %4477 = vmatprep.subr.bf16.mxu0 %v7747_v22  ;;  %4023 = vmatprep.subr.bf16.mxu1 %v7786_v39  ;;  %v223_v19 = vld [vmem:[%s9592_s0 + $0xd8] sm:$0xff] }
 0x1c6   :  { %3973 = vmatmul.mubr.bf16.gmra.mrb[20].mxu1 %v6219_v40  ;;  %v7795_v22 = vld [vmem:[#allocation2 + $0x834] ss:$8 sps:$4 sm:$0xff]   ;;  %v6126_v26 = vcombine.high %v223_v19, %v235_v21  ;;  %v6125_v36 = vcombine.low %v223_v19, %v235_v21  ;;  %v7832_v19 = vld [vmem:[#allocation2 + $0x8c0] ss:$8 sps:$4 sm:$0xff]  }
 0x1c7   :  { %4024 = vmatpush1.bf16.msra.mxu1 %v7784_v41  ;;  %3982 = vmatprep.mubr.bf16.mxu1 %v6244_v42  ;;  %v299_v39 = vld [vmem:[%s9592_s0 + $0x338] sm:$0xff]  ;;  %v7811_v41 = vld [vmem:[#allocation2 + $0x860] ss:$8 sps:$4 sm:$0xff]  }
 0x1c8   :  { %4478 = vmatpush1.bf16.msra.mxu0 %v7745_v27  ;;  %4025 = vmatprep.subr.bf16.mxu1 %v7792_v44  ;;  %v275_v27 = vld [vmem:[%s9592_s0 + $0x278] sm:$0xff] }
 0x1c9   :  { %4479 = vmatprep.subr.bf16.mxu0 %v7753_v29  ;;  %v7799_v29 = vld [vmem:[#allocation2 + $0x840] ss:$8 sps:$4 sm:$0xff]   ;;  %v311_v40 = vld [vmem:[%s9592_s0 + $0x398] sm:$0xff]  ;;  %v6181_v42 = vcombine.low %v275_v27, %v287_v28 }
 0x1ca   :  { %v283_v44 = vld [vmem:[%s9592_s0 + $0x2b8] sm:$0xff] }
 0x1cb   :  { %4435 = vmatmul.mubr.bf16.gmra.mrb[24].mxu0 %v6251_v32  ;;  %4026 = vmatpush1.bf16.msra.mxu1 %v7790_v50  ;;  %v259_v32 = vld [vmem:[%s9592_s0 + $0x1f8] sm:$0xff] }
 0x1cc   :  { %4480 = vmatpush1.bf16.msra.mxu0 %v7751_v33  ;;  %4444 = vmatprep.mubr.bf16.mxu0 %v6276_v35  ;;  %v6182_v33 = vcombine.high %v275_v27, %v287_v28  ;;  %v7805_v35 = vld [vmem:[#allocation2 + $0x850] ss:$8 sps:$4 sm:$0xff]  }
 0x1cd   :  { %4481 = vmatprep.subr.bf16.mxu0 %v7759_v38  ;;  %4027 = vmatprep.subr.bf16.mxu1 %v7798_v55  ;;  %v6150_v38 = vcombine.high %v247_v31, %v259_v32  ;;  %v295_v55 = vld [vmem:[%s9592_s0 + $0x318] sm:$0xff] }
 0x1ce   :  { %3983 = vmatmul.mubr.bf16.gmra.mrb[24].mxu1 %v6243_v57  ;;  %v343_v21 = vld [vmem:[%s9592_s0 + $0x498] sm:$0xff] }
 0x1cf   :  { %4028 = vmatpush1.bf16.msra.mxu1 %v7796_v58  ;;  %3992 = vmatprep.mubr.bf16.mxu1 %v6268_v59  ;;  %v7825_v58 = vld [vmem:[#allocation2 + $0x894] ss:$8 sps:$4 sm:$0xff]   ;;  %v7823_v59 = vld [vmem:[#allocation2 + $0x890] ss:$8 sps:$4 sm:$0xff]  }
 0x1d0   :  { %4482 = vmatpush1.bf16.msra.mxu0 %v7757_v43  ;;  %4029 = vmatprep.subr.bf16.mxu1 %v7804_v62  ;;  %v271_v43 = vld [vmem:[%s9592_s0 + $0x258] sm:$0xff] }
 0x1d1   :  { %4483 = vmatprep.subr.bf16.mxu0 %v7765_v45  ;;  %v6206_v45 = vcombine.high %v299_v39, %v311_v40  ;;  %v6174_v50 = vcombine.high %v271_v43, %v283_v44  ;;  %v7835_v27 = vld [vmem:[#allocation2 + $0x8d0] ss:$8 sps:$4 sm:$0xff]  }
 0x1d3   :  { %4445 = vmatmul.mubr.bf16.gmra.mrb[28].mxu0 %v6275_v48  ;;  %4030 = vmatpush1.bf16.msra.mxu1 %v7802_v2  ;;  %v6149_v48 = vcombine.low %v247_v31, %v259_v32  ;;  %v8940_v2 = vld [vmem:[#allocation2 + $0xb00] ss:$8 sps:$4 sm:$0xff]   ;;  %v8980_v31 = vld [vmem:[#allocation2 + $0xb44] ss:$8 sps:$4 sm:$0xff]  }
 0x1d4   :  { %4484 = vmatpush1.bf16.msra.mxu0 %v7763_v49  ;;  %4487 = vmatprep.mubr.bf16.mxu0 %v6110_v51  ;;  %v7822_v49 = vld [vmem:[#allocation2 + $0x884] ss:$8 sps:$4 sm:$0xff]   ;;  %v323_v51 = vld [vmem:[%s9592_s0 + $0x3f8] sm:$0xff] }
 0x1d5   :  { %4485 = vmatprep.subr.bf16.mxu0 %v7771_v54  ;;  %4031 = vmatprep.subr.bf16.mxu1 %v7810_v7  ;;  %v6205_v54 = vcombine.low %v299_v39, %v311_v40  ;;  %v6230_v57 = vcombine.high %v323_v51, %v335_v52  ;;  %v8950_v7 = vld [vmem:[#allocation2 + $0xb14] ss:$8 sps:$4 sm:$0xff]   ;;  %v204_v32 = vld [vmem:[%s9592_s0 + $0x40] sm:$0xff] }
 0x1d6   :  { %3993 = vmatmul.mubr.bf16.gmra.mrb[28].mxu1 %v6267_v9  ;;  %v8952_v9 = vld [vmem:[#allocation2 + $0xb10] ss:$8 sps:$4 sm:$0xff]   ;;  %v8998_v39 = vld [vmem:[#allocation2 + $0xb54] ss:$8 sps:$4 sm:$0xff]  }
 0x1d7   :  { %4032 = vmatpush1.bf16.msra.mxu1 %v7808_v11  ;;  %4035 = vmatprep.mubr.bf16.mxu1 %v6102_v12  ;;  %v7829_v11 = vld [vmem:[#allocation2 + $0x8b0] ss:$8 sps:$4 sm:$0xff]  }
 0x1d8   :  { %4486 = vmatpush1.bf16.msra.mxu0 %v7769_v56  ;;  %4033 = vmatprep.subr.bf16.mxu1 %v7816_v14  ;;  %v307_v56 = vld [vmem:[%s9592_s0 + $0x378] sm:$0xff] }
 0x1d9   :  { %4568 = vmatprep.subr.bf16.mxu0 %v7777_v60  ;;  %v6173_v60 = vcombine.low %v271_v43, %v283_v44  ;;  %v6198_v62 = vcombine.high %v295_v55, %v307_v56  ;;  %v6197_v12 = vcombine.low %v295_v55, %v307_v56  ;;  %v7841_v43 = vld [vmem:[#allocation2 + $0x8f0] ss:$8 sps:$4 sm:$0xff]  }
 0x1da   :  { %v9018_v56 = vld [vmem:[#allocation2 + $0xb70] ss:$8 sps:$4 sm:$0xff]  }
 0x1db   :  { %4488 = vmatmul.mubr.bf16.vlgmr.msra.gmra.mrb[0].mxu0 %v6109_v0  ;;  %4034 = vmatpush1.bf16.msra.mxu1 %v7814_v17  ;;  %v347_v0 = vld [vmem:[%s9592_s0 + $0x4b8] sm:$0xff] }
 0x1dc   :  { %4569 = vmatpush1.bf16.msra.mxu0 %v7775_v1  ;;  %4497 = vmatprep.mubr.bf16.mxu0 %v6134_v4  ;;  %v359_v1 = vld [vmem:[%s9592_s0 + $0x518] sm:$0xff]  ;;  %v6229_v4 = vcombine.low %v323_v51, %v335_v52  ;;  %v7844_v52 = vld [vmem:[#allocation2 + $0x900] ss:$8 sps:$4 sm:$0xff]  }
 0x1dd   :  { %4570 = vmatprep.subr.bf16.mxu0 %v7783_v6  ;;  %6980 = vmatprep.subr.bf16.mxu1 %v8932_v63  ;;  %v331_v6 = vld [vmem:[%s9592_s0 + $0x438] sm:$0xff] }
 0x1de   :  { %4036 = vmatmul.mubr.bf16.vlgmr.msra.gmra.mrb[0].mxu1 %v6101_v23  ;;  %v6222_v14 = vcombine.high %v319_v5, %v331_v6  ;;  %v383_v17 = vld [vmem:[%s9592_s0 + $0x5d8] sm:$0xff]  ;;  %v6221_v28 = vcombine.low %v319_v5, %v331_v6 }
 0x1df   :  { %4045 = vmatprep.mubr.bf16.mxu1 %v6126_v26  ;;  %6996 = vmatpush1.bf16.msra.mxu1 %v8940_v2  ;;  %v8974_v23 = vld [vmem:[#allocation2 + $0xb34] ss:$8 sps:$4 sm:$0xff]  }
 0x1e0   :  { %4571 = vmatpush1.bf16.msra.mxu0 %v7781_v8  ;;  %v6254_v8 = vcombine.high %v347_v0, %v359_v1  ;;  %6981 = vmatprep.subr.bf16.mxu1 %v8950_v7  ;;  %v7837_v26 = vld [vmem:[#allocation2 + $0x8d4] ss:$8 sps:$4 sm:$0xff]  }
 0x1e1   :  { %4572 = vmatprep.subr.bf16.mxu0 %v7789_v10  ;;  %v7831_v10 = vld [vmem:[#allocation2 + $0x8b4] ss:$8 sps:$4 sm:$0xff]  }
 0x1e2   :  { %v9034_v5 = vld [vmem:[#allocation2 + $0xb94] ss:$8 sps:$4 sm:$0xff]  }
 0x1e3   :  { %4498 = vmatmul.mubr.bf16.gmra.mrb[4].mxu0 %v6133_v18  ;;  %6997 = vmatpush1.bf16.msra.mxu1 %v8952_v9  ;;  %v8964_v18 = vld [vmem:[#allocation2 + $0xb20] ss:$8 sps:$4 sm:$0xff]  }
 0x1e4   :  { %4573 = vmatpush1.bf16.msra.mxu0 %v7787_v16  ;;  %4507 = vmatprep.mubr.bf16.mxu0 %v6158_v20  ;;  %v371_v16 = vld [vmem:[%s9592_s0 + $0x578] sm:$0xff]  ;;  %v6253_v20 = vcombine.low %v347_v0, %v359_v1  ;;  %v9030_v0 = vld [vmem:[#allocation2 + $0xb80] ss:$8 sps:$4 sm:$0xff]  }
 0x1e5   :  { %4574 = vmatprep.subr.bf16.mxu0 %v7795_v22  ;;  %6982 = vmatprep.subr.bf16.mxu1 %v8956_v15  ;;  %v355_v22 = vld [vmem:[%s9592_s0 + $0x4f8] sm:$0xff] }
 0x1e6   :  { %4046 = vmatmul.mubr.bf16.gmra.mrb[4].mxu1 %v6125_v36  ;;  %v6277_v36 = vcombine.low %v371_v16, %v383_v17  ;;  %v6245_v44 = vcombine.low %v343_v21, %v355_v22 }
 0x1e7   :  { %4055 = vmatprep.mubr.bf16.mxu1 %v6150_v38  ;;  %6998 = vmatpush1.bf16.msra.mxu1 %v8964_v18  ;;  %v379_v38 = vld [vmem:[%s9592_s0 + $0x5b8] sm:$0xff] }
 0x1e8   :  { %4575 = vmatpush1.bf16.msra.mxu0 %v7793_v24  ;;  %v6278_v24 = vcombine.high %v371_v16, %v383_v17  ;;  %6983 = vmatprep.subr.bf16.mxu1 %v8974_v23  ;;  %v9048_v16 = vld [vmem:[#allocation2 + $0xba0] ss:$8 sps:$4 sm:$0xff]  }
 0x1e9   :  { %4576 = vmatprep.subr.bf16.mxu0 %v7801_v25  ;;  %v8976_v25 = vld [vmem:[#allocation2 + $0xb30] ss:$8 sps:$4 sm:$0xff]  }
 0x1eb   :  { %4508 = vmatmul.mubr.bf16.gmra.mrb[8].mxu0 %v6157_v30  ;;  %v6246_v30 = vcombine.high %v343_v21, %v355_v22  ;;  %6999 = vmatpush1.bf16.msra.mxu1 %v8976_v25  ;;  %v9052_v21 = vld [vmem:[#allocation2 + $0xbb4] ss:$8 sps:$4 sm:$0xff]  }
 0x1ec   :  { %4577 = vmatpush1.bf16.msra.mxu0 %v7799_v29  ;;  %4517 = vmatprep.mubr.bf16.mxu0 %v6182_v33  ;;  %v7840_v29 = vld [vmem:[#allocation2 + $0x8e4] ss:$8 sps:$4 sm:$0xff]  }
 0x1ed   :  { %4578 = vmatprep.subr.bf16.mxu0 %v7807_v34  ;;  %v216_v33 = vld [vmem:[%s9592_s0 + $0xa0] sm:$0xff]  ;;  %6984 = vmatprep.subr.bf16.mxu1 %v8980_v31 }
 0x1ee   :  { %4056 = vmatmul.mubr.bf16.gmra.mrb[8].mxu1 %v6149_v48  ;;  %v8988_v34 = vld [vmem:[#allocation2 + $0xb40] ss:$8 sps:$4 sm:$0xff]   ;;  %v6112_v40 = vcombine.high %v204_v32, %v216_v33  ;;  %v6111_v51 = vcombine.low %v204_v32, %v216_v33 }
 0x1ef   :  { %4065 = vmatprep.mubr.bf16.mxu1 %v6174_v50  ;;  %7000 = vmatpush1.bf16.msra.mxu1 %v8988_v34  ;;  %v228_v48 = vld [vmem:[%s9592_s0 + $0x100] sm:$0xff] }
 0x1f0   :  { %4579 = vmatpush1.bf16.msra.mxu0 %v7805_v35  ;;  %v7838_v35 = vld [vmem:[#allocation2 + $0x8e0] ss:$8 sps:$4 sm:$0xff]   ;;  %6985 = vmatprep.subr.bf16.mxu1 %v8998_v39 }
 0x1f1   :  { %4580 = vmatprep.subr.bf16.mxu0 %v7813_v37  ;;  %v367_v37 = vld [vmem:[%s9592_s0 + $0x558] sm:$0xff]  ;;  %v9012_v50 = vld [vmem:[#allocation2 + $0xb60] ss:$8 sps:$4 sm:$0xff]  }
 0x1f2   :  { %v9066_v32 = vld [vmem:[#allocation2 + $0xbc0] ss:$8 sps:$4 sm:$0xff]  }
 0x1f3   :  { %4518 = vmatmul.mubr.bf16.gmra.mrb[12].mxu0 %v6181_v42  ;;  %v7843_v42 = vld [vmem:[#allocation2 + $0x8f4] ss:$8 sps:$4 sm:$0xff]  }
 0x1f4   :  { %4581 = vmatpush1.bf16.msra.mxu0 %v7811_v41  ;;  %4527 = vmatprep.mubr.bf16.mxu0 %v6206_v45  ;;  %v9000_v41 = vld [vmem:[#allocation2 + $0xb50] ss:$8 sps:$4 sm:$0xff]   ;;  %v7846_v45 = vld [vmem:[#allocation2 + $0x904] ss:$8 sps:$4 sm:$0xff]  }
 0x1f5   :  { %4582 = vmatprep.subr.bf16.mxu0 %v7819_v46  ;;  %v6270_v46 = vcombine.high %v367_v37, %v379_v38  ;;  %7001 = vmatpush1.bf16.msra.mxu1 %v9000_v41 }
 0x1f6   :  { %4066 = vmatmul.mubr.bf16.gmra.mrb[12].mxu1 %v6173_v60  ;;  %v252_v60 = vld [vmem:[%s9592_s0 + $0x1c0] sm:$0xff] }
 0x1f7   :  { %4075 = vmatprep.mubr.bf16.mxu1 %v6198_v62  ;;  %v9028_v62 = vld [vmem:[#allocation2 + $0xb84] ss:$8 sps:$4 sm:$0xff]  }
 0x1f8   :  { %4583 = vmatpush1.bf16.msra.mxu0 %v7817_v47  ;;  %v9004_v47 = vld [vmem:[#allocation2 + $0xb64] ss:$8 sps:$4 sm:$0xff]  }
 0x1f9   :  { %4584 = vmatprep.subr.bf16.mxu0 %v7822_v49  ;;  %v240_v49 = vld [vmem:[%s9592_s0 + $0x160] sm:$0xff]  ;;  %6986 = vmatprep.subr.bf16.mxu1 %v9004_v47 }
 0x1fa   :  { %7002 = vmatpush1.bf16.msra.mxu1 %v9012_v50  ;;  %v6136_v55 = vcombine.high %v228_v48, %v240_v49  ;;  %v6135_v1 = vcombine.low %v228_v48, %v240_v49  ;;  %v336_v48 = vld [vmem:[%s9592_s0 + $0x460] sm:$0xff] }
 0x1fb   :  { %4528 = vmatmul.mubr.bf16.gmra.mrb[16].mxu0 %v6205_v54  ;;  %v9016_v54 = vld [vmem:[#allocation2 + $0xb74] ss:$8 sps:$4 sm:$0xff]  }
 0x1fc   :  { %4585 = vmatpush1.bf16.msra.mxu0 %v7820_v53  ;;  %4537 = vmatprep.mubr.bf16.mxu0 %v6230_v57  ;;  %v7849_v53 = vld [vmem:[#allocation2 + $0x914] ss:$8 sps:$4 sm:$0xff]   ;;  %v7847_v57 = vld [vmem:[#allocation2 + $0x910] ss:$8 sps:$4 sm:$0xff]  }
 0x1fd   :  { %4586 = vmatprep.subr.bf16.mxu0 %v7825_v58  ;;  %6987 = vmatprep.subr.bf16.mxu1 %v9016_v54  ;;  %v6269_v58 = vcombine.low %v367_v37, %v379_v38  ;;  %v9072_v38 = vld [vmem:[#allocation2 + $0xbd0] ss:$8 sps:$4 sm:$0xff]  }
 0x1fe   :  { %4076 = vmatmul.mubr.bf16.gmra.mrb[16].mxu1 %v6197_v12  ;;  %v276_v12 = vld [vmem:[%s9592_s0 + $0x280] sm:$0xff] }
 0x1ff   :  { %4085 = vmatprep.mubr.bf16.mxu1 %v6222_v14  ;;  %7003 = vmatpush1.bf16.msra.mxu1 %v9018_v56  ;;  %v9046_v14 = vld [vmem:[#allocation2 + $0xba4] ss:$8 sps:$4 sm:$0xff]  }
 0x200   :  { %4587 = vmatpush1.bf16.msra.mxu0 %v7823_v59  ;;  %v7852_v59 = vld [vmem:[#allocation2 + $0x924] ss:$8 sps:$4 sm:$0xff]   ;;  %6988 = vmatprep.subr.bf16.mxu1 %v9028_v62 }
 0x201   :  { %4588 = vmatprep.subr.bf16.mxu0 %v7828_v61  ;;  %v264_v61 = vld [vmem:[%s9592_s0 + $0x220] sm:$0xff] }
 0x202   :  { %v6160_v6 = vcombine.high %v252_v60, %v264_v61  ;;  %v6159_v17 = vcombine.low %v252_v60, %v264_v61 }
 0x203   :  { %4538 = vmatmul.mubr.bf16.gmra.mrb[20].mxu0 %v6229_v4  ;;  %v7855_v4 = vld [vmem:[#allocation2 + $0x934] ss:$8 sps:$4 sm:$0xff]   ;;  %7004 = vmatpush1.bf16.msra.mxu1 %v9030_v0 }
 0x204   :  { %4589 = vmatpush1.bf16.msra.mxu0 %v7826_v3  ;;  %4547 = vmatprep.mubr.bf16.mxu0 %v6254_v8  ;;  %v7850_v3 = vld [vmem:[#allocation2 + $0x920] ss:$8 sps:$4 sm:$0xff]   ;;  %v9036_v8 = vld [vmem:[#allocation2 + $0xb90] ss:$8 sps:$4 sm:$0xff]  }
 0x205   :  { %4590 = vmatprep.subr.bf16.mxu0 %v7831_v10  ;;  %6989 = vmatprep.subr.bf16.mxu1 %v9034_v5  ;;  %v7853_v10 = vld [vmem:[#allocation2 + $0x930] ss:$8 sps:$4 sm:$0xff]  }
 0x206   :  { %4086 = vmatmul.mubr.bf16.gmra.mrb[20].mxu1 %v6221_v28  ;;  %v300_v28 = vld [vmem:[%s9592_s0 + $0x340] sm:$0xff] }
 0x207   :  { %4095 = vmatprep.mubr.bf16.mxu1 %v6246_v30  ;;  %7005 = vmatpush1.bf16.msra.mxu1 %v9036_v8  ;;  %v9064_v30 = vld [vmem:[#allocation2 + $0xbc4] ss:$8 sps:$4 sm:$0xff]  }
 0x208   :  { %4591 = vmatpush1.bf16.msra.mxu0 %v7829_v11  ;;  %v7858_v11 = vld [vmem:[#allocation2 + $0x944] ss:$8 sps:$4 sm:$0xff]   ;;  %6990 = vmatprep.subr.bf16.mxu1 %v9046_v14 }
 0x209   :  { %4592 = vmatprep.subr.bf16.mxu0 %v7834_v13  ;;  %v288_v13 = vld [vmem:[%s9592_s0 + $0x2e0] sm:$0xff] }
 0x20a   :  { %v6184_v22 = vcombine.high %v276_v12, %v288_v13  ;;  %v6183_v33 = vcombine.low %v276_v12, %v288_v13  ;;  %v7879_v13 = vld [vmem:[#allocation2 + $0x9b4] ss:$8 sps:$4 sm:$0xff]  }
 0x20b   :  { %4548 = vmatmul.mubr.bf16.gmra.mrb[24].mxu0 %v6253_v20  ;;  %v7861_v20 = vld [vmem:[#allocation2 + $0x954] ss:$8 sps:$4 sm:$0xff]   ;;  %7006 = vmatpush1.bf16.msra.mxu1 %v9048_v16 }
 0x20c   :  { %4593 = vmatpush1.bf16.msra.mxu0 %v7832_v19  ;;  %4557 = vmatprep.mubr.bf16.mxu0 %v6278_v24  ;;  %v7856_v19 = vld [vmem:[#allocation2 + $0x940] ss:$8 sps:$4 sm:$0xff]   ;;  %v9054_v24 = vld [vmem:[#allocation2 + $0xbb0] ss:$8 sps:$4 sm:$0xff]  }
 0x20d   :  { %4594 = vmatprep.subr.bf16.mxu0 %v7837_v26  ;;  %6991 = vmatprep.subr.bf16.mxu1 %v9052_v21  ;;  %v7859_v26 = vld [vmem:[#allocation2 + $0x950] ss:$8 sps:$4 sm:$0xff]  }
 0x20e   :  { %4096 = vmatmul.mubr.bf16.gmra.mrb[24].mxu1 %v6245_v44  ;;  %v9078_v44 = vld [vmem:[#allocation2 + $0xbe0] ss:$8 sps:$4 sm:$0xff]  }
 0x20f   :  { %4105 = vmatprep.mubr.bf16.mxu1 %v6270_v46  ;;  %7007 = vmatpush1.bf16.msra.mxu1 %v9054_v24  ;;  %v324_v46 = vld [vmem:[%s9592_s0 + $0x400] sm:$0xff] }
 0x210   :  { %4595 = vmatpush1.bf16.msra.mxu0 %v7835_v27  ;;  %v7864_v27 = vld [vmem:[#allocation2 + $0x964] ss:$8 sps:$4 sm:$0xff]   ;;  %6992 = vmatprep.subr.bf16.mxu1 %v9064_v30 }
 0x211   :  { %4596 = vmatprep.subr.bf16.mxu0 %v7840_v29  ;;  %v312_v29 = vld [vmem:[%s9592_s0 + $0x3a0] sm:$0xff] }
 0x212   :  { %v6208_v37 = vcombine.high %v300_v28, %v312_v29  ;;  %v6207_v49 = vcombine.low %v300_v28, %v312_v29  ;;  %v372_v28 = vld [vmem:[%s9592_s0 + $0x580] sm:$0xff] }
 0x213   :  { %4558 = vmatmul.mubr.bf16.gmra.mrb[28].mxu0 %v6277_v36  ;;  %7008 = vmatpush1.bf16.msra.mxu1 %v9066_v32  ;;  %v7862_v36 = vld [vmem:[#allocation2 + $0x960] ss:$8 sps:$4 sm:$0xff]  }
 0x214   :  { %4597 = vmatpush1.bf16.msra.mxu0 %v7838_v35  ;;  %4600 = vmatprep.mubr.bf16.mxu0 %v6112_v40  ;;  %v9070_v35 = vld [vmem:[#allocation2 + $0xbd4] ss:$8 sps:$4 sm:$0xff]   ;;  %v384_v29 = vld [vmem:[%s9592_s0 + $0x5e0] sm:$0xff] }
 0x215   :  { %4598 = vmatprep.subr.bf16.mxu0 %v7843_v42  ;;  %v7867_v40 = vld [vmem:[#allocation2 + $0x974] ss:$8 sps:$4 sm:$0xff]   ;;  %6993 = vmatprep.subr.bf16.mxu1 %v9070_v35  ;;  %v9076_v42 = vld [vmem:[#allocation2 + $0xbe4] ss:$8 sps:$4 sm:$0xff]  }
 0x216   :  { %4106 = vmatmul.mubr.bf16.gmra.mrb[28].mxu1 %v6269_v58  ;;  %v303_v58 = vld [vmem:[%s9592_s0 + $0x358] sm:$0xff] }
 0x217   :  { %7009 = vmatpush1.bf16.msra.mxu1 %v9072_v38 }
 0x218   :  { %4599 = vmatpush1.bf16.msra.mxu0 %v7841_v43  ;;  %v7865_v43 = vld [vmem:[#allocation2 + $0x970] ss:$8 sps:$4 sm:$0xff]   ;;  %6994 = vmatprep.subr.bf16.mxu1 %v9076_v42 }
 0x219   :  { %4681 = vmatprep.subr.bf16.mxu0 %v7846_v45  ;;  %v7870_v45 = vld [vmem:[#allocation2 + $0x984] ss:$8 sps:$4 sm:$0xff]  }
 0x21b   :  { %4601 = vmatmul.mubr.bf16.vlgmr.msra.gmra.mrb[0].mxu0 %v6111_v51  ;;  %7010 = vmatpush1.bf16.msra.mxu1 %v9078_v44  ;;  %v9088_v51 = vld [vmem:[#allocation2 + $0xbf4] ss:$8 sps:$4 sm:$0xff]  }
 0x21c   :  { %4682 = vmatpush1.bf16.msra.mxu0 %v7844_v52  ;;  %4610 = vmatprep.mubr.bf16.mxu0 %v6136_v55  ;;  %v7868_v52 = vld [vmem:[#allocation2 + $0x980] ss:$8 sps:$4 sm:$0xff]   ;;  %v9090_v55 = vld [vmem:[#allocation2 + $0xbf0] ss:$8 sps:$4 sm:$0xff]  }
 0x21d   :  { %4683 = vmatprep.subr.bf16.mxu0 %v7849_v53  ;;  %v6232_v53 = vcombine.high %v324_v46, %v336_v48  ;;  %6995 = vmatprep.subr.bf16.mxu1 %v9088_v51 }
 0x21f   :  { %7011 = vmatpush1.bf16.msra.mxu1 %v9090_v55 }
 0x220   :  { %4684 = vmatpush1.bf16.msra.mxu0 %v7847_v57  ;;  %v7873_v57 = vld [vmem:[#allocation2 + $0x994] ss:$8 sps:$4 sm:$0xff]  }
 0x221   :  { %4685 = vmatprep.subr.bf16.mxu0 %v7852_v59  ;;  %v315_v59 = vld [vmem:[%s9592_s0 + $0x3b8] sm:$0xff] }
 0x222   :  { %v6214_v60 = vcombine.high %v303_v58, %v315_v59  ;;  %v6213_v61 = vcombine.low %v303_v58, %v315_v59  ;;  %v6279_v58 = vcombine.low %v372_v28, %v384_v29  ;;  %v7886_v59 = vld [vmem:[#allocation2 + $0x9e0] ss:$8 sps:$4 sm:$0xff]  }
 0x223   :  { %4611 = vmatmul.mubr.bf16.gmra.mrb[4].mxu0 %v6135_v1  ;;  %v7871_v1 = vld [vmem:[#allocation2 + $0x990] ss:$8 sps:$4 sm:$0xff]  }
 0x224   :  { %4686 = vmatpush1.bf16.msra.mxu0 %v7850_v3  ;;  %4620 = vmatprep.mubr.bf16.mxu0 %v6160_v6  ;;  %v7876_v3 = vld [vmem:[#allocation2 + $0x9a4] ss:$8 sps:$4 sm:$0xff]  }
 0x225   :  { %4687 = vmatprep.subr.bf16.mxu0 %v7855_v4  ;;  %v348_v4 = vld [vmem:[%s9592_s0 + $0x4c0] sm:$0xff]  ;;  %4979 = vmatprep.mubr.bf16.mxu1 %v6214_v60 }
 0x226   :  { %v360_v6 = vld [vmem:[%s9592_s0 + $0x520] sm:$0xff]  ;;  %4980 = vmatmul.mubr.bf16.vlgmr.msra.gmra.mrb[32].mxu1 %v6213_v61  ;;  %v7891_v61 = vld [vmem:[#allocation2 + $0x9f4] ss:$8 sps:$4 sm:$0xff]  }
 0x227   :  { %v6256_v12 = vcombine.high %v348_v4, %v360_v6 }
 0x228   :  { %4688 = vmatpush1.bf16.msra.mxu0 %v7853_v10  ;;  %v6231_v10 = vcombine.low %v324_v46, %v336_v48 }
 0x229   :  { %4689 = vmatprep.subr.bf16.mxu0 %v7858_v11  ;;  %v7874_v11 = vld [vmem:[#allocation2 + $0x9a0] ss:$8 sps:$4 sm:$0xff]  }
 0x22b   :  { %4621 = vmatmul.mubr.bf16.gmra.mrb[8].mxu0 %v6159_v17  ;;  %v327_v17 = vld [vmem:[%s9592_s0 + $0x418] sm:$0xff] }
 0x22c   :  { %4690 = vmatpush1.bf16.msra.mxu0 %v7856_v19  ;;  %4630 = vmatprep.mubr.bf16.mxu0 %v6184_v22  ;;  %v339_v19 = vld [vmem:[%s9592_s0 + $0x478] sm:$0xff] }
 0x22d   :  { %4691 = vmatprep.subr.bf16.mxu0 %v7861_v20  ;;  %v6238_v20 = vcombine.high %v327_v17, %v339_v19  ;;  %v6237_v22 = vcombine.low %v327_v17, %v339_v19  ;;  %v7892_v19 = vld [vmem:[#allocation2 + $0xa00] ss:$8 sps:$4 sm:$0xff]  }
 0x22f   :  { %4989 = vmatprep.mubr.bf16.mxu1 %v6238_v20 }
 0x230   :  { %4692 = vmatpush1.bf16.msra.mxu0 %v7859_v26  ;;  %v7877_v26 = vld [vmem:[#allocation2 + $0x9b0] ss:$8 sps:$4 sm:$0xff]   ;;  %4990 = vmatmul.mubr.bf16.gmra.mrb[36].mxu1 %v6237_v22  ;;  %v7897_v22 = vld [vmem:[#allocation2 + $0xa14] ss:$8 sps:$4 sm:$0xff]  }
 0x231   :  { %4693 = vmatprep.subr.bf16.mxu0 %v7864_v27  ;;  %v7882_v27 = vld [vmem:[#allocation2 + $0x9c4] ss:$8 sps:$4 sm:$0xff]  }
 0x233   :  { %4631 = vmatmul.mubr.bf16.gmra.mrb[12].mxu0 %v6183_v33  ;;  %v6255_v33 = vcombine.low %v348_v4, %v360_v6 }
 0x234   :  { %4694 = vmatpush1.bf16.msra.mxu0 %v7862_v36  ;;  %4640 = vmatprep.mubr.bf16.mxu0 %v6208_v37  ;;  %v7880_v36 = vld [vmem:[#allocation2 + $0x9c0] ss:$8 sps:$4 sm:$0xff]   ;;  %v6280_v37 = vcombine.high %v372_v28, %v384_v29 }
 0x235   :  { %4695 = vmatprep.subr.bf16.mxu0 %v7867_v40  ;;  %v7885_v40 = vld [vmem:[#allocation2 + $0x9d4] ss:$8 sps:$4 sm:$0xff]   ;;  %v253_v28 = vld [vmem:[%s9592_s0 + $0x1c8] sm:$0xff] }
 0x236   :  { %v265_v29 = vld [vmem:[%s9592_s0 + $0x228] sm:$0xff] }
 0x238   :  { %4696 = vmatpush1.bf16.msra.mxu0 %v7865_v43  ;;  %v351_v43 = vld [vmem:[%s9592_s0 + $0x4d8] sm:$0xff] }
 0x239   :  { %4697 = vmatprep.subr.bf16.mxu0 %v7870_v45  ;;  %v363_v45 = vld [vmem:[%s9592_s0 + $0x538] sm:$0xff] }
 0x23a   :  { %v6262_v46 = vcombine.high %v351_v43, %v363_v45  ;;  %v6261_v48 = vcombine.low %v351_v43, %v363_v45  ;;  %v7901_v43 = vld [vmem:[#allocation2 + $0xa30] ss:$8 sps:$4 sm:$0xff]   ;;  %v7906_v45 = vld [vmem:[#allocation2 + $0xa44] ss:$8 sps:$4 sm:$0xff]  }
 0x23b   :  { %4641 = vmatmul.mubr.bf16.gmra.mrb[16].mxu0 %v6207_v49  ;;  %v7883_v49 = vld [vmem:[#allocation2 + $0x9d0] ss:$8 sps:$4 sm:$0xff]  }
 0x23c   :  { %4698 = vmatpush1.bf16.msra.mxu0 %v7868_v52  ;;  %4650 = vmatprep.mubr.bf16.mxu0 %v6232_v53  ;;  %v7888_v52 = vld [vmem:[#allocation2 + $0x9e4] ss:$8 sps:$4 sm:$0xff]  }
 0x23d   :  { %4699 = vmatprep.subr.bf16.mxu0 %v7873_v57  ;;  %v205_v53 = vld [vmem:[%s9592_s0 + $0x48] sm:$0xff]  ;;  %4999 = vmatprep.mubr.bf16.mxu1 %v6262_v46 }
 0x23e   :  { %v217_v57 = vld [vmem:[%s9592_s0 + $0xa8] sm:$0xff]  ;;  %5000 = vmatmul.mubr.bf16.gmra.mrb[40].mxu1 %v6261_v48 }
 0x23f   :  { %v6114_v60 = vcombine.high %v205_v53, %v217_v57  ;;  %v6113_v17 = vcombine.low %v205_v53, %v217_v57  ;;  %v277_v46 = vld [vmem:[%s9592_s0 + $0x288] sm:$0xff]  ;;  %v7909_v57 = vld [vmem:[#allocation2 + $0xa54] ss:$8 sps:$4 sm:$0xff]  }
 0x240   :  { %4700 = vmatpush1.bf16.msra.mxu0 %v7871_v1  ;;  %v375_v1 = vld [vmem:[%s9592_s0 + $0x598] sm:$0xff]  ;;  %v289_v48 = vld [vmem:[%s9592_s0 + $0x2e8] sm:$0xff] }
 0x241   :  { %4701 = vmatprep.subr.bf16.mxu0 %v7876_v3  ;;  %v387_v3 = vld [vmem:[%s9592_s0 + $0x5f8] sm:$0xff]  ;;  %v6186_v53 = vcombine.high %v277_v46, %v289_v48 }
 0x242   :  { %v6286_v4 = vcombine.high %v375_v1, %v387_v3  ;;  %v6285_v6 = vcombine.low %v375_v1, %v387_v3  ;;  %v6185_v1 = vcombine.low %v277_v46, %v289_v48  ;;  %v7910_v3 = vld [vmem:[#allocation2 + $0xa60] ss:$8 sps:$4 sm:$0xff]  }
 0x243   :  { %4651 = vmatmul.mubr.bf16.gmra.mrb[20].mxu0 %v6231_v10  ;;  %v7889_v10 = vld [vmem:[#allocation2 + $0x9f0] ss:$8 sps:$4 sm:$0xff]   ;;  %v373_v46 = vld [vmem:[%s9592_s0 + $0x588] sm:$0xff] }
 0x244   :  { %4702 = vmatpush1.bf16.msra.mxu0 %v7874_v11  ;;  %4660 = vmatprep.mubr.bf16.mxu0 %v6256_v12  ;;  %v7894_v11 = vld [vmem:[#allocation2 + $0xa04] ss:$8 sps:$4 sm:$0xff]  }
 0x245   :  { %4703 = vmatprep.subr.bf16.mxu0 %v7879_v13  ;;  %v229_v12 = vld [vmem:[%s9592_s0 + $0x108] sm:$0xff]  ;;  %5009 = vmatprep.mubr.bf16.mxu1 %v6286_v4 }
 0x246   :  { %v241_v13 = vld [vmem:[%s9592_s0 + $0x168] sm:$0xff]  ;;  %5010 = vmatmul.mubr.bf16.gmra.mrb[44].mxu1 %v6285_v6  ;;  %v7915_v6 = vld [vmem:[#allocation2 + $0xa74] ss:$8 sps:$4 sm:$0xff]  }
 0x247   :  { %v6138_v20 = vcombine.high %v229_v12, %v241_v13  ;;  %v385_v48 = vld [vmem:[%s9592_s0 + $0x5e8] sm:$0xff] }
 0x248   :  { %4704 = vmatpush1.bf16.msra.mxu0 %v7877_v26  ;;  %v7895_v26 = vld [vmem:[#allocation2 + $0xa10] ss:$8 sps:$4 sm:$0xff]  }
 0x249   :  { %4705 = vmatprep.subr.bf16.mxu0 %v7882_v27  ;;  %v7900_v27 = vld [vmem:[#allocation2 + $0xa24] ss:$8 sps:$4 sm:$0xff]  }
 0x24b   :  { %4661 = vmatmul.mubr.bf16.gmra.mrb[24].mxu0 %v6255_v33  ;;  %v6137_v33 = vcombine.low %v229_v12, %v241_v13  ;;  %v325_v12 = vld [vmem:[%s9592_s0 + $0x408] sm:$0xff] }
 0x24c   :  { %4706 = vmatpush1.bf16.msra.mxu0 %v7880_v36  ;;  %4670 = vmatprep.mubr.bf16.mxu0 %v6280_v37  ;;  %v7898_v36 = vld [vmem:[#allocation2 + $0xa20] ss:$8 sps:$4 sm:$0xff]   ;;  %v6162_v37 = vcombine.high %v253_v28, %v265_v29 }
 0x24d   :  { %4707 = vmatprep.subr.bf16.mxu0 %v7885_v40  ;;  %v7903_v40 = vld [vmem:[#allocation2 + $0xa34] ss:$8 sps:$4 sm:$0xff]   ;;  %v337_v13 = vld [vmem:[%s9592_s0 + $0x468] sm:$0xff] }
 0x250   :  { %4708 = vmatpush1.bf16.msra.mxu0 %v7883_v49  ;;  %v6161_v49 = vcombine.low %v253_v28, %v265_v29  ;;  %v349_v28 = vld [vmem:[%s9592_s0 + $0x4c8] sm:$0xff] }
 0x251   :  { %4709 = vmatprep.subr.bf16.mxu0 %v7888_v52  ;;  %v7904_v52 = vld [vmem:[#allocation2 + $0xa40] ss:$8 sps:$4 sm:$0xff]  }
 0x252   :  { %v361_v29 = vld [vmem:[%s9592_s0 + $0x528] sm:$0xff] }
 0x253   :  { %4671 = vmatmul.mubr.bf16.gmra.mrb[28].mxu0 %v6279_v58  ;;  %v7907_v58 = vld [vmem:[#allocation2 + $0xa50] ss:$8 sps:$4 sm:$0xff]  }
 0x254   :  { %4710 = vmatpush1.bf16.msra.mxu0 %v7886_v59  ;;  %4713 = vmatprep.mubr.bf16.mxu0 %v6114_v60  ;;  %v7912_v59 = vld [vmem:[#allocation2 + $0xa64] ss:$8 sps:$4 sm:$0xff]  }
 0x255   :  { %4711 = vmatprep.subr.bf16.mxu0 %v7891_v61  ;;  %v301_v60 = vld [vmem:[%s9592_s0 + $0x348] sm:$0xff] }
 0x256   :  { %v313_v61 = vld [vmem:[%s9592_s0 + $0x3a8] sm:$0xff] }
 0x257   :  { %v6210_v4 = vcombine.high %v301_v60, %v313_v61 }
 0x258   :  { %4712 = vmatpush1.bf16.msra.mxu0 %v7889_v10  ;;  %v7913_v10 = vld [vmem:[#allocation2 + $0xa70] ss:$8 sps:$4 sm:$0xff]  }
 0x259   :  { %4794 = vmatprep.subr.bf16.mxu0 %v7894_v11  ;;  %v7918_v11 = vld [vmem:[#allocation2 + $0xa84] ss:$8 sps:$4 sm:$0xff]  }
 0x25b   :  { %4714 = vmatmul.mubr.bf16.vlgmr.msra.gmra.mrb[0].mxu0 %v6113_v17  ;;  %v6209_v17 = vcombine.low %v301_v60, %v313_v61  ;;  %v206_v60 = vld [vmem:[%s9592_s0 + $0x50] sm:$0xff] }
 0x25c   :  { %4795 = vmatpush1.bf16.msra.mxu0 %v7892_v19  ;;  %4723 = vmatprep.mubr.bf16.mxu0 %v6138_v20  ;;  %v7916_v19 = vld [vmem:[#allocation2 + $0xa80] ss:$8 sps:$4 sm:$0xff]   ;;  %v6234_v20 = vcombine.high %v325_v12, %v337_v13  ;;  %v218_v61 = vld [vmem:[%s9592_s0 + $0xb0] sm:$0xff] }
 0x25d   :  { %4796 = vmatprep.subr.bf16.mxu0 %v7897_v22  ;;  %v7924_v22 = vld [vmem:[#allocation2 + $0xa94] ss:$8 sps:$4 sm:$0xff]  }
 0x260   :  { %4797 = vmatpush1.bf16.msra.mxu0 %v7895_v26  ;;  %v7922_v26 = vld [vmem:[#allocation2 + $0xa90] ss:$8 sps:$4 sm:$0xff]  }
 0x261   :  { %4798 = vmatprep.subr.bf16.mxu0 %v7900_v27  ;;  %v7930_v27 = vld [vmem:[#allocation2 + $0xaa4] ss:$8 sps:$4 sm:$0xff]  }
 0x263   :  { %4724 = vmatmul.mubr.bf16.gmra.mrb[4].mxu0 %v6137_v33  ;;  %v6233_v33 = vcombine.low %v325_v12, %v337_v13  ;;  %v242_v12 = vld [vmem:[%s9592_s0 + $0x170] sm:$0xff]  ;;  %v6115_v13 = vcombine.low %v206_v60, %v218_v61 }
 0x264   :  { %4799 = vmatpush1.bf16.msra.mxu0 %v7898_v36  ;;  %4733 = vmatprep.mubr.bf16.mxu0 %v6162_v37  ;;  %v7928_v36 = vld [vmem:[#allocation2 + $0xaa0] ss:$8 sps:$4 sm:$0xff]   ;;  %v6258_v37 = vcombine.high %v349_v28, %v361_v29 }
 0x265   :  { %4800 = vmatprep.subr.bf16.mxu0 %v7903_v40  ;;  %v7936_v40 = vld [vmem:[#allocation2 + $0xab4] ss:$8 sps:$4 sm:$0xff]  }
 0x268   :  { %4801 = vmatpush1.bf16.msra.mxu0 %v7901_v43  ;;  %v7934_v43 = vld [vmem:[#allocation2 + $0xab0] ss:$8 sps:$4 sm:$0xff]  }
 0x269   :  { %4802 = vmatprep.subr.bf16.mxu0 %v7906_v45  ;;  %v7942_v45 = vld [vmem:[#allocation2 + $0xac4] ss:$8 sps:$4 sm:$0xff]  }
 0x26b   :  { %4734 = vmatmul.mubr.bf16.gmra.mrb[8].mxu0 %v6161_v49  ;;  %v6257_v49 = vcombine.low %v349_v28, %v361_v29 }
 0x26c   :  { %4803 = vmatpush1.bf16.msra.mxu0 %v7904_v52  ;;  %4743 = vmatprep.mubr.bf16.mxu0 %v6186_v53  ;;  %v7940_v52 = vld [vmem:[#allocation2 + $0xac0] ss:$8 sps:$4 sm:$0xff]   ;;  %v6282_v53 = vcombine.high %v373_v46, %v385_v48 }
 0x26d   :  { %4804 = vmatprep.subr.bf16.mxu0 %v7909_v57  ;;  %v7948_v57 = vld [vmem:[#allocation2 + $0xad4] ss:$8 sps:$4 sm:$0xff]  }
 0x270   :  { %4805 = vmatpush1.bf16.msra.mxu0 %v7907_v58  ;;  %v7946_v58 = vld [vmem:[#allocation2 + $0xad0] ss:$8 sps:$4 sm:$0xff]  }
 0x271   :  { %4806 = vmatprep.subr.bf16.mxu0 %v7912_v59  ;;  %v7954_v59 = vld [vmem:[#allocation2 + $0xae4] ss:$8 sps:$4 sm:$0xff]  }
 0x273   :  { %4744 = vmatmul.mubr.bf16.gmra.mrb[12].mxu0 %v6185_v1  ;;  %v6281_v1 = vcombine.low %v373_v46, %v385_v48 }
 0x274   :  { %4807 = vmatpush1.bf16.msra.mxu0 %v7910_v3  ;;  %4753 = vmatprep.mubr.bf16.mxu0 %v6210_v4  ;;  %v7952_v3 = vld [vmem:[#allocation2 + $0xae0] ss:$8 sps:$4 sm:$0xff]   ;;  %v6116_v4 = vcombine.high %v206_v60, %v218_v61  ;;  %v255_v60 = vld [vmem:[%s9592_s0 + $0x1d8] sm:$0xff] }
 0x275   :  { %4808 = vmatprep.subr.bf16.mxu0 %v7915_v6  ;;  %v7960_v6 = vld [vmem:[#allocation2 + $0xaf4] ss:$8 sps:$4 sm:$0xff]  }
 0x276   :  { %v267_v61 = vld [vmem:[%s9592_s0 + $0x238] sm:$0xff] }
 0x278   :  { %4809 = vmatpush1.bf16.msra.mxu0 %v7913_v10  ;;  %v7958_v10 = vld [vmem:[#allocation2 + $0xaf0] ss:$8 sps:$4 sm:$0xff]  }
 0x279   :  { %4810 = vmatprep.subr.bf16.mxu0 %v7918_v11  ;;  %v230_v11 = vld [vmem:[%s9592_s0 + $0x110] sm:$0xff] }
 0x27b   :  { %4754 = vmatmul.mubr.bf16.gmra.mrb[16].mxu0 %v6209_v17  ;;  %v6140_v17 = vcombine.high %v230_v11, %v242_v12 }
 0x27c   :  { %4811 = vmatpush1.bf16.msra.mxu0 %v7916_v19  ;;  %4763 = vmatprep.mubr.bf16.mxu0 %v6234_v20  ;;  %v254_v19 = vld [vmem:[%s9592_s0 + $0x1d0] sm:$0xff] }
 0x27d   :  { %4812 = vmatprep.subr.bf16.mxu0 %v7924_v22  ;;  %v266_v20 = vld [vmem:[%s9592_s0 + $0x230] sm:$0xff]  ;;  %v6139_v22 = vcombine.low %v230_v11, %v242_v12  ;;  %v279_v11 = vld [vmem:[%s9592_s0 + $0x298] sm:$0xff] }
 0x27e   :  { %v291_v12 = vld [vmem:[%s9592_s0 + $0x2f8] sm:$0xff] }
 0x280   :  { %4813 = vmatpush1.bf16.msra.mxu0 %v7922_v26  ;;  %v6164_v26 = vcombine.high %v254_v19, %v266_v20 }
 0x281   :  { %4814 = vmatprep.subr.bf16.mxu0 %v7930_v27 }
 0x283   :  { %4764 = vmatmul.mubr.bf16.gmra.mrb[20].mxu0 %v6233_v33 }
 0x284   :  { %4815 = vmatpush1.bf16.msra.mxu0 %v7928_v36  ;;  %4773 = vmatprep.mubr.bf16.mxu0 %v6258_v37 }
 0x285   :  { %4816 = vmatprep.subr.bf16.mxu0 %v7936_v40 }
 0x288   :  { %4817 = vmatpush1.bf16.msra.mxu0 %v7934_v43 }
 0x289   :  { %4818 = vmatprep.subr.bf16.mxu0 %v7942_v45 }
 0x28b   :  { %4774 = vmatmul.mubr.bf16.gmra.mrb[24].mxu0 %v6257_v49 }
 0x28c   :  { %4819 = vmatpush1.bf16.msra.mxu0 %v7940_v52  ;;  %4783 = vmatprep.mubr.bf16.mxu0 %v6282_v53 }
 0x28d   :  { %4820 = vmatprep.subr.bf16.mxu0 %v7948_v57 }
 0x290   :  { %4821 = vmatpush1.bf16.msra.mxu0 %v7946_v58 }
 0x291   :  { %4822 = vmatprep.subr.bf16.mxu0 %v7954_v59 }
 0x293   :  { %4784 = vmatmul.mubr.bf16.gmra.mrb[28].mxu0 %v6281_v1  ;;  %v6166_v1 = vcombine.high %v255_v60, %v267_v61 }
 0x294   :  { %4823 = vmatpush1.bf16.msra.mxu0 %v7952_v3  ;;  %4826 = vmatprep.mubr.bf16.mxu0 %v6116_v4 }
 0x295   :  { %4824 = vmatprep.subr.bf16.mxu0 %v7960_v6 }
 0x298   :  { %4825 = vmatpush1.bf16.msra.mxu0 %v7958_v10 }
 0x299   :  { %4907 = vmatprep.subr.bf16.mxu0 %v8932_v63  ;;  %v278_v63 = vld [vmem:[%s9592_s0 + $0x290] sm:$0xff] }
 0x29b   :  { %4827 = vmatmul.mubr.bf16.vlgmr.msra.gmra.mrb[0].mxu0 %v6115_v13  ;;  %v6165_v13 = vcombine.low %v255_v60, %v267_v61 }
 0x29c   :  { %4908 = vmatpush1.bf16.msra.mxu0 %v8940_v2  ;;  %4836 = vmatprep.mubr.bf16.mxu0 %v6140_v17  ;;  %v290_v2 = vld [vmem:[%s9592_s0 + $0x2f0] sm:$0xff]  ;;  %v6190_v17 = vcombine.high %v279_v11, %v291_v12 }
 0x29d   :  { %4909 = vmatprep.subr.bf16.mxu0 %v8950_v7  ;;  %v6163_v7 = vcombine.low %v254_v19, %v266_v20 }
 0x2a0   :  { %4910 = vmatpush1.bf16.msra.mxu0 %v8952_v9  ;;  %v6188_v9 = vcombine.high %v278_v63, %v290_v2 }
 0x2a1   :  { %4911 = vmatprep.subr.bf16.mxu0 %v8956_v15  ;;  %v302_v15 = vld [vmem:[%s9592_s0 + $0x350] sm:$0xff] }
 0x2a3   :  { %4837 = vmatmul.mubr.bf16.gmra.mrb[4].mxu0 %v6139_v22 }
 0x2a4   :  { %4912 = vmatpush1.bf16.msra.mxu0 %v8964_v18  ;;  %4846 = vmatprep.mubr.bf16.mxu0 %v6164_v26  ;;  %v314_v18 = vld [vmem:[%s9592_s0 + $0x3b0] sm:$0xff] }
 0x2a5   :  { %4913 = vmatprep.subr.bf16.mxu0 %v8974_v23  ;;  %v6187_v23 = vcombine.low %v278_v63, %v290_v2  ;;  %v6189_v63 = vcombine.low %v279_v11, %v291_v12  ;;  %v7999_v11 = vld [vmem:[#allocation6 + $0x28] sm:$0xff]   ;;  %v8000_v12 = vld [vmem:[#allocation6 + $0x70] sm:$0xff]  }
 0x2a8   :  { %4914 = vmatpush1.bf16.msra.mxu0 %v8976_v25  ;;  %v6212_v25 = vcombine.high %v302_v15, %v314_v18 }
 0x2a9   :  { %4915 = vmatprep.subr.bf16.mxu0 %v8980_v31  ;;  %v326_v31 = vld [vmem:[%s9592_s0 + $0x410] sm:$0xff] }
 0x2ab   :  { %4847 = vmatmul.mubr.bf16.gmra.mrb[8].mxu0 %v6163_v7 }
 0x2ac   :  { %4916 = vmatpush1.bf16.msra.mxu0 %v8988_v34  ;;  %4856 = vmatprep.mubr.bf16.mxu0 %v6188_v9  ;;  %v338_v34 = vld [vmem:[%s9592_s0 + $0x470] sm:$0xff] }
 0x2ad   :  { %4917 = vmatprep.subr.bf16.mxu0 %v8998_v39  ;;  %v6211_v39 = vcombine.low %v302_v15, %v314_v18  ;;  %v6235_v28 = vcombine.low %v326_v31, %v338_v34 }
 0x2b0   :  { %4918 = vmatpush1.bf16.msra.mxu0 %v9000_v41  ;;  %v6236_v41 = vcombine.high %v326_v31, %v338_v34  ;;  %v7988_v34 = vld [vmem:[#allocation6 + $0x40] sm:$0xff]  }
 0x2b1   :  { %4919 = vmatprep.subr.bf16.mxu0 %v9004_v47  ;;  %v9231_v47 = vpop.f32.mrb[0].mxu1  ;;  %6724 = vmatprep.subr.bf16.mxu1 %v7988_v34  ;;  %v9378_v34 = vld [vmem:[#allocation9] sm:$0xff]  }
 0x2b3   :  { %4857 = vmatmul.mubr.bf16.gmra.mrb[12].mxu0 %v6187_v23 }
 0x2b4   :  { %4920 = vmatpush1.bf16.msra.mxu0 %v9012_v50  ;;  %4866 = vmatprep.mubr.bf16.mxu0 %v6212_v25  ;;  %v9233_v50 = vpop.f32.mrb[1].mxu1 }
 0x2b5   :  { %4921 = vmatprep.subr.bf16.mxu0 %v9016_v54  ;;  %v9235_v54 = vpop.f32.mrb[2].mxu1 }
 0x2b6   :  { %v9238_v27 = vpop.f32.mrb[3].mxu1 }
 0x2b8   :  { %4922 = vmatpush1.bf16.msra.mxu0 %v9018_v56  ;;  %v350_v56 = vld [vmem:[%s9592_s0 + $0x4d0] sm:$0xff] }
 0x2b9   :  { %4923 = vmatprep.subr.bf16.mxu0 %v9028_v62  ;;  %v362_v62 = vld [vmem:[%s9592_s0 + $0x530] sm:$0xff] }
 0x2ba   :  { %v6260_v29 = vcombine.high %v350_v56, %v362_v62  ;;  %v6259_v37 = vcombine.low %v350_v56, %v362_v62 }
 0x2bb   :  { %4867 = vmatmul.mubr.bf16.gmra.mrb[16].mxu0 %v6211_v39  ;;  %v7989_v39 = vld [vmem:[#allocation6] sm:$0xff]  }
 0x2bc   :  { %4924 = vmatpush1.bf16.msra.mxu0 %v9030_v0  ;;  %4876 = vmatprep.mubr.bf16.mxu0 %v6236_v41  ;;  %v9249_v0 = vpop.f32.mrb[4].mxu1 }
 0x2bd   :  { %4925 = vmatprep.subr.bf16.mxu0 %v9034_v5  ;;  %v9251_v33 = vpop.f32.mrb[5].mxu1  ;;  %6725 = vmatpush3.bf16.msra.mxu1 %v7989_v39  ;;  %v774_v39 = vlaneseq }
 0x2be   :  { %v9253_v5 = vpop.f32.mrb[6].mxu1 }
 0x2bf   :  { %v9256_v36 = vpop.f32.mrb[7].mxu1 }
 0x2c0   :  { %4926 = vmatpush1.bf16.msra.mxu0 %v9036_v8  ;;  %v374_v8 = vld [vmem:[%s9592_s0 + $0x590] sm:$0xff] }
 0x2c1   :  { %4927 = vmatprep.subr.bf16.mxu0 %v9046_v14  ;;  %v386_v14 = vld [vmem:[%s9592_s0 + $0x5f0] sm:$0xff] }
 0x2c2   :  { %v6284_v40 = vcombine.high %v374_v8, %v386_v14  ;;  %v6283_v46 = vcombine.low %v374_v8, %v386_v14  ;;  %v7991_v8 = vld [vmem:[#allocation6 + $0x8] sm:$0xff]   ;;  %v7992_v14 = vld [vmem:[#allocation6 + $0x50] sm:$0xff]  }
 0x2c3   :  { %4877 = vmatmul.mubr.bf16.gmra.mrb[20].mxu0 %v6235_v28  ;;  %v7990_v28 = vld [vmem:[#allocation6 + $0x48] sm:$0xff]  }
 0x2c4   :  { %4928 = vmatpush1.bf16.msra.mxu0 %v9048_v16  ;;  %4886 = vmatprep.mubr.bf16.mxu0 %v6260_v29  ;;  %v9267_v16 = vpop.f32.mrb[8].mxu1 }
 0x2c5   :  { %4929 = vmatprep.subr.bf16.mxu0 %v9052_v21  ;;  %v9269_v43 = vpop.f32.mrb[9].mxu1  ;;  %6726 = vmatprep.subr.bf16.mxu1 %v7990_v28  ;;  %v775_v28 = vshrl.u32 %v774_v39, 7 }
 0x2c6   :  { %v9271_v21 = vpop.f32.mrb[10].mxu1  ;;  %6727 = vmatpush3.bf16.msra.mxu1 %v7991_v8 }
 0x2c7   :  { %v9274_v45 = vpop.f32.mrb[11].mxu1  ;;  %6728 = vmatprep.subr.bf16.mxu1 %v7992_v14  ;;  %v776_v8 = vsub.s32 0, %v775_v28  ;;  %v772_v14 = vld [vmem:[#allocation4] sm:$0x3] }
 0x2c8   :  { %4930 = vmatpush1.bf16.msra.mxu0 %v9054_v24  ;;  %v207_v24 = vld [vmem:[%s9592_s0 + $0x58] sm:$0xff] }
 0x2c9   :  { %4931 = vmatprep.subr.bf16.mxu0 %v9064_v30  ;;  %v219_v30 = vld [vmem:[%s9592_s0 + $0xb8] sm:$0xff] }
 0x2ca   :  { %v6118_v48 = vcombine.high %v207_v24, %v219_v30  ;;  %v6117_v53 = vcombine.low %v207_v24, %v219_v30 }
 0x2cb   :  { %4887 = vmatmul.mubr.bf16.gmra.mrb[24].mxu0 %v6259_v37  ;;  %v7993_v37 = vld [vmem:[#allocation6 + $0x10] sm:$0xff]  }
 0x2cc   :  { %4932 = vmatpush1.bf16.msra.mxu0 %v9066_v32  ;;  %4896 = vmatprep.mubr.bf16.mxu0 %v6284_v40  ;;  %v9285_v32 = vpop.f32.mrb[12].mxu1 }
 0x2cd   :  { %4933 = vmatprep.subr.bf16.mxu0 %v9070_v35  ;;  %v9287_v49 = vpop.f32.mrb[13].mxu1  ;;  %6729 = vmatpush3.bf16.msra.mxu1 %v7993_v37  ;;  %v780_v37 = vsub.s32 1, %v775_v28 }
 0x2ce   :  { %v9289_v35 = vpop.f32.mrb[14].mxu1 }
 0x2cf   :  { %v9292_v52 = vpop.f32.mrb[15].mxu1 }
 0x2d0   :  { %4934 = vmatpush1.bf16.msra.mxu0 %v9072_v38  ;;  %9606 = vst [vmem:[#allocation28_spill] sm:$0xff] %v9292_v52  ;;  %v231_v38 = vld [vmem:[%s9592_s0 + $0x118] sm:$0xff] }
 0x2d1   :  { %4935 = vmatprep.subr.bf16.mxu0 %v9076_v42  ;;  %v243_v42 = vld [vmem:[%s9592_s0 + $0x178] sm:$0xff]  ;;  %v9302_v58 = vpop.f32.mrb[16].mxu1 }
 0x2d2   :  { %v6142_v57 = vcombine.high %v231_v38, %v243_v42 }
 0x2d3   :  { %4897 = vmatmul.mubr.bf16.gmra.mrb[28].mxu0 %v6283_v46  ;;  %v7994_v46 = vld [vmem:[#allocation6 + $0x58] sm:$0xff]  }
 0x2d4   :  { %4936 = vmatpush1.bf16.msra.mxu0 %v9078_v44  ;;  %4939 = vmatprep.mubr.bf16.mxu0 %v6118_v48  ;;  %v9304_v44 = vpop.f32.mrb[17].mxu1 }
 0x2d5   :  { %4937 = vmatprep.subr.bf16.mxu0 %v9088_v51  ;;  %v9306_v59 = vpop.f32.mrb[18].mxu1  ;;  %6730 = vmatprep.subr.bf16.mxu1 %v7994_v46  ;;  %v9381_v46 = vrot.slane %v772_v14, %v776_v8 }
 0x2d6   :  { %v9308_v51 = vpop.f32.mrb[19].mxu1 }
 0x2d8   :  { %4938 = vmatpush1.bf16.msra.mxu0 %v9090_v55  ;;  %v6141_v55 = vcombine.low %v231_v38, %v243_v42  ;;  %v7995_v38 = vld [vmem:[#allocation6 + $0x18] sm:$0xff]   ;;  %v7996_v42 = vld [vmem:[#allocation6 + $0x60] sm:$0xff]  }
 0x2d9   :  { %v9316_v3 = vpop.f32.mrb[20].mxu1  ;;  %6731 = vmatpush3.bf16.msra.mxu1 %v7995_v38  ;;  %v9383_v38 = vrot.slane %v772_v14, %v780_v37 }
 0x2da   :  { %v9318_v4 = vpop.f32.mrb[21].mxu1  ;;  %6732 = vmatprep.subr.bf16.mxu1 %v7996_v42  ;;  %v7044_v42 = vadd.f32 %v9302_v58, %v9381_v46 }
 0x2db   :  { %4940 = vmatmul.mubr.bf16.vlgmr.msra.gmra.mrb[0].mxu0 %v6117_v53  ;;  %v9320_v6 = vpop.f32.mrb[22].mxu1  ;;  %v7997_v53 = vld [vmem:[#allocation6 + $0x20] sm:$0xff]  }
 0x2dc   :  { %4949 = vmatprep.mubr.bf16.mxu0 %v6142_v57  ;;  %v9322_v10 = vpop.f32.mrb[23].mxu1 }
 0x2dd   :  { %6733 = vmatpush3.bf16.msra.mxu1 %v7997_v53  ;;  %v7047_v53 = vadd.f32 %v9304_v44, %v9383_v38 }
 0x2e1   :  { %v9330_v19 = vpop.f32.mrb[24].mxu1 }
 0x2e2   :  { %v9332_v20 = vpop.f32.mrb[25].mxu1 }
 0x2e3   :  { %4950 = vmatmul.mubr.bf16.gmra.mrb[4].mxu0 %v6141_v55  ;;  %v9334_v22 = vpop.f32.mrb[26].mxu1  ;;  %v7998_v55 = vld [vmem:[#allocation6 + $0x68] sm:$0xff]  }
 0x2e4   :  { %4959 = vmatprep.mubr.bf16.mxu0 %v6166_v1  ;;  %v9336_v26 = vpop.f32.mrb[27].mxu1  ;;  %6734 = vmatprep.subr.bf16.mxu1 %v7998_v55 }
 0x2e5   :  { %6735 = vmatpush3.bf16.msra.mxu1 %v7999_v11  ;;  %v7050_v11 = vadd.f32 %v9306_v59, %v9381_v46  ;;  %v7056_v59 = vadd.f32 %v9316_v3, %v9381_v46 }
 0x2e6   :  { %6736 = vmatprep.subr.bf16.mxu1 %v8000_v12 }
 0x2e9   :  { %v9338_v2 = vpop.f32.mrb[28].mxu1 }
 0x2ea   :  { %v9340_v7 = vpop.f32.mrb[29].mxu1 }
 0x2eb   :  { %4960 = vmatmul.mubr.bf16.gmra.mrb[8].mxu0 %v6165_v13  ;;  %v9342_v9 = vpop.f32.mrb[30].mxu1  ;;  %v8001_v13 = vld [vmem:[#allocation6 + $0x30] sm:$0xff]  }
 0x2ec   :  { %4969 = vmatprep.mubr.bf16.mxu0 %v6190_v17  ;;  %v9344_v15 = vpop.f32.mrb[31].mxu1  ;;  %6737 = vmatpush3.bf16.msra.mxu1 %v8001_v13  ;;  %v8002_v17 = vld [vmem:[#allocation6 + $0x78] sm:$0xff]  }
 0x2ed   :  { %6738 = vmatprep.subr.bf16.mxu1 %v8002_v17  ;;  %v7053_v17 = vadd.f32 %v9308_v51, %v9383_v38  ;;  %v7059_v51 = vadd.f32 %v9318_v4, %v9383_v38 }
 0x2f3   :  { %4970 = vmatmul.mubr.bf16.gmra.mrb[12].mxu0 %v6189_v63  ;;  %v8003_v63 = vld [vmem:[#allocation6 + $0x38] sm:$0xff]  }
 0x2f4   :  { %6739 = vmatpush3.bf16.msra.mxu1 %v8003_v63 }
 0x2f5   :  { %6852 = vmatprep.subr.bf16.mxu1 %v9378_v34 }
 0x2f9   :  { %v9346_v18 = vpop.f32.mrb[32].mxu1 }
 0x2fa   :  { %v9348_v23 = vpop.f32.mrb[33].mxu1 }
 0x2fb   :  { %v9350_v25 = vpop.f32.mrb[34].mxu1 }
 0x2fc   :  { %v9352_v31 = vpop.f32.mrb[35].mxu1 }
 0x303   :  { %v9354_v41 = vpop.f32.mrb[36].mxu1 }
 0x304   :  { %v9356_v56 = vpop.f32.mrb[37].mxu1 }
 0x305   :  { %v9358_v62 = vpop.f32.mrb[38].mxu1 }
 0x306   :  { %v9360_v29 = vpop.f32.mrb[39].mxu1 }
 0x311   :  { %v9362_v40 = vpop.f32.mrb[40].mxu1 }
 0x312   :  { %v9364_v24 = vpop.f32.mrb[41].mxu1 }
 0x313   :  { %v9366_v30 = vpop.f32.mrb[42].mxu1 }
 0x314   :  { %v9368_v48 = vpop.f32.mrb[43].mxu1 }
 0x319   :  { %v9370_v57 = vpop.f32.mrb[44].mxu1 }
 0x31a   :  { %v9372_v60 = vpop.f32.mrb[45].mxu1 }
 0x31b   :  { %v9374_v61 = vpop.f32.mrb[46].mxu1 }
 0x31c   :  { %v9376_v1 = vpop.f32.mrb[47].mxu1 }
 0x38e   :  { %v4868_v55 = vpop.f32.mrb[16].mxu0 }
 0x38f   :  { %v7045_v12 = vadd.f32 %v7044_v42, %v4868_v55  ;;  %v4870_v13 = vpop.f32.mrb[17].mxu0 }
 0x390   :  { %v7048_v63 = vadd.f32 %v7047_v53, %v4870_v13  ;;  %v4872_v39 = vpop.f32.mrb[18].mxu0 }
 0x391   :  { %v7051_v28 = vadd.f32 %v7050_v11, %v4872_v39  ;;  %v7046_v8 = vadd.f32 %v7045_v12, %v9346_v18  ;;  %v4874_v14 = vpop.f32.mrb[19].mxu0  ;;  %v7062_v18 = vadd.f32 %v9320_v6, %v9381_v46 }
 0x392   :  { %v7054_v37 = vadd.f32 %v7053_v17, %v4874_v14  ;;  %v7049_v58 = vadd.f32 %v7048_v63, %v9348_v23 }
 0x393   :  { %v7052_v44 = vadd.f32 %v7051_v28, %v9350_v25  ;;  %v5036_v42 = vmax.f32 %v7046_v8, 0.0 }
 0x394   :  { %v7055_v52 = vadd.f32 %v7054_v37, %v9352_v31  ;;  %v5037_v53 = vmax.f32 %v7049_v58, 0.0  ;;  %v7065_v31 = vadd.f32 %v9322_v10, %v9383_v38  ;;  %v7068_v37 = vadd.f32 %v9330_v19, %v9381_v46 }
 0x395   :  { %v5038_v55 = vmax.f32 %v7052_v44, 0.0  ;;  %v7071_v44 = vadd.f32 %v9332_v20, %v9383_v38 }
 0x396   :  { %v5039_v11 = vmax.f32 %v7055_v52, 0.0  ;;  %v4878_v13 = vpop.f32.mrb[20].mxu0 }
 0x397   :  { %v9403_v12 = vpack.c.bf16 %v5038_v55, %v5036_v42  ;;  %v7057_v23 = vadd.f32 %v7056_v59, %v4878_v13  ;;  %v4880_v25 = vpop.f32.mrb[21].mxu0 }
 0x398   :  { %v9407_v17 = vpack.c.bf16 %v5039_v11, %v5037_v53  ;;  %v7060_v3 = vadd.f32 %v7059_v51, %v4880_v25  ;;  %v4882_v63 = vpop.f32.mrb[22].mxu0 }
 0x399   :  { %v7063_v39 = vadd.f32 %v7062_v18, %v4882_v63  ;;  %v7058_v4 = vadd.f32 %v7057_v23, %v9354_v41  ;;  %v4884_v28 = vpop.f32.mrb[23].mxu0  ;;  %v7074_v41 = vadd.f32 %v9334_v22, %v9381_v46 }
 0x39a   :  { %v7066_v52 = vadd.f32 %v7065_v31, %v4884_v28  ;;  %v7061_v8 = vadd.f32 %v7060_v3, %v9356_v56  ;;  %v7080_v3 = vadd.f32 %v9338_v2, %v9381_v46 }
 0x39b   :  { %v7064_v6 = vadd.f32 %v7063_v39, %v9358_v62  ;;  %v5040_v58 = vmax.f32 %v7058_v4, 0.0  ;;  %v7083_v39 = vadd.f32 %v9340_v7, %v9383_v38 }
 0x39c   :  { %v7067_v14 = vadd.f32 %v7066_v52, %v9360_v29  ;;  %v5041_v59 = vmax.f32 %v7061_v8, 0.0  ;;  %v7077_v29 = vadd.f32 %v9336_v26, %v9383_v38 }
 0x39d   :  { %v5042_v10 = vmax.f32 %v7064_v6, 0.0 }
 0x39e   :  { %v5043_v42 = vmax.f32 %v7067_v14, 0.0  ;;  %v4888_v55 = vpop.f32.mrb[24].mxu0 }
 0x39f   :  { %v9419_v51 = vpack.c.bf16 %v5042_v10, %v5040_v58  ;;  %v7069_v56 = vadd.f32 %v7068_v37, %v4888_v55  ;;  %v4890_v62 = vpop.f32.mrb[25].mxu0 }
 0x3a0   :  { %v9423_v53 = vpack.c.bf16 %v5043_v42, %v5041_v59  ;;  %v7072_v19 = vadd.f32 %v7071_v44, %v4890_v62  ;;  %v4892_v11 = vpop.f32.mrb[26].mxu0  ;;  %v7012_v42 = vadd.f32 %v9231_v47, %v9381_v46 }
 0x3a1   :  { %v7075_v13 = vadd.f32 %v7074_v41, %v4892_v11  ;;  %v7070_v20 = vadd.f32 %v7069_v56, %v9362_v40  ;;  %v4894_v18 = vpop.f32.mrb[27].mxu0  ;;  %v7086_v40 = vadd.f32 %v9342_v9, %v9381_v46  ;;  %v7014_v41 = vadd.f32 %v9233_v50, %v9383_v38 }
 0x3a2   :  { %v7078_v23 = vadd.f32 %v7077_v29, %v4894_v18  ;;  %v7073_v25 = vadd.f32 %v7072_v19, %v9364_v24 }
 0x3a3   :  { %v7076_v22 = vadd.f32 %v7075_v13, %v9366_v30  ;;  %v5044_v63 = vmax.f32 %v7070_v20, 0.0 }
 0x3a4   :  { %v7079_v31 = vadd.f32 %v7078_v23, %v9368_v48  ;;  %v5045_v4 = vmax.f32 %v7073_v25, 0.0  ;;  %v7089_v48 = vadd.f32 %v9344_v15, %v9383_v38 }
 0x3a5   :  { %v5046_v26 = vmax.f32 %v7076_v22, 0.0 }
 0x3a6   :  { %v5047_v28 = vmax.f32 %v7079_v31, 0.0  ;;  %v4898_v52 = vpop.f32.mrb[28].mxu0 }
 0x3a7   :  { %v9435_v8 = vpack.c.bf16 %v5046_v26, %v5044_v63  ;;  %v7081_v24 = vadd.f32 %v7080_v3, %v4898_v52  ;;  %v4900_v30 = vpop.f32.mrb[29].mxu0  ;;  %v7022_v63 = vadd.f32 %v9251_v33, %v9383_v38  ;;  %v8005_v52 = vld [vmem:[#allocation9 + $0x8] sm:$0xff]  }
 0x3a8   :  { %v9439_v6 = vpack.c.bf16 %v5047_v28, %v5045_v4  ;;  %v7084_v2 = vadd.f32 %v7083_v39, %v4900_v30  ;;  %v4902_v14 = vpop.f32.mrb[30].mxu0  ;;  %v7024_v39 = vadd.f32 %v9253_v5, %v9381_v46 }
 0x3a9   :  { %v7087_v37 = vadd.f32 %v7086_v40, %v4902_v14  ;;  %v7082_v7 = vadd.f32 %v7081_v24, %v9370_v57  ;;  %v4904_v58 = vpop.f32.mrb[31].mxu0  ;;  %v7016_v57 = vadd.f32 %v9235_v54, %v9381_v46  ;;  %v7020_v54 = vadd.f32 %v9249_v0, %v9381_v46 }
 0x3aa   :  { %v7090_v10 = vadd.f32 %v7089_v48, %v4904_v58  ;;  %v7085_v44 = vadd.f32 %v7084_v2, %v9372_v60  ;;  %v7026_v40 = vadd.f32 %v9256_v36, %v9383_v38  ;;  %v7028_v58 = vadd.f32 %v9267_v16, %v9381_v46 }
 0x3ab   :  { %v7088_v9 = vadd.f32 %v7087_v37, %v9374_v61  ;;  %v5048_v55 = vmax.f32 %v7082_v7, 0.0  ;;  %v8006_v37 = vld [vmem:[#allocation9 + $0x10] sm:$0xff]   ;;  %v7030_v36 = vadd.f32 %v9269_v43, %v9383_v38 }
 0x3ac   :  { %v7091_v59 = vadd.f32 %v7090_v10, %v9376_v1  ;;  %v5049_v56 = vmax.f32 %v7085_v44, 0.0  ;;  %v7018_v1 = vadd.f32 %v9238_v27, %v9383_v38 }
 0x3ad   :  { %v5050_v15 = vmax.f32 %v7088_v9, 0.0 }
 0x3ae   :  { %v5051_v62 = vmax.f32 %v7091_v59, 0.0  ;;  %v4941_v29 = vpop.f32.mrb[0].mxu0  ;;  %v7032_v59 = vadd.f32 %v9271_v21, %v9381_v46  ;;  %v7036_v21 = vadd.f32 %v9285_v32, %v9381_v46 }
 0x3af   :  { %v9451_v19 = vpack.c.bf16 %v5050_v15, %v5048_v55  ;;  %v7013_v60 = vadd.f32 %v7012_v42, %v4941_v29  ;;  %v4943_v61 = vpop.f32.mrb[1].mxu0  ;;  %v7034_v55 = vadd.f32 %v9274_v45, %v9383_v38 }
 0x3b0   :  { %v9455_v11 = vpack.c.bf16 %v5051_v62, %v5049_v56  ;;  %v7015_v47 = vadd.f32 %v7014_v41, %v4943_v61  ;;  %v4945_v13 = vpop.f32.mrb[2].mxu0 }
 0x3b1   :  { %v7017_v20 = vadd.f32 %v7016_v57, %v4945_v13  ;;  %v4947_v18 = vpop.f32.mrb[3].mxu0  ;;  %v5020_v23 = vmax.f32 %v7013_v60, 0.0  ;;  %v7040_v13 = vadd.f32 %v9289_v35, %v9381_v46  ;;  %v8007_v35 = vld [vmem:[#allocation9 + $0x18] sm:$0xff]   ;;  %v8008_v46 = vld [vmem:[#allocation9 + $0x20] sm:$0xff]  }
 0x3b2   :  { %v7019_v50 = vadd.f32 %v7018_v1, %v4947_v18  ;;  %v5021_v22 = vmax.f32 %v7015_v47, 0.0  ;;  %v7038_v1 = vadd.f32 %v9287_v49, %v9383_v38 }
 0x3b3   :  { %v5022_v25 = vmax.f32 %v7017_v20, 0.0 }
 0x3b4   :  { %v5023_v31 = vmax.f32 %v7019_v50, 0.0  ;;  %v9607_v50 = vld [vmem:[#allocation28_spill] sm:$0xff] }
 0x3b5   :  { %v5052_v3 = vpack.c.bf16 %v5022_v25, %v5020_v23  ;;  %v7042_v23 = vadd.f32 %v9607_v50, %v9383_v38  ;;  %v8009_v38 = vld [vmem:[#allocation9 + $0x28] sm:$0xff]  }
 0x3b6   :  { %v5053_v26 = vpack.c.bf16 %v5023_v31, %v5021_v22  ;;  %v4951_v27 = vpop.f32.mrb[4].mxu0  ;;  %v8016_v50 = vld [vmem:[#allocation12 + $0x20] sm:$0xff]  }
 0x3b7   :  { %v7021_v4 = vadd.f32 %v7020_v54, %v4951_v27  ;;  %v4953_v28 = vpop.f32.mrb[5].mxu0 }
 0x3b8   :  { %v7023_v24 = vadd.f32 %v7022_v63, %v4953_v28  ;;  %v4955_v30 = vpop.f32.mrb[6].mxu0  ;;  %5235 = vmatprep.mubr.bf16.mxu1 %v5053_v26 }
 0x3b9   :  { %v7025_v48 = vadd.f32 %v7024_v39, %v4955_v30  ;;  %v4957_v0 = vpop.f32.mrb[7].mxu0  ;;  %5236 = vmatmul.mubr.bf16.vlgmr.msra.gmra.mrb[48].mxu1 %v5052_v3  ;;  %v5024_v33 = vmax.f32 %v7021_v4, 0.0 }
 0x3ba   :  { %v7027_v2 = vadd.f32 %v7026_v40, %v4957_v0  ;;  %6853 = vmatpush3.bf16.msra.mxu1 %v9378_v34  ;;  %v5025_v5 = vmax.f32 %v7023_v24, 0.0 }
 0x3bb   :  { %v5026_v14 = vmax.f32 %v7025_v48, 0.0  ;;  %6854 = vmatprep.subr.bf16.mxu1 %v8005_v52 }
 0x3bc   :  { %v5027_v7 = vmax.f32 %v7027_v2, 0.0 }
 0x3bd   :  { %v5054_v10 = vpack.c.bf16 %v5026_v14, %v5024_v33 }
 0x3be   :  { %v5055_v44 = vpack.c.bf16 %v5027_v7, %v5025_v5  ;;  %v4961_v9 = vpop.f32.mrb[8].mxu0  ;;  %6855 = vmatpush3.bf16.msra.mxu1 %v8005_v52 }
 0x3bf   :  { %v7029_v34 = vadd.f32 %v7028_v58, %v4961_v9  ;;  %v4963_v42 = vpop.f32.mrb[9].mxu0  ;;  %6856 = vmatprep.subr.bf16.mxu1 %v8006_v37 }
 0x3c0   :  { %v7031_v15 = vadd.f32 %v7030_v36, %v4963_v42  ;;  %v4965_v41 = vpop.f32.mrb[10].mxu0  ;;  %5243 = vmatprep.mubr.bf16.mxu1 %v5055_v44 }
 0x3c1   :  { %v7033_v16 = vadd.f32 %v7032_v59, %v4965_v41  ;;  %v4967_v56 = vpop.f32.mrb[11].mxu0  ;;  %5244 = vmatmul.mubr.bf16.gmra.mrb[52].mxu1 %v5054_v10  ;;  %v5028_v43 = vmax.f32 %v7029_v34, 0.0 }
 0x3c2   :  { %v7035_v62 = vadd.f32 %v7034_v55, %v4967_v56  ;;  %6857 = vmatpush3.bf16.msra.mxu1 %v8006_v37  ;;  %v5029_v57 = vmax.f32 %v7031_v15, 0.0  ;;  %v8013_v55 = vld [vmem:[#allocation12 + $0x8] sm:$0xff]  }
 0x3c3   :  { %v5030_v29 = vmax.f32 %v7033_v16, 0.0  ;;  %6858 = vmatprep.subr.bf16.mxu1 %v8007_v35 }
 0x3c4   :  { %v5031_v60 = vmax.f32 %v7035_v62, 0.0  ;;  %v8014_v62 = vld [vmem:[#allocation12 + $0x10] sm:$0xff]  }
 0x3c5   :  { %v5056_v61 = vpack.c.bf16 %v5030_v29, %v5028_v43 }
 0x3c6   :  { %v5057_v45 = vpack.c.bf16 %v5031_v60, %v5029_v57  ;;  %v4971_v47 = vpop.f32.mrb[12].mxu0  ;;  %6859 = vmatpush3.bf16.msra.mxu1 %v8007_v35 }
 0x3c7   :  { %v7037_v20 = vadd.f32 %v7036_v21, %v4971_v47  ;;  %v4973_v18 = vpop.f32.mrb[13].mxu0  ;;  %6860 = vmatprep.subr.bf16.mxu1 %v8008_v46 }
 0x3c8   :  { %v7039_v25 = vadd.f32 %v7038_v1, %v4973_v18  ;;  %v4975_v22 = vpop.f32.mrb[14].mxu0  ;;  %5251 = vmatprep.mubr.bf16.mxu1 %v5057_v45  ;;  %v8015_v45 = vld [vmem:[#allocation12 + $0x18] sm:$0xff]  }
 0x3c9   :  { %v7041_v31 = vadd.f32 %v7040_v13, %v4975_v22  ;;  %v4977_v54 = vpop.f32.mrb[15].mxu0  ;;  %5252 = vmatmul.mubr.bf16.gmra.mrb[56].mxu1 %v5056_v61  ;;  %v5032_v3 = vmax.f32 %v7037_v20, 0.0 }
 0x3ca   :  { %v7043_v32 = vadd.f32 %v7042_v23, %v4977_v54  ;;  %v5033_v49 = vmax.f32 %v7039_v25, 0.0  ;;  %6861 = vmatpush3.bf16.msra.mxu1 %v8008_v46 }
 0x3cb   :  { %v5034_v63 = vmax.f32 %v7041_v31, 0.0  ;;  %6862 = vmatprep.subr.bf16.mxu1 %v8009_v38 }
 0x3cc   :  { %v5035_v26 = vmax.f32 %v7043_v32, 0.0 }
 0x3cd   :  { %v5058_v27 = vpack.c.bf16 %v5034_v63, %v5032_v3  ;;  %v8017_v63 = vld [vmem:[#allocation12 + $0x28] sm:$0xff]  }
 0x3ce   :  { %v5059_v39 = vpack.c.bf16 %v5035_v26, %v5033_v49  ;;  %6863 = vmatpush3.bf16.msra.mxu1 %v8009_v38 }
 0x3d0   :  { %5259 = vmatprep.mubr.bf16.mxu1 %v5059_v39 }
 0x3d1   :  { %5260 = vmatmul.mubr.bf16.gmra.mrb[60].mxu1 %v5058_v27 }
 0x3d2   :  { %5267 = vmatprep.mubr.bf16.mxu1 %v9407_v17  ;;  %v8011_v17 = vld [vmem:[#allocation9 + $0x38] sm:$0xff]  }
 0x3d9   :  { %5268 = vmatmul.mubr.bf16.gmra.mrb[64].mxu1 %v9403_v12  ;;  %v8010_v12 = vld [vmem:[#allocation9 + $0x30] sm:$0xff]  }
 0x3da   :  { %5275 = vmatprep.mubr.bf16.mxu1 %v9423_v53  ;;  %6864 = vmatprep.subr.bf16.mxu1 %v8010_v12 }
 0x3db   :  { %6865 = vmatpush3.bf16.msra.mxu1 %v8010_v12 }
 0x3dc   :  { %6866 = vmatprep.subr.bf16.mxu1 %v8011_v17 }
 0x3df   :  { %6867 = vmatpush3.bf16.msra.mxu1 %v8011_v17 }
 0x3e1   :  { %5276 = vmatmul.mubr.bf16.gmra.mrb[68].mxu1 %v9419_v51  ;;  %v8012_v51 = vld [vmem:[#allocation12] sm:$0xff]  }
 0x3e2   :  { %5283 = vmatprep.mubr.bf16.mxu1 %v9439_v6  ;;  %6884 = vmatprep.subr.bf16.mxu1 %v8012_v51 }
 0x3e9   :  { %5284 = vmatmul.mubr.bf16.gmra.mrb[72].mxu1 %v9435_v8  ;;  %v9490_v8 = vld [vmem:[#allocation7] ss:$0 sm:$0xff] }
 0x3ea   :  { %5291 = vmatprep.mubr.bf16.mxu1 %v9455_v11 }
 0x3f1   :  { %5292 = vmatmul.mubr.bf16.gmra.mrb[76].mxu1 %v9451_v19 }
 0x48c   :  { %v6740_v53 = vpop.f32.mrb[48].mxu1 }
 0x48d   :  { %v6741_v6 = vpop.f32.mrb[49].mxu1 }
 0x48e   :  { %v6742_v19 = vadd.f32 %v6741_v6, %v6740_v53  ;;  %v6743_v11 = vpop.f32.mrb[50].mxu1 }
 0x48f   :  { %v6744_v4 = vpop.f32.mrb[51].mxu1 }
 0x490   :  { %v5238_v28 = vadd.f32 %v6742_v19, %v9490_v8  ;;  %v6745_v52 = vadd.f32 %v6744_v4, %v6743_v11 }
 0x492   :  { %v5241_v40 = vadd.f32 %v6745_v52, %v9490_v8  ;;  %v5300_v24 = vmax.f32 %v5238_v28, 0.0 }
 0x494   :  { %v5301_v30 = vmax.f32 %v5241_v40, 0.0  ;;  %v6746_v48 = vpop.f32.mrb[52].mxu1 }
 0x495   :  { %v6747_v0 = vpop.f32.mrb[53].mxu1 }
 0x496   :  { %v6748_v2 = vadd.f32 %v6747_v0, %v6746_v48  ;;  %v6749_v33 = vpop.f32.mrb[54].mxu1  ;;  %v5316_v14 = vpack.c.bf16 %v5301_v30, %v5300_v24 }
 0x497   :  { %v6750_v37 = vpop.f32.mrb[55].mxu1 }
 0x498   :  { %v5246_v5 = vadd.f32 %v6748_v2, %v9490_v8  ;;  %v6751_v7 = vadd.f32 %v6750_v37, %v6749_v33  ;;  %6868 = vmatprep.mubr.bf16.mxu1 %v5316_v14 }
 0x49a   :  { %v5249_v58 = vadd.f32 %v6751_v7, %v9490_v8  ;;  %v5302_v10 = vmax.f32 %v5246_v5, 0.0 }
 0x49c   :  { %v5303_v36 = vmax.f32 %v5249_v58, 0.0  ;;  %v6752_v44 = vpop.f32.mrb[56].mxu1 }
 0x49d   :  { %v6753_v9 = vpop.f32.mrb[57].mxu1 }
 0x49e   :  { %v5317_v59 = vpack.c.bf16 %v5303_v36, %v5302_v10  ;;  %v6754_v34 = vadd.f32 %v6753_v9, %v6752_v44  ;;  %v6755_v42 = vpop.f32.mrb[58].mxu1 }
 0x49f   :  { %v6756_v15 = vpop.f32.mrb[59].mxu1 }
 0x4a0   :  { %v5254_v41 = vadd.f32 %v6754_v34, %v9490_v8  ;;  %v6757_v16 = vadd.f32 %v6756_v15, %v6755_v42  ;;  %6869 = vmatmul.mubr.bf16.vlgmr.msra.gmra.mrb[80].mxu1 %v5317_v59 }
 0x4a1   :  { %6885 = vmatpush3.bf16.msra.mxu1 %v8012_v51 }
 0x4a2   :  { %v5257_v56 = vadd.f32 %v6757_v16, %v9490_v8  ;;  %6886 = vmatprep.subr.bf16.mxu1 %v8013_v55  ;;  %v5304_v43 = vmax.f32 %v5254_v41, 0.0 }
 0x4a4   :  { %v5305_v29 = vmax.f32 %v5257_v56, 0.0  ;;  %v6758_v57 = vpop.f32.mrb[60].mxu1  ;;  %v8018_v56 = vld [vmem:[#allocation12 + $0x30] sm:$0xff]  }
 0x4a5   :  { %v6759_v60 = vpop.f32.mrb[61].mxu1  ;;  %6887 = vmatpush3.bf16.msra.mxu1 %v8013_v55 }
 0x4a6   :  { %v6760_v21 = vadd.f32 %v6759_v60, %v6758_v57  ;;  %v6761_v61 = vpop.f32.mrb[62].mxu1  ;;  %v5318_v1 = vpack.c.bf16 %v5305_v29, %v5304_v43  ;;  %6888 = vmatprep.subr.bf16.mxu1 %v8014_v62  ;;  %v8020_v43 = vld [vmem:[#allocation15] sm:$0xff]   ;;  %v9508_v29 = vld [vmem:[#allocation10] ss:$0 sm:$0xff] }
 0x4a7   :  { %v6762_v47 = vpop.f32.mrb[63].mxu1 }
 0x4a8   :  { %v5262_v13 = vadd.f32 %v6760_v21, %v9490_v8  ;;  %v6763_v20 = vadd.f32 %v6762_v47, %v6761_v61  ;;  %6872 = vmatprep.mubr.bf16.mxu1 %v5318_v1 }
 0x4a9   :  { %6889 = vmatpush3.bf16.msra.mxu1 %v8014_v62  ;;  %v8019_v62 = vld [vmem:[#allocation12 + $0x38] sm:$0xff]  }
 0x4aa   :  { %v5265_v18 = vadd.f32 %v6763_v20, %v9490_v8  ;;  %6890 = vmatprep.subr.bf16.mxu1 %v8015_v45  ;;  %v5306_v23 = vmax.f32 %v5262_v13, 0.0 }
 0x4ac   :  { %v5307_v25 = vmax.f32 %v5265_v18, 0.0  ;;  %v6764_v22 = vpop.f32.mrb[64].mxu1 }
 0x4ad   :  { %v6765_v31 = vpop.f32.mrb[65].mxu1  ;;  %6891 = vmatpush3.bf16.msra.mxu1 %v8015_v45 }
 0x4ae   :  { %v6766_v54 = vadd.f32 %v6765_v31, %v6764_v22  ;;  %v6767_v32 = vpop.f32.mrb[66].mxu1  ;;  %v5319_v3 = vpack.c.bf16 %v5307_v25, %v5306_v23  ;;  %6892 = vmatprep.subr.bf16.mxu1 %v8016_v50  ;;  %v8021_v22 = vld [vmem:[#allocation15 + $0x8] sm:$0xff]   ;;  %v8022_v31 = vld [vmem:[#allocation15 + $0x10] sm:$0xff]  }
 0x4af   :  { %v6768_v49 = vpop.f32.mrb[67].mxu1 }
 0x4b0   :  { %v5270_v26 = vadd.f32 %v6766_v54, %v9490_v8  ;;  %v6769_v27 = vadd.f32 %v6768_v49, %v6767_v32  ;;  %6873 = vmatmul.mubr.bf16.gmra.mrb[84].mxu1 %v5319_v3 }
 0x4b1   :  { %6893 = vmatpush3.bf16.msra.mxu1 %v8016_v50 }
 0x4b2   :  { %v5273_v39 = vadd.f32 %v6769_v27, %v9490_v8  ;;  %6894 = vmatprep.subr.bf16.mxu1 %v8017_v63  ;;  %v5308_v35 = vmax.f32 %v5270_v26, 0.0 }
 0x4b4   :  { %v5309_v46 = vmax.f32 %v5273_v39, 0.0  ;;  %v6770_v38 = vpop.f32.mrb[68].mxu1 }
 0x4b5   :  { %v6771_v12 = vpop.f32.mrb[69].mxu1  ;;  %6895 = vmatpush3.bf16.msra.mxu1 %v8017_v63  ;;  %v8023_v63 = vld [vmem:[#allocation15 + $0x18] sm:$0xff]  }
 0x4b6   :  { %v6772_v17 = vadd.f32 %v6771_v12, %v6770_v38  ;;  %v6773_v51 = vpop.f32.mrb[70].mxu1  ;;  %v5320_v53 = vpack.c.bf16 %v5309_v46, %v5308_v35  ;;  %6896 = vmatprep.subr.bf16.mxu1 %v8018_v56  ;;  %v8024_v12 = vld [vmem:[#allocation15 + $0x20] sm:$0xff]  }
 0x4b7   :  { %v6774_v6 = vpop.f32.mrb[71].mxu1 }
 0x4b8   :  { %v5278_v19 = vadd.f32 %v6772_v17, %v9490_v8  ;;  %v6775_v11 = vadd.f32 %v6774_v6, %v6773_v51  ;;  %6876 = vmatprep.mubr.bf16.mxu1 %v5320_v53 }
 0x4b9   :  { %6897 = vmatpush3.bf16.msra.mxu1 %v8018_v56 }
 0x4ba   :  { %v5281_v4 = vadd.f32 %v6775_v11, %v9490_v8  ;;  %v5310_v28 = vmax.f32 %v5278_v19, 0.0  ;;  %6898 = vmatprep.subr.bf16.mxu1 %v8019_v62  ;;  %v8025_v19 = vld [vmem:[#allocation15 + $0x28] sm:$0xff]  }
 0x4bc   :  { %v5311_v52 = vmax.f32 %v5281_v4, 0.0  ;;  %v6776_v40 = vpop.f32.mrb[72].mxu1 }
 0x4bd   :  { %v6777_v24 = vpop.f32.mrb[73].mxu1  ;;  %6899 = vmatpush3.bf16.msra.mxu1 %v8019_v62  ;;  %v8026_v62 = vld [vmem:[#allocation15 + $0x30] sm:$0xff]  }
 0x4be   :  { %v6778_v30 = vadd.f32 %v6777_v24, %v6776_v40  ;;  %v6779_v48 = vpop.f32.mrb[74].mxu1  ;;  %v5321_v0 = vpack.c.bf16 %v5311_v52, %v5310_v28  ;;  %6916 = vmatprep.subr.bf16.mxu1 %v8020_v43 }
 0x4bf   :  { %v6780_v2 = vpop.f32.mrb[75].mxu1 }
 0x4c0   :  { %v5286_v33 = vadd.f32 %v6778_v30, %v9490_v8  ;;  %v6781_v14 = vadd.f32 %v6780_v2, %v6779_v48  ;;  %6877 = vmatmul.mubr.bf16.gmra.mrb[88].mxu1 %v5321_v0 }
 0x4c2   :  { %v5289_v37 = vadd.f32 %v6781_v14, %v9490_v8  ;;  %v5312_v5 = vmax.f32 %v5286_v33, 0.0 }
 0x4c4   :  { %v5313_v7 = vmax.f32 %v5289_v37, 0.0  ;;  %v6782_v58 = vpop.f32.mrb[76].mxu1 }
 0x4c5   :  { %v6783_v10 = vpop.f32.mrb[77].mxu1 }
 0x4c6   :  { %v6784_v36 = vadd.f32 %v6783_v10, %v6782_v58  ;;  %v6785_v44 = vpop.f32.mrb[78].mxu1  ;;  %v5322_v9 = vpack.c.bf16 %v5313_v7, %v5312_v5 }
 0x4c7   :  { %v6786_v59 = vpop.f32.mrb[79].mxu1 }
 0x4c8   :  { %v5294_v34 = vadd.f32 %v6784_v36, %v9490_v8  ;;  %v6787_v42 = vadd.f32 %v6786_v59, %v6785_v44  ;;  %6880 = vmatprep.mubr.bf16.mxu1 %v5322_v9 }
 0x4ca   :  { %v5297_v55 = vadd.f32 %v6787_v42, %v9490_v8  ;;  %v5314_v15 = vmax.f32 %v5294_v34, 0.0 }
 0x4cc   :  { %v5315_v41 = vmax.f32 %v5297_v55, 0.0 }
 0x4ce   :  { %v5323_v16 = vpack.c.bf16 %v5315_v41, %v5314_v15 }
 0x4d0   :  { %6881 = vmatmul.mubr.bf16.gmra.mrb[92].mxu1 %v5323_v16 }
 0x573   :  { %v6870_v57 = vpop.f32.mrb[80].mxu1 }
 0x574   :  { %v5438_v60 = vadd.f32 %v6870_v57, %v9508_v29  ;;  %v5429_v21 = vpop.f32.mrb[81].mxu1  ;;  %v8028_v57 = vld [vmem:[#allocation18] sm:$0xff]  }
 0x575   :  { %v5430_v8 = vadd.f32 %v9508_v29, %v5429_v21  ;;  %v6871_v61 = vpop.f32.mrb[82].mxu1 }
 0x576   :  { %v5441_v1 = vadd.f32 %v6871_v61, %v9508_v29  ;;  %v5432_v45 = vpop.f32.mrb[83].mxu1  ;;  %v5494_v13 = vmax.f32 %v5438_v60, 0.0  ;;  %v9526_v60 = vld [vmem:[#allocation13] ss:$0 sm:$0xff] }
 0x577   :  { %v5433_v47 = vadd.f32 %v9508_v29, %v5432_v45  ;;  %v5492_v18 = vmax.f32 %v5430_v8, 0.0 }
 0x578   :  { %v5495_v20 = vmax.f32 %v5441_v1, 0.0 }
 0x579   :  { %v5493_v50 = vmax.f32 %v5433_v47, 0.0 }
 0x57a   :  { %v5509_v23 = vpack.c.bf16 %v5495_v20, %v5494_v13 }
 0x57b   :  { %v5508_v25 = vpack.c.bf16 %v5493_v50, %v5492_v18 }
 0x57d   :  { %6900 = vmatprep.mubr.bf16.mxu1 %v5508_v25 }
 0x57e   :  { %6901 = vmatmul.mubr.bf16.vlgmr.msra.gmra.mrb[96].mxu1 %v5509_v23 }
 0x57f   :  { %6917 = vmatpush3.bf16.msra.mxu1 %v8020_v43  ;;  %v8027_v43 = vld [vmem:[#allocation15 + $0x38] sm:$0xff]  }
 0x580   :  { %6918 = vmatprep.subr.bf16.mxu1 %v8021_v22 }
 0x583   :  { %v6874_v54 = vpop.f32.mrb[84].mxu1  ;;  %6919 = vmatpush3.bf16.msra.mxu1 %v8021_v22 }
 0x584   :  { %v5454_v32 = vadd.f32 %v6874_v54, %v9508_v29  ;;  %v5445_v3 = vpop.f32.mrb[85].mxu1  ;;  %6920 = vmatprep.subr.bf16.mxu1 %v8022_v31  ;;  %v8030_v54 = vld [vmem:[#allocation18 + $0x10] sm:$0xff]  }
 0x585   :  { %v5446_v49 = vadd.f32 %v9508_v29, %v5445_v3  ;;  %v6875_v26 = vpop.f32.mrb[86].mxu1 }
 0x586   :  { %v5457_v27 = vadd.f32 %v6875_v26, %v9508_v29  ;;  %v5448_v39 = vpop.f32.mrb[87].mxu1  ;;  %v5498_v46 = vmax.f32 %v5454_v32, 0.0 }
 0x587   :  { %v5449_v35 = vadd.f32 %v9508_v29, %v5448_v39  ;;  %6921 = vmatpush3.bf16.msra.mxu1 %v8022_v31  ;;  %v5496_v17 = vmax.f32 %v5446_v49, 0.0  ;;  %v8029_v31 = vld [vmem:[#allocation18 + $0x8] sm:$0xff]   ;;  %v8031_v49 = vld [vmem:[#allocation18 + $0x18] sm:$0xff]  }
 0x588   :  { %v5499_v38 = vmax.f32 %v5457_v27, 0.0  ;;  %6922 = vmatprep.subr.bf16.mxu1 %v8023_v63 }
 0x589   :  { %v5497_v51 = vmax.f32 %v5449_v35, 0.0 }
 0x58a   :  { %v5511_v53 = vpack.c.bf16 %v5499_v38, %v5498_v46 }
 0x58b   :  { %v5510_v6 = vpack.c.bf16 %v5497_v51, %v5496_v17  ;;  %6923 = vmatpush3.bf16.msra.mxu1 %v8023_v63  ;;  %v8032_v17 = vld [vmem:[#allocation18 + $0x20] sm:$0xff]  }
 0x58c   :  { %6924 = vmatprep.subr.bf16.mxu1 %v8024_v12 }
 0x58d   :  { %6904 = vmatprep.mubr.bf16.mxu1 %v5510_v6 }
 0x58e   :  { %6905 = vmatmul.mubr.bf16.gmra.mrb[100].mxu1 %v5511_v53 }
 0x58f   :  { %6925 = vmatpush3.bf16.msra.mxu1 %v8024_v12 }
 0x590   :  { %6926 = vmatprep.subr.bf16.mxu1 %v8025_v19 }
 0x593   :  { %v6878_v11 = vpop.f32.mrb[88].mxu1  ;;  %6927 = vmatpush3.bf16.msra.mxu1 %v8025_v19 }
 0x594   :  { %v5470_v4 = vadd.f32 %v6878_v11, %v9508_v29  ;;  %v5461_v28 = vpop.f32.mrb[89].mxu1  ;;  %6928 = vmatprep.subr.bf16.mxu1 %v8026_v62  ;;  %v8033_v11 = vld [vmem:[#allocation18 + $0x28] sm:$0xff]  }
 0x595   :  { %v5462_v52 = vadd.f32 %v9508_v29, %v5461_v28  ;;  %v6879_v40 = vpop.f32.mrb[90].mxu1 }
 0x596   :  { %v5473_v24 = vadd.f32 %v6879_v40, %v9508_v29  ;;  %v5464_v30 = vpop.f32.mrb[91].mxu1  ;;  %v5502_v0 = vmax.f32 %v5470_v4, 0.0 }
 0x597   :  { %v5465_v48 = vadd.f32 %v9508_v29, %v5464_v30  ;;  %v5500_v33 = vmax.f32 %v5462_v52, 0.0  ;;  %6929 = vmatpush3.bf16.msra.mxu1 %v8026_v62 }
 0x598   :  { %v5503_v2 = vmax.f32 %v5473_v24, 0.0  ;;  %6930 = vmatprep.subr.bf16.mxu1 %v8027_v43 }
 0x599   :  { %v5501_v14 = vmax.f32 %v5465_v48, 0.0 }
 0x59a   :  { %v5513_v37 = vpack.c.bf16 %v5503_v2, %v5502_v0 }
 0x59b   :  { %v5512_v5 = vpack.c.bf16 %v5501_v14, %v5500_v33  ;;  %6931 = vmatpush3.bf16.msra.mxu1 %v8027_v43  ;;  %v8034_v43 = vld [vmem:[#allocation18 + $0x30] sm:$0xff]  }
 0x59c   :  { %6948 = vmatprep.subr.bf16.mxu1 %v8028_v57 }
 0x59d   :  { %6908 = vmatprep.mubr.bf16.mxu1 %v5512_v5 }
 0x59e   :  { %6909 = vmatmul.mubr.bf16.gmra.mrb[104].mxu1 %v5513_v37 }
 0x5a3   :  { %v6882_v7 = vpop.f32.mrb[92].mxu1 }
 0x5a4   :  { %v5486_v58 = vadd.f32 %v6882_v7, %v9508_v29  ;;  %v5477_v10 = vpop.f32.mrb[93].mxu1 }
 0x5a5   :  { %v5478_v36 = vadd.f32 %v9508_v29, %v5477_v10  ;;  %v6883_v44 = vpop.f32.mrb[94].mxu1 }
 0x5a6   :  { %v5489_v9 = vadd.f32 %v6883_v44, %v9508_v29  ;;  %v5480_v59 = vpop.f32.mrb[95].mxu1  ;;  %v5506_v42 = vmax.f32 %v5486_v58, 0.0 }
 0x5a7   :  { %v5481_v34 = vadd.f32 %v9508_v29, %v5480_v59  ;;  %v5504_v15 = vmax.f32 %v5478_v36, 0.0 }
 0x5a8   :  { %v5507_v55 = vmax.f32 %v5489_v9, 0.0 }
 0x5a9   :  { %v5505_v41 = vmax.f32 %v5481_v34, 0.0 }
 0x5aa   :  { %v5515_v16 = vpack.c.bf16 %v5507_v55, %v5506_v42 }
 0x5ab   :  { %v5514_v56 = vpack.c.bf16 %v5505_v41, %v5504_v15 }
 0x5ad   :  { %6912 = vmatprep.mubr.bf16.mxu1 %v5514_v56 }
 0x5ae   :  { %6913 = vmatmul.mubr.bf16.gmra.mrb[108].mxu1 %v5515_v16 }
 0x651   :  { %v6902_v21 = vpop.f32.mrb[96].mxu1 }
 0x652   :  { %v5630_v29 = vadd.f32 %v6902_v21, %v9526_v60  ;;  %v5621_v8 = vpop.f32.mrb[97].mxu1  ;;  %v6706_v21 = vld [vmem:[#allocation16] ss:$0 sm:$0xff] }
 0x653   :  { %v5622_v61 = vadd.f32 %v9526_v60, %v5621_v8  ;;  %v6903_v1 = vpop.f32.mrb[98].mxu1 }
 0x654   :  { %v5633_v45 = vadd.f32 %v6903_v1, %v9526_v60  ;;  %v5624_v47 = vpop.f32.mrb[99].mxu1  ;;  %v5686_v20 = vmax.f32 %v5630_v29, 0.0 }
 0x655   :  { %v5625_v13 = vadd.f32 %v9526_v60, %v5624_v47  ;;  %v5684_v50 = vmax.f32 %v5622_v61, 0.0 }
 0x656   :  { %v5687_v18 = vmax.f32 %v5633_v45, 0.0 }
 0x657   :  { %v5685_v23 = vmax.f32 %v5625_v13, 0.0 }
 0x658   :  { %v5701_v25 = vpack.c.bf16 %v5687_v18, %v5686_v20 }
 0x659   :  { %v5700_v22 = vpack.c.bf16 %v5685_v23, %v5684_v50 }
 0x65b   :  { %6932 = vmatprep.mubr.bf16.mxu1 %v5700_v22 }
 0x65c   :  { %6933 = vmatmul.mubr.bf16.vlgmr.msra.gmra.mrb[112].mxu1 %v5701_v25 }
 0x65d   :  { %6949 = vmatpush3.bf16.msra.mxu1 %v8028_v57  ;;  %v8035_v57 = vld [vmem:[#allocation18 + $0x38] sm:$0xff]  }
 0x65e   :  { %6950 = vmatprep.subr.bf16.mxu1 %v8029_v31 }
 0x661   :  { %v6906_v32 = vpop.f32.mrb[100].mxu1  ;;  %6951 = vmatpush3.bf16.msra.mxu1 %v8029_v31 }
 0x662   :  { %v5646_v3 = vadd.f32 %v6906_v32, %v9526_v60  ;;  %v5637_v63 = vpop.f32.mrb[101].mxu1  ;;  %6952 = vmatprep.subr.bf16.mxu1 %v8030_v54 }
 0x663   :  { %v5638_v26 = vadd.f32 %v9526_v60, %v5637_v63  ;;  %v6907_v27 = vpop.f32.mrb[102].mxu1 }
 0x664   :  { %v5649_v39 = vadd.f32 %v6907_v27, %v9526_v60  ;;  %v5640_v35 = vpop.f32.mrb[103].mxu1  ;;  %v5690_v38 = vmax.f32 %v5646_v3, 0.0 }
 0x665   :  { %v5641_v46 = vadd.f32 %v9526_v60, %v5640_v35  ;;  %6953 = vmatpush3.bf16.msra.mxu1 %v8030_v54  ;;  %v5688_v51 = vmax.f32 %v5638_v26, 0.0 }
 0x666   :  { %v5691_v12 = vmax.f32 %v5649_v39, 0.0  ;;  %6954 = vmatprep.subr.bf16.mxu1 %v8031_v49 }
 0x667   :  { %v5689_v53 = vmax.f32 %v5641_v46, 0.0 }
 0x668   :  { %v5703_v6 = vpack.c.bf16 %v5691_v12, %v5690_v38 }
 0x669   :  { %v5702_v19 = vpack.c.bf16 %v5689_v53, %v5688_v51  ;;  %6955 = vmatpush3.bf16.msra.mxu1 %v8031_v49 }
 0x66a   :  { %6956 = vmatprep.subr.bf16.mxu1 %v8032_v17 }
 0x66b   :  { %6936 = vmatprep.mubr.bf16.mxu1 %v5702_v19 }
 0x66c   :  { %6937 = vmatmul.mubr.bf16.gmra.mrb[116].mxu1 %v5703_v6 }
 0x66d   :  { %6957 = vmatpush3.bf16.msra.mxu1 %v8032_v17 }
 0x66e   :  { %6958 = vmatprep.subr.bf16.mxu1 %v8033_v11 }
 0x671   :  { %v6910_v4 = vpop.f32.mrb[104].mxu1  ;;  %6959 = vmatpush3.bf16.msra.mxu1 %v8033_v11 }
 0x672   :  { %v5662_v28 = vadd.f32 %v6910_v4, %v9526_v60  ;;  %v5653_v52 = vpop.f32.mrb[105].mxu1  ;;  %6960 = vmatprep.subr.bf16.mxu1 %v8034_v43 }
 0x673   :  { %v5654_v40 = vadd.f32 %v9526_v60, %v5653_v52  ;;  %v6911_v24 = vpop.f32.mrb[106].mxu1 }
 0x674   :  { %v5665_v30 = vadd.f32 %v6911_v24, %v9526_v60  ;;  %v5656_v48 = vpop.f32.mrb[107].mxu1  ;;  %v5694_v2 = vmax.f32 %v5662_v28, 0.0 }
 0x675   :  { %v5657_v0 = vadd.f32 %v9526_v60, %v5656_v48  ;;  %v5692_v14 = vmax.f32 %v5654_v40, 0.0  ;;  %6961 = vmatpush3.bf16.msra.mxu1 %v8034_v43 }
 0x676   :  { %v5695_v33 = vmax.f32 %v5665_v30, 0.0  ;;  %6962 = vmatprep.subr.bf16.mxu1 %v8035_v57 }
 0x677   :  { %v5693_v37 = vmax.f32 %v5657_v0, 0.0 }
 0x678   :  { %v5705_v5 = vpack.c.bf16 %v5695_v33, %v5694_v2 }
 0x679   :  { %v5704_v7 = vpack.c.bf16 %v5693_v37, %v5692_v14  ;;  %6963 = vmatpush3.bf16.msra.mxu1 %v8035_v57 }
 0x67b   :  { %6940 = vmatprep.mubr.bf16.mxu1 %v5704_v7 }
 0x67c   :  { %6941 = vmatmul.mubr.bf16.gmra.mrb[120].mxu1 %v5705_v5 }
 0x681   :  { %v6914_v58 = vpop.f32.mrb[108].mxu1 }
 0x682   :  { %v5678_v10 = vadd.f32 %v6914_v58, %v9526_v60  ;;  %v5669_v36 = vpop.f32.mrb[109].mxu1 }
 0x683   :  { %v5670_v44 = vadd.f32 %v9526_v60, %v5669_v36  ;;  %v6915_v9 = vpop.f32.mrb[110].mxu1 }
 0x684   :  { %v5681_v59 = vadd.f32 %v6915_v9, %v9526_v60  ;;  %v5672_v34 = vpop.f32.mrb[111].mxu1  ;;  %v5698_v55 = vmax.f32 %v5678_v10, 0.0 }
 0x685   :  { %v5673_v42 = vadd.f32 %v9526_v60, %v5672_v34  ;;  %v5696_v41 = vmax.f32 %v5670_v44, 0.0 }
 0x686   :  { %v5699_v15 = vmax.f32 %v5681_v59, 0.0 }
 0x687   :  { %v5697_v16 = vmax.f32 %v5673_v42, 0.0 }
 0x688   :  { %v5707_v56 = vpack.c.bf16 %v5699_v15, %v5698_v55  ;;  %v6715_v15 = vld [vmem:[#allocation19] ss:$0 sm:$0xff] }
 0x689   :  { %v5706_v62 = vpack.c.bf16 %v5697_v16, %v5696_v41 }
 0x68b   :  { %6944 = vmatprep.mubr.bf16.mxu1 %v5706_v62 }
 0x68c   :  { %6945 = vmatmul.mubr.bf16.gmra.mrb[124].mxu1 %v5707_v56 }
 0x72f   :  { %v6934_v29 = vpop.f32.mrb[112].mxu1 }
 0x730   :  { %v5822_v8 = vadd.f32 %v6934_v29, %v6706_v21  ;;  %v5813_v61 = vpop.f32.mrb[113].mxu1 }
 0x731   :  { %v5814_v1 = vadd.f32 %v6706_v21, %v5813_v61  ;;  %v6935_v60 = vpop.f32.mrb[114].mxu1 }
 0x732   :  { %v5825_v45 = vadd.f32 %v6935_v60, %v6706_v21  ;;  %v5816_v47 = vpop.f32.mrb[115].mxu1  ;;  %v5878_v20 = vmax.f32 %v5822_v8, 0.0 }
 0x733   :  { %v5817_v13 = vadd.f32 %v6706_v21, %v5816_v47  ;;  %v5876_v50 = vmax.f32 %v5814_v1, 0.0 }
 0x734   :  { %v5879_v18 = vmax.f32 %v5825_v45, 0.0 }
 0x735   :  { %v5877_v23 = vmax.f32 %v5817_v13, 0.0 }
 0x736   :  { %v5893_v25 = vpack.c.bf16 %v5879_v18, %v5878_v20 }
 0x737   :  { %v5892_v22 = vpack.c.bf16 %v5877_v23, %v5876_v50 }
 0x739   :  { %6964 = vmatprep.mubr.bf16.mxu1 %v5892_v22 }
 0x73a   :  { %6965 = vmatmul.mubr.bf16.vlgmr.msra.gmra.mrb[128].mxu1 %v5893_v25 }
 0x73f   :  { %v6938_v31 = vpop.f32.mrb[116].mxu1 }
 0x740   :  { %v5838_v54 = vadd.f32 %v6938_v31, %v6706_v21  ;;  %v5829_v32 = vpop.f32.mrb[117].mxu1 }
 0x741   :  { %v5830_v3 = vadd.f32 %v6706_v21, %v5829_v32  ;;  %v6939_v63 = vpop.f32.mrb[118].mxu1 }
 0x742   :  { %v5841_v49 = vadd.f32 %v6939_v63, %v6706_v21  ;;  %v5832_v26 = vpop.f32.mrb[119].mxu1  ;;  %v5882_v39 = vmax.f32 %v5838_v54, 0.0 }
 0x743   :  { %v5833_v27 = vadd.f32 %v6706_v21, %v5832_v26  ;;  %v5880_v46 = vmax.f32 %v5830_v3, 0.0 }
 0x744   :  { %v5883_v35 = vmax.f32 %v5841_v49, 0.0 }
 0x745   :  { %v5881_v38 = vmax.f32 %v5833_v27, 0.0 }
 0x746   :  { %v5895_v12 = vpack.c.bf16 %v5883_v35, %v5882_v39 }
 0x747   :  { %v5894_v17 = vpack.c.bf16 %v5881_v38, %v5880_v46 }
 0x749   :  { %6968 = vmatprep.mubr.bf16.mxu1 %v5894_v17 }
 0x74a   :  { %6969 = vmatmul.mubr.bf16.gmra.mrb[132].mxu1 %v5895_v12 }
 0x74f   :  { %v6942_v51 = vpop.f32.mrb[120].mxu1 }
 0x750   :  { %v5854_v53 = vadd.f32 %v6942_v51, %v6706_v21  ;;  %v5845_v6 = vpop.f32.mrb[121].mxu1 }
 0x751   :  { %v5846_v19 = vadd.f32 %v6706_v21, %v5845_v6  ;;  %v6943_v11 = vpop.f32.mrb[122].mxu1 }
 0x752   :  { %v5857_v4 = vadd.f32 %v6943_v11, %v6706_v21  ;;  %v5848_v28 = vpop.f32.mrb[123].mxu1  ;;  %v5886_v40 = vmax.f32 %v5854_v53, 0.0 }
 0x753   :  { %v5849_v52 = vadd.f32 %v6706_v21, %v5848_v28  ;;  %v5884_v30 = vmax.f32 %v5846_v19, 0.0 }
 0x754   :  { %v5887_v24 = vmax.f32 %v5857_v4, 0.0 }
 0x755   :  { %v5885_v48 = vmax.f32 %v5849_v52, 0.0 }
 0x756   :  { %v5897_v0 = vpack.c.bf16 %v5887_v24, %v5886_v40 }
 0x757   :  { %v5896_v2 = vpack.c.bf16 %v5885_v48, %v5884_v30 }
 0x759   :  { %6972 = vmatprep.mubr.bf16.mxu1 %v5896_v2 }
 0x75a   :  { %6973 = vmatmul.mubr.bf16.gmra.mrb[136].mxu1 %v5897_v0 }
 0x75f   :  { %v6946_v33 = vpop.f32.mrb[124].mxu1 }
 0x760   :  { %v5870_v14 = vadd.f32 %v6946_v33, %v6706_v21  ;;  %v5861_v37 = vpop.f32.mrb[125].mxu1 }
 0x761   :  { %v5862_v5 = vadd.f32 %v6706_v21, %v5861_v37  ;;  %v6947_v7 = vpop.f32.mrb[126].mxu1 }
 0x762   :  { %v5873_v58 = vadd.f32 %v6947_v7, %v6706_v21  ;;  %v5864_v10 = vpop.f32.mrb[127].mxu1  ;;  %v5890_v44 = vmax.f32 %v5870_v14, 0.0 }
 0x763   :  { %v5865_v36 = vadd.f32 %v6706_v21, %v5864_v10  ;;  %v5888_v59 = vmax.f32 %v5862_v5, 0.0 }
 0x764   :  { %v5891_v9 = vmax.f32 %v5873_v58, 0.0 }
 0x765   :  { %v5889_v34 = vmax.f32 %v5865_v36, 0.0 }
 0x766   :  { %v5899_v42 = vpack.c.bf16 %v5891_v9, %v5890_v44 }
 0x767   :  { %v5898_v55 = vpack.c.bf16 %v5889_v34, %v5888_v59 }
 0x769   :  { %6976 = vmatprep.mubr.bf16.mxu1 %v5898_v55 }
 0x76a   :  { %6977 = vmatmul.mubr.bf16.gmra.mrb[140].mxu1 %v5899_v42 }
 0x80d   :  { %v6966_v41 = vpop.f32.mrb[128].mxu1 }
 0x80e   :  { %v6014_v16 = vadd.f32 %v6966_v41, %v6715_v15  ;;  %v6005_v56 = vpop.f32.mrb[129].mxu1 }
 0x80f   :  { %v6006_v62 = vadd.f32 %v6715_v15, %v6005_v56  ;;  %v6967_v43 = vpop.f32.mrb[130].mxu1 }
 0x810   :  { %6070 = vst [vmem:[%s9605_s13 + $0x10] sm:$0xff] %v6014_v16  ;;  %v6017_v57 = vadd.f32 %v6967_v43, %v6715_v15  ;;  %v6008_v21 = vpop.f32.mrb[131].mxu1 }
 0x811   :  { %6068 = vst [vmem:[%s9605_s13] sm:$0xff] %v6006_v62  ;;  %v6009_v29 = vadd.f32 %v6715_v15, %v6008_v21 }
 0x812   :  { %6071 = vst [vmem:[%s9605_s13 + $0x18] sm:$0xff] %v6017_v57 }
 0x813   :  { %6069 = vst [vmem:[%s9605_s13 + $0x8] sm:$0xff] %v6009_v29 }
 0x81d   :  { %v6970_v8 = vpop.f32.mrb[132].mxu1 }
 0x81e   :  { %v6030_v61 = vadd.f32 %v6970_v8, %v6715_v15  ;;  %v6021_v1 = vpop.f32.mrb[133].mxu1 }
 0x81f   :  { %v6022_v60 = vadd.f32 %v6715_v15, %v6021_v1  ;;  %v6971_v45 = vpop.f32.mrb[134].mxu1 }
 0x820   :  { %6074 = vst [vmem:[%s9605_s13 + $0x30] sm:$0xff] %v6030_v61  ;;  %v6033_v47 = vadd.f32 %v6971_v45, %v6715_v15  ;;  %v6024_v13 = vpop.f32.mrb[135].mxu1 }
 0x821   :  { %6072 = vst [vmem:[%s9605_s13 + $0x20] sm:$0xff] %v6022_v60  ;;  %v6025_v20 = vadd.f32 %v6715_v15, %v6024_v13 }
 0x822   :  { %6075 = vst [vmem:[%s9605_s13 + $0x38] sm:$0xff] %v6033_v47 }
 0x823   :  { %6073 = vst [vmem:[%s9605_s13 + $0x28] sm:$0xff] %v6025_v20 }
 0x82d   :  { %v6974_v18 = vpop.f32.mrb[136].mxu1 }
 0x82e   :  { %v6046_v50 = vadd.f32 %v6974_v18, %v6715_v15  ;;  %v6037_v23 = vpop.f32.mrb[137].mxu1 }
 0x82f   :  { %v6038_v25 = vadd.f32 %v6715_v15, %v6037_v23  ;;  %v6975_v22 = vpop.f32.mrb[138].mxu1 }
 0x830   :  { %6078 = vst [vmem:[%s9605_s13 + $0x50] sm:$0xff] %v6046_v50  ;;  %v6049_v31 = vadd.f32 %v6975_v22, %v6715_v15  ;;  %v6040_v54 = vpop.f32.mrb[139].mxu1 }
 0x831   :  { %6076 = vst [vmem:[%s9605_s13 + $0x40] sm:$0xff] %v6038_v25  ;;  %v6041_v32 = vadd.f32 %v6715_v15, %v6040_v54 }
 0x832   :  { %6079 = vst [vmem:[%s9605_s13 + $0x58] sm:$0xff] %v6049_v31 }
 0x833   :  { %6077 = vst [vmem:[%s9605_s13 + $0x48] sm:$0xff] %v6041_v32 }
 0x83d   :  { %v6978_v3 = vpop.f32.mrb[140].mxu1 }
 0x83e   :  { %v6062_v63 = vadd.f32 %v6978_v3, %v6715_v15  ;;  %v6053_v49 = vpop.f32.mrb[141].mxu1 }
 0x83f   :  { %v6054_v26 = vadd.f32 %v6715_v15, %v6053_v49  ;;  %v6979_v27 = vpop.f32.mrb[142].mxu1 }
 0x840   :  { %6082 = vst [vmem:[%s9605_s13 + $0x70] sm:$0xff] %v6062_v63  ;;  %v6065_v39 = vadd.f32 %v6979_v27, %v6715_v15  ;;  %v6056_v35 = vpop.f32.mrb[143].mxu1 }
 0x841   :  { %6080 = vst [vmem:[%s9605_s13 + $0x60] sm:$0xff] %v6054_v26  ;;  %v6057_v46 = vadd.f32 %v6715_v15, %v6056_v35 }
 0x842   :  { %6083 = vst [vmem:[%s9605_s13 + $0x78] sm:$0xff] %v6065_v39 }
 0x843   :  { %6081 = vst [vmem:[%s9605_s13 + $0x68] sm:$0xff] %v6057_v46 }
 0x844   :  { %6088 = vsyncpa [#allocation3], 1 }
 0x845   :  { %6089 = vsyncpa [#allocation5], 1 }
 0x846   :  { %6090 = vsyncpa [#allocation8], 1 }
 0x847   :  { %6091 = vsyncpa [#allocation11], 1 }
 0x848   :  { %6092 = vsyncpa [#allocation14], 1 }
 0x849   :  { %6093 = vsyncpa [#allocation17], 1 }
 0x84a   :  { %6094 = vsyncpa [#allocation20], 1 }

</bundles_post_ra>
